<compile_context>
chip_gen: v7x
topology: tpu7x:2x2x1
jax: 0.10.0
libtpu: 0.0.40
codegen_flags: <defaults>
</compile_context>

<pallas_src>
import functools

import jax
import jax.numpy as jnp
from jax.experimental import pallas as pl

# ----------------------------- tiny BERT config -----------------------------
VOCAB = 100
VOCAB_PAD = 128            # word table padded to 128 rows for the one-hot matmul
TYPE_VOCAB = 2
MAX_POS = 16
HIDDEN = 128
N_LAYERS = 2
N_HEADS = 2
HEAD_DIM = HIDDEN // N_HEADS          # 64
INTERMEDIATE = 256
LN_EPS = 1e-12
NEG_INF = -1e9


# ------------------------------ in-kernel math -------------------------------
def _erf(x):
    # Abramowitz & Stegun 7.1.26 (|err| <= 1.5e-7): exact-GELU behaviour without
    # relying on a lax.erf lowering inside Mosaic (abs/exp/where/arith only).
    # NOTE: keep the true divide here (approx reciprocal would push erf error to ~1e-3).
    a1, a2, a3, a4, a5 = 0.254829592, -0.284496736, 1.421413741, -1.453152027, 1.061405429
    p = 0.3275911
    ax = jnp.abs(x)
    t = 1.0 / (1.0 + p * ax)
    poly = ((((a5 * t + a4) * t + a3) * t + a2) * t + a1) * t
    e = 1.0 - poly * jnp.exp(-ax * ax)
    return jnp.where(x >= 0, e, -e)


def _gelu_exact(x):
    # HuggingFace BertModel uses exact (erf) GELU, not the tanh approximation.
    return 0.5 * x * (1.0 + _erf(x * 0.7071067811865476))


def _layer_norm(x, g, b):
    # Single pass: E[x] and E[x^2] computed together (independent XLU reductions),
    # gain/shift folded into one x*a + c epilogue.
    m1 = jnp.mean(x, axis=-1, keepdims=True)
    m2 = jnp.mean(x * x, axis=-1, keepdims=True)
    a = g * jax.lax.rsqrt(m2 - m1 * m1 + LN_EPS)
    return x * a + (b - m1 * a)


# ----------------------------- fused encoder kernel ---------------------------
def _encoder_kernel(B, S,
                    ids_ref, tt_ref, amask_ref,
                    word_ref, pos_ref, type_ref, emb_g_ref, emb_b_ref,
                    wqkv_ref, bqkv_ref, wo_ref, bo_ref,
                    ln1_g_ref, ln1_b_ref, w1_ref, b1_ref,
                    w2_ref, b2_ref, ln2_g_ref, ln2_b_ref,
                    pool_w_ref, pool_b_ref,
                    out_ref):
    f32, bf16 = jnp.float32, jnp.bfloat16
    M = B * S
    scale = 1.0 / (HEAD_DIM ** 0.5)

    def matmul(x, w, bias):            # bf16 MXU feed, f32 accumulate
        return jnp.dot(x.astype(bf16), w, preferred_element_type=f32) + bias

    # ---- fused embeddings ----------------------------------------------------
    # word: one-hot [M, VOCAB_PAD] matmul against the padded f32 table (exact select)
    lane_v = jax.lax.broadcasted_iota(jnp.int32, (M, VOCAB_PAD), 1)
    word_onehot = (lane_v == ids_ref[...]).astype(f32)                 # ids_ref: [M, 1]
    emb = jnp.dot(word_onehot, word_ref[...], preferred_element_type=f32)   # [M, H]
    # position: rows 0..S-1 repeated for each batch (static slices + concat)
    emb = emb + jnp.concatenate([pos_ref[0:S, :]] * B, axis=0)
    # token type: TYPE_VOCAB == 2 -> linear blend select
    t = tt_ref[...].astype(f32)                                        # [M, 1]
    emb = emb + (1.0 - t) * type_ref[0:1, :] + t * type_ref[1:2, :]

    x = _layer_norm(emb, emb_g_ref[...], emb_b_ref[...])               # [M, H] f32

    # ---- block-diagonal additive attention bias (shared by all layers) -------
    key_add = (1.0 - amask_ref[...]) * jnp.float32(NEG_INF)            # [1, M]
    kpos = jax.lax.broadcasted_iota(jnp.int32, (1, M), 1)
    bias_rows = []
    for b in range(B):
        in_batch = jnp.logical_and(kpos >= b * S, kpos < (b + 1) * S)
        row = jnp.where(in_batch, key_add, jnp.float32(NEG_INF))       # [1, M]
        bias_rows.append(jnp.broadcast_to(row, (S, M)))
    attn_bias = jnp.concatenate(bias_rows, axis=0)                     # [M, M]

    for l in range(N_LAYERS):                      # fully unrolled (N_LAYERS = 2)
        # ---- self-attention: fused QKV projection; heads = lane slices ----
        qkv = matmul(x, wqkv_ref[l], bqkv_ref[l])                      # [M, 3H]
        q = qkv[:, 0 * HIDDEN:1 * HIDDEN].astype(bf16)
        k = qkv[:, 1 * HIDDEN:2 * HIDDEN].astype(bf16)
        v = qkv[:, 2 * HIDDEN:3 * HIDDEN].astype(bf16)

        ctx_heads = []
        for h in range(N_HEADS):                   # batched over B via attn_bias
            cs = h * HEAD_DIM
            q_h = q[:, cs:cs + HEAD_DIM]
            k_h = k[:, cs:cs + HEAD_DIM]
            v_h = v[:, cs:cs + HEAD_DIM]
            s = jax.lax.dot_general(q_h, k_h, (((1,), (1,)), ((), ())),
                                    preferred_element_type=f32)        # [M, M]
            s = s * scale + attn_bias
            s = s - jnp.max(s, axis=-1, keepdims=True)
            p = jnp.exp(s)
            # approx reciprocal (EUP): ~2^-12 rel err, acceptable for inference.
            p = p * pl.reciprocal(jnp.sum(p, axis=-1, keepdims=True), approx=True)
            ctx_heads.append(jnp.dot(p.astype(bf16), v_h,
                                     preferred_element_type=f32))      # [M, Dh]
        ctx = jnp.concatenate(ctx_heads, axis=1)                       # [M, H] lane-dense

        attn_out = matmul(ctx, wo_ref[l], bo_ref[l])                   # [M, H]
        x = _layer_norm(attn_out + x, ln1_g_ref[l], ln1_b_ref[l])

        # ---- FFN ----
        hdn = _gelu_exact(matmul(x, w1_ref[l], b1_ref[l]))             # [M, I]
        ffn = matmul(hdn, w2_ref[l], b2_ref[l])                        # [M, H]
        x = _layer_norm(ffn + x, ln2_g_ref[l], ln2_b_ref[l])

    # ---- BERT pooler on the B CLS rows only; single lane-dense store ----
    cls = jnp.concatenate([x[b * S:b * S + 1, :] for b in range(B)], axis=0)   # [B, H]
    out_ref[...] = jnp.tanh(matmul(cls, pool_w_ref[...], pool_b_ref[...]))


# --------------------------- parameter construction ---------------------------
def init_params(key):
    def nrm(k, shape):
        return (0.02 * jax.random.normal(k, shape)).astype(jnp.float32)

    keys = iter(jax.random.split(key, 8 + N_LAYERS * 16))
    p = {
        "word_emb": nrm(next(keys), (VOCAB, HIDDEN)),
        "pos_emb": nrm(next(keys), (MAX_POS, HIDDEN)),
        "type_emb": nrm(next(keys), (TYPE_VOCAB, HIDDEN)),
        "emb_ln_g": jnp.ones((HIDDEN,), jnp.float32),
        "emb_ln_b": jnp.zeros((HIDDEN,), jnp.float32),
        "pooler_w": nrm(next(keys), (HIDDEN, HIDDEN)),
        "pooler_b": jnp.zeros((HIDDEN,), jnp.float32),
        "layers": [],
    }
    for _ in range(N_LAYERS):
        p["layers"].append({
            "wq": nrm(next(keys), (HIDDEN, HIDDEN)), "bq": jnp.zeros((HIDDEN,), jnp.float32),
            "wk": nrm(next(keys), (HIDDEN, HIDDEN)), "bk": jnp.zeros((HIDDEN,), jnp.float32),
            "wv": nrm(next(keys), (HIDDEN, HIDDEN)), "bv": jnp.zeros((HIDDEN,), jnp.float32),
            "wo": nrm(next(keys), (HIDDEN, HIDDEN)), "bo": jnp.zeros((HIDDEN,), jnp.float32),
            "ln1_g": jnp.ones((HIDDEN,), jnp.float32), "ln1_b": jnp.zeros((HIDDEN,), jnp.float32),
            "w1": nrm(next(keys), (HIDDEN, INTERMEDIATE)), "b1": jnp.zeros((INTERMEDIATE,), jnp.float32),
            "w2": nrm(next(keys), (INTERMEDIATE, HIDDEN)), "b2": jnp.zeros((HIDDEN,), jnp.float32),
            "ln2_g": jnp.ones((HIDDEN,), jnp.float32), "ln2_b": jnp.zeros((HIDDEN,), jnp.float32),
        })
    return p


def pack_params(params):
    """One-time (outside jit) weight packing: stack per-layer weights ([L, ...]),
    fuse QKV, pad the word table to 128 rows, cast matmul operands to bf16
    (f32 accumulate in-kernel); embedding tables / biases / LN params stay f32."""
    bf16 = jnp.bfloat16
    L = params["layers"]
    stack = lambda name: jnp.stack([lp[name] for lp in L])
    wqkv = jnp.stack([jnp.concatenate([lp["wq"], lp["wk"], lp["wv"]], axis=1) for lp in L])
    bqkv = jnp.stack([jnp.concatenate([lp["bq"], lp["bk"], lp["bv"]]) for lp in L])
    return dict(
        word=jnp.pad(params["word_emb"], ((0, VOCAB_PAD - VOCAB), (0, 0))),   # [128, H] f32
        pos=params["pos_emb"],                                                 # [MAX_POS, H]
        type=params["type_emb"],                                               # [2, H]
        emb_g=params["emb_ln_g"][None, :], emb_b=params["emb_ln_b"][None, :],
        wqkv=wqkv.astype(bf16), bqkv=bqkv[:, None, :],
        wo=stack("wo").astype(bf16), bo=stack("bo")[:, None, :],
        ln1_g=stack("ln1_g")[:, None, :], ln1_b=stack("ln1_b")[:, None, :],
        w1=stack("w1").astype(bf16), b1=stack("b1")[:, None, :],
        w2=stack("w2").astype(bf16), b2=stack("b2")[:, None, :],
        ln2_g=stack("ln2_g")[:, None, :], ln2_b=stack("ln2_b")[:, None, :],
        pool_w=params["pooler_w"].astype(bf16), pool_b=params["pooler_b"][None, :],
    )


# ------------------------------- forward pass --------------------------------
@jax.jit
def addn_encoder_forward(packed, input_ids, attention_mask, token_type_ids):
    B, S = input_ids.shape
    M = B * S

    # Only tiny reshapes of the [B,S] id tensors remain outside the kernel.
    ids = input_ids.reshape(M, 1).astype(jnp.int32)          # word ids, per row
    tt = token_type_ids.reshape(M, 1).astype(jnp.int32)      # token type, per row
    am = attention_mask.reshape(1, M).astype(jnp.float32)    # key validity, per lane

    # Single fused pallas_call: embeddings + N_LAYERS transformer layers + pooler,
    # all weights and activations VMEM-resident.
    return pl.pallas_call(
        functools.partial(_encoder_kernel, B, S),
        out_shape=jax.ShapeDtypeStruct((B, HIDDEN), jnp.float32),
        cost_estimate=pl.CostEstimate(flops=9_300_000,
                                      transcendentals=10_000,
                                      bytes_accessed=650_000),
    )(ids, tt, am,
      packed["word"], packed["pos"], packed["type"], packed["emb_g"], packed["emb_b"],
      packed["wqkv"], packed["bqkv"], packed["wo"], packed["bo"],
      packed["ln1_g"], packed["ln1_b"], packed["w1"], packed["b1"],
      packed["w2"], packed["b2"], packed["ln2_g"], packed["ln2_b"],
      packed["pool_w"], packed["pool_b"])


# ----------------------------------- main -------------------------------------
if __name__ == "__main__":
    B, S = 2, 8
    key = jax.random.PRNGKey(0)
    k_ids, k_params = jax.random.split(key)

    input_ids = jax.random.randint(k_ids, (B, S), 0, VOCAB, dtype=jnp.int32)
    attention_mask = jnp.ones((B, S), dtype=jnp.int32)
    token_type_ids = jnp.zeros((B, S), dtype=jnp.int32)

    params = init_params(k_params)
    packed = jax.tree_util.tree_map(jax.block_until_ready, pack_params(params))  # once, outside jit

    out = addn_encoder_forward(packed, input_ids, attention_mask, token_type_ids)
    out = jax.block_until_ready(out)
    assert out.shape == (B, HIDDEN) and out.dtype == jnp.float32
    assert bool(jnp.all(jnp.isfinite(out)))
    print("KERNEL_OK")
</pallas_src>

<mosaic_0001>
module attributes {stable_mosaic.version = 11 : i64} {
  func.func @_encoder_kernel(%arg0: memref<16x1xi32, #tpu.memory_space<vmem>>, %arg1: memref<16x1xi32, #tpu.memory_space<vmem>>, %arg2: memref<1x16xf32, #tpu.memory_space<vmem>>, %arg3: memref<128x128xf32, #tpu.memory_space<vmem>>, %arg4: memref<16x128xf32, #tpu.memory_space<vmem>>, %arg5: memref<2x128xf32, #tpu.memory_space<vmem>>, %arg6: memref<1x128xf32, #tpu.memory_space<vmem>>, %arg7: memref<1x128xf32, #tpu.memory_space<vmem>>, %arg8: memref<2x128x384xbf16, #tpu.memory_space<vmem>>, %arg9: memref<2x1x384xf32, #tpu.memory_space<vmem>>, %arg10: memref<2x128x128xbf16, #tpu.memory_space<vmem>>, %arg11: memref<2x1x128xf32, #tpu.memory_space<vmem>>, %arg12: memref<2x1x128xf32, #tpu.memory_space<vmem>>, %arg13: memref<2x1x128xf32, #tpu.memory_space<vmem>>, %arg14: memref<2x128x256xbf16, #tpu.memory_space<vmem>>, %arg15: memref<2x1x256xf32, #tpu.memory_space<vmem>>, %arg16: memref<2x256x128xbf16, #tpu.memory_space<vmem>>, %arg17: memref<2x1x128xf32, #tpu.memory_space<vmem>>, %arg18: memref<2x1x128xf32, #tpu.memory_space<vmem>>, %arg19: memref<2x1x128xf32, #tpu.memory_space<vmem>>, %arg20: memref<128x128xbf16, #tpu.memory_space<vmem>>, %arg21: memref<1x128xf32, #tpu.memory_space<vmem>>, %arg22: memref<2x128xf32, #tpu.memory_space<vmem>>) attributes {dimension_semantics = [], scalar_prefetch = 0 : i64, scratch_operands = 0 : i64, tpu.core_type = #tpu.core_type<tc>} {
    %0 = tpu.iota {dimensions = array<i32: 1>} : vector<16x128xi32>
    %c0 = arith.constant 0 : index
    %c0_0 = arith.constant 0 : index
    %1 = vector.load %arg0[%c0, %c0_0] : memref<16x1xi32, #tpu.memory_space<vmem>>, vector<16x1xi32>
    %2 = vector.broadcast %1 : vector<16x1xi32> to vector<16x128xi32>
    %3 = arith.cmpi eq, %0, %2 : vector<16x128xi32>
    %4 = arith.extui %3 : vector<16x128xi1> to vector<16x128xi32>
    %5 = arith.sitofp %4 : vector<16x128xi32> to vector<16x128xf32>
    %c0_1 = arith.constant 0 : index
    %c0_2 = arith.constant 0 : index
    %6 = vector.load %arg3[%c0_1, %c0_2] : memref<128x128xf32, #tpu.memory_space<vmem>>, vector<128x128xf32>
    %cst = arith.constant dense<0.000000e+00> : vector<16x128xf32>
    %7 = tpu.matmul %5, %6, %cst {dimension_numbers = #tpu.dot_dimension_numbers<[1], [0], [0], [1], [0, 0, 1, 1], [], []>} : vector<16x128xf32>, vector<128x128xf32>, vector<16x128xf32> -> vector<16x128xf32>
    %c0_3 = arith.constant 0 : index
    %c0_4 = arith.constant 0 : index
    %8 = vector.load %arg4[%c0_3, %c0_4] : memref<16x128xf32, #tpu.memory_space<vmem>>, vector<8x128xf32>
    %9 = tpu.concatenate %8, %8 in 0 : vector<8x128xf32>, vector<8x128xf32> -> vector<16x128xf32>
    %10 = arith.addf %7, %9 : vector<16x128xf32>
    %c0_5 = arith.constant 0 : index
    %c0_6 = arith.constant 0 : index
    %11 = vector.load %arg1[%c0_5, %c0_6] : memref<16x1xi32, #tpu.memory_space<vmem>>, vector<16x1xi32>
    %12 = arith.sitofp %11 : vector<16x1xi32> to vector<16x1xf32>
    %cst_7 = arith.constant 1.000000e+00 : f32
    %13 = vector.broadcast %cst_7 : f32 to vector<16x1xf32>
    %14 = arith.subf %13, %12 : vector<16x1xf32>
    %c0_8 = arith.constant 0 : index
    %c0_9 = arith.constant 0 : index
    %15 = vector.load %arg5[%c0_8, %c0_9] : memref<2x128xf32, #tpu.memory_space<vmem>>, vector<1x128xf32>
    %16 = vector.broadcast %14 : vector<16x1xf32> to vector<16x128xf32>
    %17 = vector.broadcast %15 : vector<1x128xf32> to vector<16x128xf32>
    %18 = arith.mulf %16, %17 : vector<16x128xf32>
    %19 = arith.addf %10, %18 : vector<16x128xf32>
    %c1 = arith.constant 1 : index
    %c0_10 = arith.constant 0 : index
    %20 = vector.load %arg5[%c1, %c0_10] : memref<2x128xf32, #tpu.memory_space<vmem>>, vector<1x128xf32>
    %21 = vector.broadcast %12 : vector<16x1xf32> to vector<16x128xf32>
    %22 = vector.broadcast %20 : vector<1x128xf32> to vector<16x128xf32>
    %23 = arith.mulf %21, %22 : vector<16x128xf32>
    %24 = arith.addf %19, %23 : vector<16x128xf32>
    %c0_11 = arith.constant 0 : index
    %c0_12 = arith.constant 0 : index
    %25 = vector.load %arg6[%c0_11, %c0_12] : memref<1x128xf32, #tpu.memory_space<vmem>>, vector<1x128xf32>
    %c0_13 = arith.constant 0 : index
    %c0_14 = arith.constant 0 : index
    %26 = vector.load %arg7[%c0_13, %c0_14] : memref<1x128xf32, #tpu.memory_space<vmem>>, vector<1x128xf32>
    %cst_15 = arith.constant dense<0.000000e+00> : vector<16xf32>
    %27 = vector.multi_reduction <add>, %24, %cst_15 [1] : vector<16x128xf32> to vector<16xf32>
    %28 = vector.shape_cast %27 : vector<16xf32> to vector<16x1xf32>
    %cst_16 = arith.constant 1.280000e+02 : f32
    %29 = vector.broadcast %cst_16 : f32 to vector<16x1xf32>
    %30 = arith.divf %28, %29 : vector<16x1xf32>
    %31 = arith.mulf %24, %24 : vector<16x128xf32>
    %cst_17 = arith.constant dense<0.000000e+00> : vector<16xf32>
    %32 = vector.multi_reduction <add>, %31, %cst_17 [1] : vector<16x128xf32> to vector<16xf32>
    %33 = vector.shape_cast %32 : vector<16xf32> to vector<16x1xf32>
    %cst_18 = arith.constant 1.280000e+02 : f32
    %34 = vector.broadcast %cst_18 : f32 to vector<16x1xf32>
    %35 = arith.divf %33, %34 : vector<16x1xf32>
    %36 = arith.mulf %30, %30 : vector<16x1xf32>
    %37 = arith.subf %35, %36 : vector<16x1xf32>
    %cst_19 = arith.constant 9.99999996E-13 : f32
    %38 = vector.broadcast %cst_19 : f32 to vector<16x1xf32>
    %39 = arith.addf %37, %38 : vector<16x1xf32>
    %40 = math.rsqrt %39 : vector<16x1xf32>
    %41 = vector.broadcast %25 : vector<1x128xf32> to vector<16x128xf32>
    %42 = vector.broadcast %40 : vector<16x1xf32> to vector<16x128xf32>
    %43 = arith.mulf %41, %42 : vector<16x128xf32>
    %44 = arith.mulf %24, %43 : vector<16x128xf32>
    %45 = vector.broadcast %30 : vector<16x1xf32> to vector<16x128xf32>
    %46 = arith.mulf %45, %43 : vector<16x128xf32>
    %47 = vector.broadcast %26 : vector<1x128xf32> to vector<16x128xf32>
    %48 = arith.subf %47, %46 : vector<16x128xf32>
    %49 = arith.addf %44, %48 : vector<16x128xf32>
    %c0_20 = arith.constant 0 : index
    %c0_21 = arith.constant 0 : index
    %50 = vector.load %arg2[%c0_20, %c0_21] : memref<1x16xf32, #tpu.memory_space<vmem>>, vector<1x16xf32>
    %cst_22 = arith.constant 1.000000e+00 : f32
    %51 = vector.broadcast %cst_22 : f32 to vector<1x16xf32>
    %52 = arith.subf %51, %50 : vector<1x16xf32>
    %cst_23 = arith.constant -1.000000e+09 : f32
    %53 = vector.broadcast %cst_23 : f32 to vector<1x16xf32>
    %54 = arith.mulf %52, %53 : vector<1x16xf32>
    %55 = tpu.iota {dimensions = array<i32: 1>} : vector<1x16xi32>
    %c0_i32 = arith.constant 0 : i32
    %56 = vector.broadcast %c0_i32 : i32 to vector<1x16xi32>
    %57 = arith.cmpi sge, %55, %56 : vector<1x16xi32>
    %c8_i32 = arith.constant 8 : i32
    %58 = vector.broadcast %c8_i32 : i32 to vector<1x16xi32>
    %59 = arith.cmpi slt, %55, %58 : vector<1x16xi32>
    %60 = arith.andi %57, %59 : vector<1x16xi1>
    %cst_24 = arith.constant -1.000000e+09 : f32
    %61 = vector.broadcast %cst_24 : f32 to vector<1x16xf32>
    %62 = arith.select %60, %54, %61 : vector<1x16xi1>, vector<1x16xf32>
    %63 = vector.shape_cast %62 : vector<1x16xf32> to vector<1x16xf32>
    %64 = vector.broadcast %63 : vector<1x16xf32> to vector<8x16xf32>
    %c8_i32_25 = arith.constant 8 : i32
    %65 = vector.broadcast %c8_i32_25 : i32 to vector<1x16xi32>
    %66 = arith.cmpi sge, %55, %65 : vector<1x16xi32>
    %c16_i32 = arith.constant 16 : i32
    %67 = vector.broadcast %c16_i32 : i32 to vector<1x16xi32>
    %68 = arith.cmpi slt, %55, %67 : vector<1x16xi32>
    %69 = arith.andi %66, %68 : vector<1x16xi1>
    %cst_26 = arith.constant -1.000000e+09 : f32
    %70 = vector.broadcast %cst_26 : f32 to vector<1x16xf32>
    %71 = arith.select %69, %54, %70 : vector<1x16xi1>, vector<1x16xf32>
    %72 = vector.shape_cast %71 : vector<1x16xf32> to vector<1x16xf32>
    %73 = vector.broadcast %72 : vector<1x16xf32> to vector<8x16xf32>
    %74 = tpu.concatenate %64, %73 in 0 : vector<8x16xf32>, vector<8x16xf32> -> vector<16x16xf32>
    %c0_27 = arith.constant 0 : index
    %c0_28 = arith.constant 0 : index
    %c0_29 = arith.constant 0 : index
    %75 = vector.load %arg8[%c0_27, %c0_28, %c0_29] : memref<2x128x384xbf16, #tpu.memory_space<vmem>>, vector<1x128x384xbf16>
    %76 = vector.shape_cast %75 : vector<1x128x384xbf16> to vector<128x384xbf16>
    %c0_30 = arith.constant 0 : index
    %c0_31 = arith.constant 0 : index
    %c0_32 = arith.constant 0 : index
    %77 = vector.load %arg9[%c0_30, %c0_31, %c0_32] : memref<2x1x384xf32, #tpu.memory_space<vmem>>, vector<1x1x384xf32>
    %78 = vector.shape_cast %77 : vector<1x1x384xf32> to vector<1x384xf32>
    %79 = arith.truncf %49 : vector<16x128xf32> to vector<16x128xbf16>
    %cst_33 = arith.constant dense<0.000000e+00> : vector<16x384xf32>
    %80 = tpu.matmul %79, %76, %cst_33 {dimension_numbers = #tpu.dot_dimension_numbers<[1], [0], [0], [1], [0, 0, 1, 1], [], []>} : vector<16x128xbf16>, vector<128x384xbf16>, vector<16x384xf32> -> vector<16x384xf32>
    %81 = vector.broadcast %78 : vector<1x384xf32> to vector<16x384xf32>
    %82 = arith.addf %80, %81 : vector<16x384xf32>
    %83 = vector.extract_strided_slice %82 {offsets = [0, 0], sizes = [16, 128], strides = [1, 1]} : vector<16x384xf32> to vector<16x128xf32>
    %84 = arith.truncf %83 : vector<16x128xf32> to vector<16x128xbf16>
    %85 = vector.extract_strided_slice %82 {offsets = [0, 128], sizes = [16, 128], strides = [1, 1]} : vector<16x384xf32> to vector<16x128xf32>
    %86 = arith.truncf %85 : vector<16x128xf32> to vector<16x128xbf16>
    %87 = vector.extract_strided_slice %82 {offsets = [0, 256], sizes = [16, 128], strides = [1, 1]} : vector<16x384xf32> to vector<16x128xf32>
    %88 = arith.truncf %87 : vector<16x128xf32> to vector<16x128xbf16>
    %89 = vector.extract_strided_slice %84 {offsets = [0, 0], sizes = [16, 64], strides = [1, 1]} : vector<16x128xbf16> to vector<16x64xbf16>
    %90 = vector.extract_strided_slice %86 {offsets = [0, 0], sizes = [16, 64], strides = [1, 1]} : vector<16x128xbf16> to vector<16x64xbf16>
    %91 = vector.extract_strided_slice %88 {offsets = [0, 0], sizes = [16, 64], strides = [1, 1]} : vector<16x128xbf16> to vector<16x64xbf16>
    %cst_34 = arith.constant dense<0.000000e+00> : vector<16x16xf32>
    %92 = tpu.matmul %89, %90, %cst_34 {dimension_numbers = #tpu.dot_dimension_numbers<[1], [1], [0], [0], [0, 0, 1, 0], [], []>} : vector<16x64xbf16>, vector<16x64xbf16>, vector<16x16xf32> -> vector<16x16xf32>
    %cst_35 = arith.constant 1.250000e-01 : f32
    %93 = vector.broadcast %cst_35 : f32 to vector<16x16xf32>
    %94 = arith.mulf %92, %93 : vector<16x16xf32>
    %95 = arith.addf %94, %74 : vector<16x16xf32>
    %cst_36 = arith.constant dense<0xFF800000> : vector<16xf32>
    %96 = vector.multi_reduction <maximumf>, %95, %cst_36 [1] : vector<16x16xf32> to vector<16xf32>
    %97 = vector.shape_cast %96 : vector<16xf32> to vector<16x1xf32>
    %98 = vector.broadcast %97 : vector<16x1xf32> to vector<16x16xf32>
    %99 = arith.subf %95, %98 : vector<16x16xf32>
    %100 = math.exp %99 : vector<16x16xf32>
    %cst_37 = arith.constant dense<0.000000e+00> : vector<16xf32>
    %101 = vector.multi_reduction <add>, %100, %cst_37 [1] : vector<16x16xf32> to vector<16xf32>
    %102 = vector.shape_cast %101 : vector<16xf32> to vector<16x1xf32>
    %103 = tpu.reciprocal %102 {approx = true} : vector<16x1xf32> -> vector<16x1xf32>
    %104 = vector.broadcast %103 : vector<16x1xf32> to vector<16x16xf32>
    %105 = arith.mulf %100, %104 : vector<16x16xf32>
    %106 = arith.truncf %105 : vector<16x16xf32> to vector<16x16xbf16>
    %cst_38 = arith.constant dense<0.000000e+00> : vector<16x64xf32>
    %107 = tpu.matmul %106, %91, %cst_38 {dimension_numbers = #tpu.dot_dimension_numbers<[1], [0], [0], [1], [0, 0, 1, 1], [], []>} : vector<16x16xbf16>, vector<16x64xbf16>, vector<16x64xf32> -> vector<16x64xf32>
    %108 = vector.extract_strided_slice %84 {offsets = [0, 64], sizes = [16, 64], strides = [1, 1]} : vector<16x128xbf16> to vector<16x64xbf16>
    %109 = vector.extract_strided_slice %86 {offsets = [0, 64], sizes = [16, 64], strides = [1, 1]} : vector<16x128xbf16> to vector<16x64xbf16>
    %110 = vector.extract_strided_slice %88 {offsets = [0, 64], sizes = [16, 64], strides = [1, 1]} : vector<16x128xbf16> to vector<16x64xbf16>
    %cst_39 = arith.constant dense<0.000000e+00> : vector<16x16xf32>
    %111 = tpu.matmul %108, %109, %cst_39 {dimension_numbers = #tpu.dot_dimension_numbers<[1], [1], [0], [0], [0, 0, 1, 0], [], []>} : vector<16x64xbf16>, vector<16x64xbf16>, vector<16x16xf32> -> vector<16x16xf32>
    %cst_40 = arith.constant 1.250000e-01 : f32
    %112 = vector.broadcast %cst_40 : f32 to vector<16x16xf32>
    %113 = arith.mulf %111, %112 : vector<16x16xf32>
    %114 = arith.addf %113, %74 : vector<16x16xf32>
    %cst_41 = arith.constant dense<0xFF800000> : vector<16xf32>
    %115 = vector.multi_reduction <maximumf>, %114, %cst_41 [1] : vector<16x16xf32> to vector<16xf32>
    %116 = vector.shape_cast %115 : vector<16xf32> to vector<16x1xf32>
    %117 = vector.broadcast %116 : vector<16x1xf32> to vector<16x16xf32>
    %118 = arith.subf %114, %117 : vector<16x16xf32>
    %119 = math.exp %118 : vector<16x16xf32>
    %cst_42 = arith.constant dense<0.000000e+00> : vector<16xf32>
    %120 = vector.multi_reduction <add>, %119, %cst_42 [1] : vector<16x16xf32> to vector<16xf32>
    %121 = vector.shape_cast %120 : vector<16xf32> to vector<16x1xf32>
    %122 = tpu.reciprocal %121 {approx = true} : vector<16x1xf32> -> vector<16x1xf32>
    %123 = vector.broadcast %122 : vector<16x1xf32> to vector<16x16xf32>
    %124 = arith.mulf %119, %123 : vector<16x16xf32>
    %125 = arith.truncf %124 : vector<16x16xf32> to vector<16x16xbf16>
    %cst_43 = arith.constant dense<0.000000e+00> : vector<16x64xf32>
    %126 = tpu.matmul %125, %110, %cst_43 {dimension_numbers = #tpu.dot_dimension_numbers<[1], [0], [0], [1], [0, 0, 1, 1], [], []>} : vector<16x16xbf16>, vector<16x64xbf16>, vector<16x64xf32> -> vector<16x64xf32>
    %127 = tpu.concatenate %107, %126 in 1 : vector<16x64xf32>, vector<16x64xf32> -> vector<16x128xf32>
    %c0_44 = arith.constant 0 : index
    %c0_45 = arith.constant 0 : index
    %c0_46 = arith.constant 0 : index
    %128 = vector.load %arg10[%c0_44, %c0_45, %c0_46] : memref<2x128x128xbf16, #tpu.memory_space<vmem>>, vector<1x128x128xbf16>
    %129 = vector.shape_cast %128 : vector<1x128x128xbf16> to vector<128x128xbf16>
    %c0_47 = arith.constant 0 : index
    %c0_48 = arith.constant 0 : index
    %c0_49 = arith.constant 0 : index
    %130 = vector.load %arg11[%c0_47, %c0_48, %c0_49] : memref<2x1x128xf32, #tpu.memory_space<vmem>>, vector<1x1x128xf32>
    %131 = vector.shape_cast %130 : vector<1x1x128xf32> to vector<1x128xf32>
    %132 = arith.truncf %127 : vector<16x128xf32> to vector<16x128xbf16>
    %cst_50 = arith.constant dense<0.000000e+00> : vector<16x128xf32>
    %133 = tpu.matmul %132, %129, %cst_50 {dimension_numbers = #tpu.dot_dimension_numbers<[1], [0], [0], [1], [0, 0, 1, 1], [], []>} : vector<16x128xbf16>, vector<128x128xbf16>, vector<16x128xf32> -> vector<16x128xf32>
    %134 = vector.broadcast %131 : vector<1x128xf32> to vector<16x128xf32>
    %135 = arith.addf %133, %134 : vector<16x128xf32>
    %136 = arith.addf %135, %49 : vector<16x128xf32>
    %c0_51 = arith.constant 0 : index
    %c0_52 = arith.constant 0 : index
    %c0_53 = arith.constant 0 : index
    %137 = vector.load %arg12[%c0_51, %c0_52, %c0_53] : memref<2x1x128xf32, #tpu.memory_space<vmem>>, vector<1x1x128xf32>
    %138 = vector.shape_cast %137 : vector<1x1x128xf32> to vector<1x128xf32>
    %c0_54 = arith.constant 0 : index
    %c0_55 = arith.constant 0 : index
    %c0_56 = arith.constant 0 : index
    %139 = vector.load %arg13[%c0_54, %c0_55, %c0_56] : memref<2x1x128xf32, #tpu.memory_space<vmem>>, vector<1x1x128xf32>
    %140 = vector.shape_cast %139 : vector<1x1x128xf32> to vector<1x128xf32>
    %cst_57 = arith.constant dense<0.000000e+00> : vector<16xf32>
    %141 = vector.multi_reduction <add>, %136, %cst_57 [1] : vector<16x128xf32> to vector<16xf32>
    %142 = vector.shape_cast %141 : vector<16xf32> to vector<16x1xf32>
    %cst_58 = arith.constant 1.280000e+02 : f32
    %143 = vector.broadcast %cst_58 : f32 to vector<16x1xf32>
    %144 = arith.divf %142, %143 : vector<16x1xf32>
    %145 = arith.mulf %136, %136 : vector<16x128xf32>
    %cst_59 = arith.constant dense<0.000000e+00> : vector<16xf32>
    %146 = vector.multi_reduction <add>, %145, %cst_59 [1] : vector<16x128xf32> to vector<16xf32>
    %147 = vector.shape_cast %146 : vector<16xf32> to vector<16x1xf32>
    %cst_60 = arith.constant 1.280000e+02 : f32
    %148 = vector.broadcast %cst_60 : f32 to vector<16x1xf32>
    %149 = arith.divf %147, %148 : vector<16x1xf32>
    %150 = arith.mulf %144, %144 : vector<16x1xf32>
    %151 = arith.subf %149, %150 : vector<16x1xf32>
    %cst_61 = arith.constant 9.99999996E-13 : f32
    %152 = vector.broadcast %cst_61 : f32 to vector<16x1xf32>
    %153 = arith.addf %151, %152 : vector<16x1xf32>
    %154 = math.rsqrt %153 : vector<16x1xf32>
    %155 = vector.broadcast %138 : vector<1x128xf32> to vector<16x128xf32>
    %156 = vector.broadcast %154 : vector<16x1xf32> to vector<16x128xf32>
    %157 = arith.mulf %155, %156 : vector<16x128xf32>
    %158 = arith.mulf %136, %157 : vector<16x128xf32>
    %159 = vector.broadcast %144 : vector<16x1xf32> to vector<16x128xf32>
    %160 = arith.mulf %159, %157 : vector<16x128xf32>
    %161 = vector.broadcast %140 : vector<1x128xf32> to vector<16x128xf32>
    %162 = arith.subf %161, %160 : vector<16x128xf32>
    %163 = arith.addf %158, %162 : vector<16x128xf32>
    %c0_62 = arith.constant 0 : index
    %c0_63 = arith.constant 0 : index
    %c0_64 = arith.constant 0 : index
    %164 = vector.load %arg14[%c0_62, %c0_63, %c0_64] : memref<2x128x256xbf16, #tpu.memory_space<vmem>>, vector<1x128x256xbf16>
    %165 = vector.shape_cast %164 : vector<1x128x256xbf16> to vector<128x256xbf16>
    %c0_65 = arith.constant 0 : index
    %c0_66 = arith.constant 0 : index
    %c0_67 = arith.constant 0 : index
    %166 = vector.load %arg15[%c0_65, %c0_66, %c0_67] : memref<2x1x256xf32, #tpu.memory_space<vmem>>, vector<1x1x256xf32>
    %167 = vector.shape_cast %166 : vector<1x1x256xf32> to vector<1x256xf32>
    %168 = arith.truncf %163 : vector<16x128xf32> to vector<16x128xbf16>
    %cst_68 = arith.constant dense<0.000000e+00> : vector<16x256xf32>
    %169 = tpu.matmul %168, %165, %cst_68 {dimension_numbers = #tpu.dot_dimension_numbers<[1], [0], [0], [1], [0, 0, 1, 1], [], []>} : vector<16x128xbf16>, vector<128x256xbf16>, vector<16x256xf32> -> vector<16x256xf32>
    %170 = vector.broadcast %167 : vector<1x256xf32> to vector<16x256xf32>
    %171 = arith.addf %169, %170 : vector<16x256xf32>
    %cst_69 = arith.constant 5.000000e-01 : f32
    %172 = vector.broadcast %cst_69 : f32 to vector<16x256xf32>
    %173 = arith.mulf %172, %171 : vector<16x256xf32>
    %cst_70 = arith.constant 0.707106769 : f32
    %174 = vector.broadcast %cst_70 : f32 to vector<16x256xf32>
    %175 = arith.mulf %171, %174 : vector<16x256xf32>
    %176 = math.absf %175 : vector<16x256xf32>
    %cst_71 = arith.constant 0.327591091 : f32
    %177 = vector.broadcast %cst_71 : f32 to vector<16x256xf32>
    %178 = arith.mulf %177, %176 : vector<16x256xf32>
    %cst_72 = arith.constant 1.000000e+00 : f32
    %179 = vector.broadcast %cst_72 : f32 to vector<16x256xf32>
    %180 = arith.addf %179, %178 : vector<16x256xf32>
    %cst_73 = arith.constant 1.000000e+00 : f32
    %181 = vector.broadcast %cst_73 : f32 to vector<16x256xf32>
    %182 = arith.divf %181, %180 : vector<16x256xf32>
    %cst_74 = arith.constant 1.06140542 : f32
    %183 = vector.broadcast %cst_74 : f32 to vector<16x256xf32>
    %184 = arith.mulf %183, %182 : vector<16x256xf32>
    %cst_75 = arith.constant -1.45315206 : f32
    %185 = vector.broadcast %cst_75 : f32 to vector<16x256xf32>
    %186 = arith.addf %184, %185 : vector<16x256xf32>
    %187 = arith.mulf %186, %182 : vector<16x256xf32>
    %cst_76 = arith.constant 1.42141378 : f32
    %188 = vector.broadcast %cst_76 : f32 to vector<16x256xf32>
    %189 = arith.addf %187, %188 : vector<16x256xf32>
    %190 = arith.mulf %189, %182 : vector<16x256xf32>
    %cst_77 = arith.constant -0.284496725 : f32
    %191 = vector.broadcast %cst_77 : f32 to vector<16x256xf32>
    %192 = arith.addf %190, %191 : vector<16x256xf32>
    %193 = arith.mulf %192, %182 : vector<16x256xf32>
    %cst_78 = arith.constant 0.254829586 : f32
    %194 = vector.broadcast %cst_78 : f32 to vector<16x256xf32>
    %195 = arith.addf %193, %194 : vector<16x256xf32>
    %196 = arith.mulf %195, %182 : vector<16x256xf32>
    %cst_79 = arith.constant 0.000000e+00 : f32
    %197 = vector.broadcast %cst_79 : f32 to vector<16x256xf32>
    %198 = arith.subf %197, %176 : vector<16x256xf32>
    %199 = arith.mulf %198, %176 : vector<16x256xf32>
    %200 = math.exp %199 : vector<16x256xf32>
    %201 = arith.mulf %196, %200 : vector<16x256xf32>
    %cst_80 = arith.constant 1.000000e+00 : f32
    %202 = vector.broadcast %cst_80 : f32 to vector<16x256xf32>
    %203 = arith.subf %202, %201 : vector<16x256xf32>
    %cst_81 = arith.constant 0.000000e+00 : f32
    %204 = vector.broadcast %cst_81 : f32 to vector<16x256xf32>
    %205 = arith.cmpf oge, %175, %204 : vector<16x256xf32>
    %cst_82 = arith.constant 0.000000e+00 : f32
    %206 = vector.broadcast %cst_82 : f32 to vector<16x256xf32>
    %207 = arith.subf %206, %203 : vector<16x256xf32>
    %208 = arith.select %205, %203, %207 : vector<16x256xi1>, vector<16x256xf32>
    %cst_83 = arith.constant 1.000000e+00 : f32
    %209 = vector.broadcast %cst_83 : f32 to vector<16x256xf32>
    %210 = arith.addf %209, %208 : vector<16x256xf32>
    %211 = arith.mulf %173, %210 : vector<16x256xf32>
    %c0_84 = arith.constant 0 : index
    %c0_85 = arith.constant 0 : index
    %c0_86 = arith.constant 0 : index
    %212 = vector.load %arg16[%c0_84, %c0_85, %c0_86] : memref<2x256x128xbf16, #tpu.memory_space<vmem>>, vector<1x256x128xbf16>
    %213 = vector.shape_cast %212 : vector<1x256x128xbf16> to vector<256x128xbf16>
    %c0_87 = arith.constant 0 : index
    %c0_88 = arith.constant 0 : index
    %c0_89 = arith.constant 0 : index
    %214 = vector.load %arg17[%c0_87, %c0_88, %c0_89] : memref<2x1x128xf32, #tpu.memory_space<vmem>>, vector<1x1x128xf32>
    %215 = vector.shape_cast %214 : vector<1x1x128xf32> to vector<1x128xf32>
    %216 = arith.truncf %211 : vector<16x256xf32> to vector<16x256xbf16>
    %cst_90 = arith.constant dense<0.000000e+00> : vector<16x128xf32>
    %217 = tpu.matmul %216, %213, %cst_90 {dimension_numbers = #tpu.dot_dimension_numbers<[1], [0], [0], [1], [0, 0, 1, 1], [], []>} : vector<16x256xbf16>, vector<256x128xbf16>, vector<16x128xf32> -> vector<16x128xf32>
    %218 = vector.broadcast %215 : vector<1x128xf32> to vector<16x128xf32>
    %219 = arith.addf %217, %218 : vector<16x128xf32>
    %220 = arith.addf %219, %163 : vector<16x128xf32>
    %c0_91 = arith.constant 0 : index
    %c0_92 = arith.constant 0 : index
    %c0_93 = arith.constant 0 : index
    %221 = vector.load %arg18[%c0_91, %c0_92, %c0_93] : memref<2x1x128xf32, #tpu.memory_space<vmem>>, vector<1x1x128xf32>
    %222 = vector.shape_cast %221 : vector<1x1x128xf32> to vector<1x128xf32>
    %c0_94 = arith.constant 0 : index
    %c0_95 = arith.constant 0 : index
    %c0_96 = arith.constant 0 : index
    %223 = vector.load %arg19[%c0_94, %c0_95, %c0_96] : memref<2x1x128xf32, #tpu.memory_space<vmem>>, vector<1x1x128xf32>
    %224 = vector.shape_cast %223 : vector<1x1x128xf32> to vector<1x128xf32>
    %cst_97 = arith.constant dense<0.000000e+00> : vector<16xf32>
    %225 = vector.multi_reduction <add>, %220, %cst_97 [1] : vector<16x128xf32> to vector<16xf32>
    %226 = vector.shape_cast %225 : vector<16xf32> to vector<16x1xf32>
    %cst_98 = arith.constant 1.280000e+02 : f32
    %227 = vector.broadcast %cst_98 : f32 to vector<16x1xf32>
    %228 = arith.divf %226, %227 : vector<16x1xf32>
    %229 = arith.mulf %220, %220 : vector<16x128xf32>
    %cst_99 = arith.constant dense<0.000000e+00> : vector<16xf32>
    %230 = vector.multi_reduction <add>, %229, %cst_99 [1] : vector<16x128xf32> to vector<16xf32>
    %231 = vector.shape_cast %230 : vector<16xf32> to vector<16x1xf32>
    %cst_100 = arith.constant 1.280000e+02 : f32
    %232 = vector.broadcast %cst_100 : f32 to vector<16x1xf32>
    %233 = arith.divf %231, %232 : vector<16x1xf32>
    %234 = arith.mulf %228, %228 : vector<16x1xf32>
    %235 = arith.subf %233, %234 : vector<16x1xf32>
    %cst_101 = arith.constant 9.99999996E-13 : f32
    %236 = vector.broadcast %cst_101 : f32 to vector<16x1xf32>
    %237 = arith.addf %235, %236 : vector<16x1xf32>
    %238 = math.rsqrt %237 : vector<16x1xf32>
    %239 = vector.broadcast %222 : vector<1x128xf32> to vector<16x128xf32>
    %240 = vector.broadcast %238 : vector<16x1xf32> to vector<16x128xf32>
    %241 = arith.mulf %239, %240 : vector<16x128xf32>
    %242 = arith.mulf %220, %241 : vector<16x128xf32>
    %243 = vector.broadcast %228 : vector<16x1xf32> to vector<16x128xf32>
    %244 = arith.mulf %243, %241 : vector<16x128xf32>
    %245 = vector.broadcast %224 : vector<1x128xf32> to vector<16x128xf32>
    %246 = arith.subf %245, %244 : vector<16x128xf32>
    %247 = arith.addf %242, %246 : vector<16x128xf32>
    %c1_102 = arith.constant 1 : index
    %c0_103 = arith.constant 0 : index
    %c0_104 = arith.constant 0 : index
    %248 = vector.load %arg8[%c1_102, %c0_103, %c0_104] : memref<2x128x384xbf16, #tpu.memory_space<vmem>>, vector<1x128x384xbf16>
    %249 = vector.shape_cast %248 : vector<1x128x384xbf16> to vector<128x384xbf16>
    %c1_105 = arith.constant 1 : index
    %c0_106 = arith.constant 0 : index
    %c0_107 = arith.constant 0 : index
    %250 = vector.load %arg9[%c1_105, %c0_106, %c0_107] : memref<2x1x384xf32, #tpu.memory_space<vmem>>, vector<1x1x384xf32>
    %251 = vector.shape_cast %250 : vector<1x1x384xf32> to vector<1x384xf32>
    %252 = arith.truncf %247 : vector<16x128xf32> to vector<16x128xbf16>
    %cst_108 = arith.constant dense<0.000000e+00> : vector<16x384xf32>
    %253 = tpu.matmul %252, %249, %cst_108 {dimension_numbers = #tpu.dot_dimension_numbers<[1], [0], [0], [1], [0, 0, 1, 1], [], []>} : vector<16x128xbf16>, vector<128x384xbf16>, vector<16x384xf32> -> vector<16x384xf32>
    %254 = vector.broadcast %251 : vector<1x384xf32> to vector<16x384xf32>
    %255 = arith.addf %253, %254 : vector<16x384xf32>
    %256 = vector.extract_strided_slice %255 {offsets = [0, 0], sizes = [16, 128], strides = [1, 1]} : vector<16x384xf32> to vector<16x128xf32>
    %257 = arith.truncf %256 : vector<16x128xf32> to vector<16x128xbf16>
    %258 = vector.extract_strided_slice %255 {offsets = [0, 128], sizes = [16, 128], strides = [1, 1]} : vector<16x384xf32> to vector<16x128xf32>
    %259 = arith.truncf %258 : vector<16x128xf32> to vector<16x128xbf16>
    %260 = vector.extract_strided_slice %255 {offsets = [0, 256], sizes = [16, 128], strides = [1, 1]} : vector<16x384xf32> to vector<16x128xf32>
    %261 = arith.truncf %260 : vector<16x128xf32> to vector<16x128xbf16>
    %262 = vector.extract_strided_slice %257 {offsets = [0, 0], sizes = [16, 64], strides = [1, 1]} : vector<16x128xbf16> to vector<16x64xbf16>
    %263 = vector.extract_strided_slice %259 {offsets = [0, 0], sizes = [16, 64], strides = [1, 1]} : vector<16x128xbf16> to vector<16x64xbf16>
    %264 = vector.extract_strided_slice %261 {offsets = [0, 0], sizes = [16, 64], strides = [1, 1]} : vector<16x128xbf16> to vector<16x64xbf16>
    %cst_109 = arith.constant dense<0.000000e+00> : vector<16x16xf32>
    %265 = tpu.matmul %262, %263, %cst_109 {dimension_numbers = #tpu.dot_dimension_numbers<[1], [1], [0], [0], [0, 0, 1, 0], [], []>} : vector<16x64xbf16>, vector<16x64xbf16>, vector<16x16xf32> -> vector<16x16xf32>
    %cst_110 = arith.constant 1.250000e-01 : f32
    %266 = vector.broadcast %cst_110 : f32 to vector<16x16xf32>
    %267 = arith.mulf %265, %266 : vector<16x16xf32>
    %268 = arith.addf %267, %74 : vector<16x16xf32>
    %cst_111 = arith.constant dense<0xFF800000> : vector<16xf32>
    %269 = vector.multi_reduction <maximumf>, %268, %cst_111 [1] : vector<16x16xf32> to vector<16xf32>
    %270 = vector.shape_cast %269 : vector<16xf32> to vector<16x1xf32>
    %271 = vector.broadcast %270 : vector<16x1xf32> to vector<16x16xf32>
    %272 = arith.subf %268, %271 : vector<16x16xf32>
    %273 = math.exp %272 : vector<16x16xf32>
    %cst_112 = arith.constant dense<0.000000e+00> : vector<16xf32>
    %274 = vector.multi_reduction <add>, %273, %cst_112 [1] : vector<16x16xf32> to vector<16xf32>
    %275 = vector.shape_cast %274 : vector<16xf32> to vector<16x1xf32>
    %276 = tpu.reciprocal %275 {approx = true} : vector<16x1xf32> -> vector<16x1xf32>
    %277 = vector.broadcast %276 : vector<16x1xf32> to vector<16x16xf32>
    %278 = arith.mulf %273, %277 : vector<16x16xf32>
    %279 = arith.truncf %278 : vector<16x16xf32> to vector<16x16xbf16>
    %cst_113 = arith.constant dense<0.000000e+00> : vector<16x64xf32>
    %280 = tpu.matmul %279, %264, %cst_113 {dimension_numbers = #tpu.dot_dimension_numbers<[1], [0], [0], [1], [0, 0, 1, 1], [], []>} : vector<16x16xbf16>, vector<16x64xbf16>, vector<16x64xf32> -> vector<16x64xf32>
    %281 = vector.extract_strided_slice %257 {offsets = [0, 64], sizes = [16, 64], strides = [1, 1]} : vector<16x128xbf16> to vector<16x64xbf16>
    %282 = vector.extract_strided_slice %259 {offsets = [0, 64], sizes = [16, 64], strides = [1, 1]} : vector<16x128xbf16> to vector<16x64xbf16>
    %283 = vector.extract_strided_slice %261 {offsets = [0, 64], sizes = [16, 64], strides = [1, 1]} : vector<16x128xbf16> to vector<16x64xbf16>
    %cst_114 = arith.constant dense<0.000000e+00> : vector<16x16xf32>
    %284 = tpu.matmul %281, %282, %cst_114 {dimension_numbers = #tpu.dot_dimension_numbers<[1], [1], [0], [0], [0, 0, 1, 0], [], []>} : vector<16x64xbf16>, vector<16x64xbf16>, vector<16x16xf32> -> vector<16x16xf32>
    %cst_115 = arith.constant 1.250000e-01 : f32
    %285 = vector.broadcast %cst_115 : f32 to vector<16x16xf32>
    %286 = arith.mulf %284, %285 : vector<16x16xf32>
    %287 = arith.addf %286, %74 : vector<16x16xf32>
    %cst_116 = arith.constant dense<0xFF800000> : vector<16xf32>
    %288 = vector.multi_reduction <maximumf>, %287, %cst_116 [1] : vector<16x16xf32> to vector<16xf32>
    %289 = vector.shape_cast %288 : vector<16xf32> to vector<16x1xf32>
    %290 = vector.broadcast %289 : vector<16x1xf32> to vector<16x16xf32>
    %291 = arith.subf %287, %290 : vector<16x16xf32>
    %292 = math.exp %291 : vector<16x16xf32>
    %cst_117 = arith.constant dense<0.000000e+00> : vector<16xf32>
    %293 = vector.multi_reduction <add>, %292, %cst_117 [1] : vector<16x16xf32> to vector<16xf32>
    %294 = vector.shape_cast %293 : vector<16xf32> to vector<16x1xf32>
    %295 = tpu.reciprocal %294 {approx = true} : vector<16x1xf32> -> vector<16x1xf32>
    %296 = vector.broadcast %295 : vector<16x1xf32> to vector<16x16xf32>
    %297 = arith.mulf %292, %296 : vector<16x16xf32>
    %298 = arith.truncf %297 : vector<16x16xf32> to vector<16x16xbf16>
    %cst_118 = arith.constant dense<0.000000e+00> : vector<16x64xf32>
    %299 = tpu.matmul %298, %283, %cst_118 {dimension_numbers = #tpu.dot_dimension_numbers<[1], [0], [0], [1], [0, 0, 1, 1], [], []>} : vector<16x16xbf16>, vector<16x64xbf16>, vector<16x64xf32> -> vector<16x64xf32>
    %300 = tpu.concatenate %280, %299 in 1 : vector<16x64xf32>, vector<16x64xf32> -> vector<16x128xf32>
    %c1_119 = arith.constant 1 : index
    %c0_120 = arith.constant 0 : index
    %c0_121 = arith.constant 0 : index
    %301 = vector.load %arg10[%c1_119, %c0_120, %c0_121] : memref<2x128x128xbf16, #tpu.memory_space<vmem>>, vector<1x128x128xbf16>
    %302 = vector.shape_cast %301 : vector<1x128x128xbf16> to vector<128x128xbf16>
    %c1_122 = arith.constant 1 : index
    %c0_123 = arith.constant 0 : index
    %c0_124 = arith.constant 0 : index
    %303 = vector.load %arg11[%c1_122, %c0_123, %c0_124] : memref<2x1x128xf32, #tpu.memory_space<vmem>>, vector<1x1x128xf32>
    %304 = vector.shape_cast %303 : vector<1x1x128xf32> to vector<1x128xf32>
    %305 = arith.truncf %300 : vector<16x128xf32> to vector<16x128xbf16>
    %cst_125 = arith.constant dense<0.000000e+00> : vector<16x128xf32>
    %306 = tpu.matmul %305, %302, %cst_125 {dimension_numbers = #tpu.dot_dimension_numbers<[1], [0], [0], [1], [0, 0, 1, 1], [], []>} : vector<16x128xbf16>, vector<128x128xbf16>, vector<16x128xf32> -> vector<16x128xf32>
    %307 = vector.broadcast %304 : vector<1x128xf32> to vector<16x128xf32>
    %308 = arith.addf %306, %307 : vector<16x128xf32>
    %309 = arith.addf %308, %247 : vector<16x128xf32>
    %c1_126 = arith.constant 1 : index
    %c0_127 = arith.constant 0 : index
    %c0_128 = arith.constant 0 : index
    %310 = vector.load %arg12[%c1_126, %c0_127, %c0_128] : memref<2x1x128xf32, #tpu.memory_space<vmem>>, vector<1x1x128xf32>
    %311 = vector.shape_cast %310 : vector<1x1x128xf32> to vector<1x128xf32>
    %c1_129 = arith.constant 1 : index
    %c0_130 = arith.constant 0 : index
    %c0_131 = arith.constant 0 : index
    %312 = vector.load %arg13[%c1_129, %c0_130, %c0_131] : memref<2x1x128xf32, #tpu.memory_space<vmem>>, vector<1x1x128xf32>
    %313 = vector.shape_cast %312 : vector<1x1x128xf32> to vector<1x128xf32>
    %cst_132 = arith.constant dense<0.000000e+00> : vector<16xf32>
    %314 = vector.multi_reduction <add>, %309, %cst_132 [1] : vector<16x128xf32> to vector<16xf32>
    %315 = vector.shape_cast %314 : vector<16xf32> to vector<16x1xf32>
    %cst_133 = arith.constant 1.280000e+02 : f32
    %316 = vector.broadcast %cst_133 : f32 to vector<16x1xf32>
    %317 = arith.divf %315, %316 : vector<16x1xf32>
    %318 = arith.mulf %309, %309 : vector<16x128xf32>
    %cst_134 = arith.constant dense<0.000000e+00> : vector<16xf32>
    %319 = vector.multi_reduction <add>, %318, %cst_134 [1] : vector<16x128xf32> to vector<16xf32>
    %320 = vector.shape_cast %319 : vector<16xf32> to vector<16x1xf32>
    %cst_135 = arith.constant 1.280000e+02 : f32
    %321 = vector.broadcast %cst_135 : f32 to vector<16x1xf32>
    %322 = arith.divf %320, %321 : vector<16x1xf32>
    %323 = arith.mulf %317, %317 : vector<16x1xf32>
    %324 = arith.subf %322, %323 : vector<16x1xf32>
    %cst_136 = arith.constant 9.99999996E-13 : f32
    %325 = vector.broadcast %cst_136 : f32 to vector<16x1xf32>
    %326 = arith.addf %324, %325 : vector<16x1xf32>
    %327 = math.rsqrt %326 : vector<16x1xf32>
    %328 = vector.broadcast %311 : vector<1x128xf32> to vector<16x128xf32>
    %329 = vector.broadcast %327 : vector<16x1xf32> to vector<16x128xf32>
    %330 = arith.mulf %328, %329 : vector<16x128xf32>
    %331 = arith.mulf %309, %330 : vector<16x128xf32>
    %332 = vector.broadcast %317 : vector<16x1xf32> to vector<16x128xf32>
    %333 = arith.mulf %332, %330 : vector<16x128xf32>
    %334 = vector.broadcast %313 : vector<1x128xf32> to vector<16x128xf32>
    %335 = arith.subf %334, %333 : vector<16x128xf32>
    %336 = arith.addf %331, %335 : vector<16x128xf32>
    %c1_137 = arith.constant 1 : index
    %c0_138 = arith.constant 0 : index
    %c0_139 = arith.constant 0 : index
    %337 = vector.load %arg14[%c1_137, %c0_138, %c0_139] : memref<2x128x256xbf16, #tpu.memory_space<vmem>>, vector<1x128x256xbf16>
    %338 = vector.shape_cast %337 : vector<1x128x256xbf16> to vector<128x256xbf16>
    %c1_140 = arith.constant 1 : index
    %c0_141 = arith.constant 0 : index
    %c0_142 = arith.constant 0 : index
    %339 = vector.load %arg15[%c1_140, %c0_141, %c0_142] : memref<2x1x256xf32, #tpu.memory_space<vmem>>, vector<1x1x256xf32>
    %340 = vector.shape_cast %339 : vector<1x1x256xf32> to vector<1x256xf32>
    %341 = arith.truncf %336 : vector<16x128xf32> to vector<16x128xbf16>
    %cst_143 = arith.constant dense<0.000000e+00> : vector<16x256xf32>
    %342 = tpu.matmul %341, %338, %cst_143 {dimension_numbers = #tpu.dot_dimension_numbers<[1], [0], [0], [1], [0, 0, 1, 1], [], []>} : vector<16x128xbf16>, vector<128x256xbf16>, vector<16x256xf32> -> vector<16x256xf32>
    %343 = vector.broadcast %340 : vector<1x256xf32> to vector<16x256xf32>
    %344 = arith.addf %342, %343 : vector<16x256xf32>
    %cst_144 = arith.constant 5.000000e-01 : f32
    %345 = vector.broadcast %cst_144 : f32 to vector<16x256xf32>
    %346 = arith.mulf %345, %344 : vector<16x256xf32>
    %cst_145 = arith.constant 0.707106769 : f32
    %347 = vector.broadcast %cst_145 : f32 to vector<16x256xf32>
    %348 = arith.mulf %344, %347 : vector<16x256xf32>
    %349 = math.absf %348 : vector<16x256xf32>
    %cst_146 = arith.constant 0.327591091 : f32
    %350 = vector.broadcast %cst_146 : f32 to vector<16x256xf32>
    %351 = arith.mulf %350, %349 : vector<16x256xf32>
    %cst_147 = arith.constant 1.000000e+00 : f32
    %352 = vector.broadcast %cst_147 : f32 to vector<16x256xf32>
    %353 = arith.addf %352, %351 : vector<16x256xf32>
    %cst_148 = arith.constant 1.000000e+00 : f32
    %354 = vector.broadcast %cst_148 : f32 to vector<16x256xf32>
    %355 = arith.divf %354, %353 : vector<16x256xf32>
    %cst_149 = arith.constant 1.06140542 : f32
    %356 = vector.broadcast %cst_149 : f32 to vector<16x256xf32>
    %357 = arith.mulf %356, %355 : vector<16x256xf32>
    %cst_150 = arith.constant -1.45315206 : f32
    %358 = vector.broadcast %cst_150 : f32 to vector<16x256xf32>
    %359 = arith.addf %357, %358 : vector<16x256xf32>
    %360 = arith.mulf %359, %355 : vector<16x256xf32>
    %cst_151 = arith.constant 1.42141378 : f32
    %361 = vector.broadcast %cst_151 : f32 to vector<16x256xf32>
    %362 = arith.addf %360, %361 : vector<16x256xf32>
    %363 = arith.mulf %362, %355 : vector<16x256xf32>
    %cst_152 = arith.constant -0.284496725 : f32
    %364 = vector.broadcast %cst_152 : f32 to vector<16x256xf32>
    %365 = arith.addf %363, %364 : vector<16x256xf32>
    %366 = arith.mulf %365, %355 : vector<16x256xf32>
    %cst_153 = arith.constant 0.254829586 : f32
    %367 = vector.broadcast %cst_153 : f32 to vector<16x256xf32>
    %368 = arith.addf %366, %367 : vector<16x256xf32>
    %369 = arith.mulf %368, %355 : vector<16x256xf32>
    %cst_154 = arith.constant 0.000000e+00 : f32
    %370 = vector.broadcast %cst_154 : f32 to vector<16x256xf32>
    %371 = arith.subf %370, %349 : vector<16x256xf32>
    %372 = arith.mulf %371, %349 : vector<16x256xf32>
    %373 = math.exp %372 : vector<16x256xf32>
    %374 = arith.mulf %369, %373 : vector<16x256xf32>
    %cst_155 = arith.constant 1.000000e+00 : f32
    %375 = vector.broadcast %cst_155 : f32 to vector<16x256xf32>
    %376 = arith.subf %375, %374 : vector<16x256xf32>
    %cst_156 = arith.constant 0.000000e+00 : f32
    %377 = vector.broadcast %cst_156 : f32 to vector<16x256xf32>
    %378 = arith.cmpf oge, %348, %377 : vector<16x256xf32>
    %cst_157 = arith.constant 0.000000e+00 : f32
    %379 = vector.broadcast %cst_157 : f32 to vector<16x256xf32>
    %380 = arith.subf %379, %376 : vector<16x256xf32>
    %381 = arith.select %378, %376, %380 : vector<16x256xi1>, vector<16x256xf32>
    %cst_158 = arith.constant 1.000000e+00 : f32
    %382 = vector.broadcast %cst_158 : f32 to vector<16x256xf32>
    %383 = arith.addf %382, %381 : vector<16x256xf32>
    %384 = arith.mulf %346, %383 : vector<16x256xf32>
    %c1_159 = arith.constant 1 : index
    %c0_160 = arith.constant 0 : index
    %c0_161 = arith.constant 0 : index
    %385 = vector.load %arg16[%c1_159, %c0_160, %c0_161] : memref<2x256x128xbf16, #tpu.memory_space<vmem>>, vector<1x256x128xbf16>
    %386 = vector.shape_cast %385 : vector<1x256x128xbf16> to vector<256x128xbf16>
    %c1_162 = arith.constant 1 : index
    %c0_163 = arith.constant 0 : index
    %c0_164 = arith.constant 0 : index
    %387 = vector.load %arg17[%c1_162, %c0_163, %c0_164] : memref<2x1x128xf32, #tpu.memory_space<vmem>>, vector<1x1x128xf32>
    %388 = vector.shape_cast %387 : vector<1x1x128xf32> to vector<1x128xf32>
    %389 = arith.truncf %384 : vector<16x256xf32> to vector<16x256xbf16>
    %cst_165 = arith.constant dense<0.000000e+00> : vector<16x128xf32>
    %390 = tpu.matmul %389, %386, %cst_165 {dimension_numbers = #tpu.dot_dimension_numbers<[1], [0], [0], [1], [0, 0, 1, 1], [], []>} : vector<16x256xbf16>, vector<256x128xbf16>, vector<16x128xf32> -> vector<16x128xf32>
    %391 = vector.broadcast %388 : vector<1x128xf32> to vector<16x128xf32>
    %392 = arith.addf %390, %391 : vector<16x128xf32>
    %393 = arith.addf %392, %336 : vector<16x128xf32>
    %c1_166 = arith.constant 1 : index
    %c0_167 = arith.constant 0 : index
    %c0_168 = arith.constant 0 : index
    %394 = vector.load %arg18[%c1_166, %c0_167, %c0_168] : memref<2x1x128xf32, #tpu.memory_space<vmem>>, vector<1x1x128xf32>
    %395 = vector.shape_cast %394 : vector<1x1x128xf32> to vector<1x128xf32>
    %c1_169 = arith.constant 1 : index
    %c0_170 = arith.constant 0 : index
    %c0_171 = arith.constant 0 : index
    %396 = vector.load %arg19[%c1_169, %c0_170, %c0_171] : memref<2x1x128xf32, #tpu.memory_space<vmem>>, vector<1x1x128xf32>
    %397 = vector.shape_cast %396 : vector<1x1x128xf32> to vector<1x128xf32>
    %cst_172 = arith.constant dense<0.000000e+00> : vector<16xf32>
    %398 = vector.multi_reduction <add>, %393, %cst_172 [1] : vector<16x128xf32> to vector<16xf32>
    %399 = vector.shape_cast %398 : vector<16xf32> to vector<16x1xf32>
    %cst_173 = arith.constant 1.280000e+02 : f32
    %400 = vector.broadcast %cst_173 : f32 to vector<16x1xf32>
    %401 = arith.divf %399, %400 : vector<16x1xf32>
    %402 = arith.mulf %393, %393 : vector<16x128xf32>
    %cst_174 = arith.constant dense<0.000000e+00> : vector<16xf32>
    %403 = vector.multi_reduction <add>, %402, %cst_174 [1] : vector<16x128xf32> to vector<16xf32>
    %404 = vector.shape_cast %403 : vector<16xf32> to vector<16x1xf32>
    %cst_175 = arith.constant 1.280000e+02 : f32
    %405 = vector.broadcast %cst_175 : f32 to vector<16x1xf32>
    %406 = arith.divf %404, %405 : vector<16x1xf32>
    %407 = arith.mulf %401, %401 : vector<16x1xf32>
    %408 = arith.subf %406, %407 : vector<16x1xf32>
    %cst_176 = arith.constant 9.99999996E-13 : f32
    %409 = vector.broadcast %cst_176 : f32 to vector<16x1xf32>
    %410 = arith.addf %408, %409 : vector<16x1xf32>
    %411 = math.rsqrt %410 : vector<16x1xf32>
    %412 = vector.broadcast %395 : vector<1x128xf32> to vector<16x128xf32>
    %413 = vector.broadcast %411 : vector<16x1xf32> to vector<16x128xf32>
    %414 = arith.mulf %412, %413 : vector<16x128xf32>
    %415 = arith.mulf %393, %414 : vector<16x128xf32>
    %416 = vector.broadcast %401 : vector<16x1xf32> to vector<16x128xf32>
    %417 = arith.mulf %416, %414 : vector<16x128xf32>
    %418 = vector.broadcast %397 : vector<1x128xf32> to vector<16x128xf32>
    %419 = arith.subf %418, %417 : vector<16x128xf32>
    %420 = arith.addf %415, %419 : vector<16x128xf32>
    %421 = vector.extract_strided_slice %420 {offsets = [0, 0], sizes = [1, 128], strides = [1, 1]} : vector<16x128xf32> to vector<1x128xf32>
    %422 = vector.extract_strided_slice %420 {offsets = [8, 0], sizes = [1, 128], strides = [1, 1]} : vector<16x128xf32> to vector<1x128xf32>
    %423 = tpu.concatenate %421, %422 in 0 : vector<1x128xf32>, vector<1x128xf32> -> vector<2x128xf32>
    %c0_177 = arith.constant 0 : index
    %c0_178 = arith.constant 0 : index
    %424 = vector.load %arg20[%c0_177, %c0_178] : memref<128x128xbf16, #tpu.memory_space<vmem>>, vector<128x128xbf16>
    %c0_179 = arith.constant 0 : index
    %c0_180 = arith.constant 0 : index
    %425 = vector.load %arg21[%c0_179, %c0_180] : memref<1x128xf32, #tpu.memory_space<vmem>>, vector<1x128xf32>
    %426 = arith.truncf %423 : vector<2x128xf32> to vector<2x128xbf16>
    %cst_181 = arith.constant dense<0.000000e+00> : vector<2x128xf32>
    %427 = tpu.matmul %426, %424, %cst_181 {dimension_numbers = #tpu.dot_dimension_numbers<[1], [0], [0], [1], [0, 0, 1, 1], [], []>} : vector<2x128xbf16>, vector<128x128xbf16>, vector<2x128xf32> -> vector<2x128xf32>
    %428 = vector.broadcast %425 : vector<1x128xf32> to vector<2x128xf32>
    %429 = arith.addf %427, %428 : vector<2x128xf32>
    %430 = math.tanh %429 : vector<2x128xf32>
    %c0_182 = arith.constant 0 : index
    %c0_183 = arith.constant 0 : index
    %431 = vector.load %arg22[%c0_182, %c0_183] : memref<2x128xf32, #tpu.memory_space<vmem>>, vector<2x128xf32>
    tpu.vector_store %arg22[%c0_182, %c0_183], %430 {strides = array<i32>} : memref<2x128xf32, #tpu.memory_space<vmem>>, vector<2x128xf32>,
    return
  }
}

</mosaic_0001>

<bundles_post_ra>
// kernel: addn_encoder_forward.1
= control target key start
LH: loop header
LB: loop body
LE: loop exit
PB: predicated region body
PF: predicated region fallthrough
CT: control target
= control target key end

     0   :  { %s4882_s0 = inlined_call_operand.vmem [shape: s32[16,1], index: 0, kind: input, shape index: {}]   ;;  %s4883_s1 = inlined_call_operand.vmem [shape: s32[16,1], index: 1, kind: input, shape index: {}]   ;;  %s4884_s2 = inlined_call_operand.vmem [shape: f32[1,16], index: 2, kind: input, shape index: {}]   ;;  %s4885_s3 = inlined_call_operand.hbm [shape: f32[128,128], index: 3, kind: input, shape index: {}]   ;;  %s4886_s4 = inlined_call_operand.vmem [shape: f32[16,128], index: 4, kind: input, shape index: {}]   ;;  %s4887_s5 = inlined_call_operand.vmem [shape: f32[2,128], index: 5, kind: input, shape index: {}]   ;;  %s4888_s6 = inlined_call_operand.vmem [shape: f32[1,128], index: 6, kind: input, shape index: {}]   ;;  %s4889_s7 = inlined_call_operand.hbm [shape: f32[1,128], index: 7, kind: input, shape index: {}]   ;;  %s4890_s8 = inlined_call_operand.hbm [shape: bf16[2,128,384], index: 8, kind: input, shape index: {}]   ;;  %s4891_s9 = inlined_call_operand.hbm [shape: f32[2,1,384], index: 9, kind: input, shape index: {}]   ;;  %s4892_s10 = inlined_call_operand.hbm [shape: bf16[2,128,128], index: 10, kind: input, shape index: {}]   ;;  %s4893_s11 = inlined_call_operand.hbm [shape: f32[2,1,128], index: 11, kind: input, shape index: {}]   ;;  %s4894_s12 = inlined_call_operand.hbm [shape: f32[2,1,128], index: 12, kind: input, shape index: {}]   ;;  %s4895_s13 = inlined_call_operand.hbm [shape: f32[2,1,128], index: 13, kind: input, shape index: {}]   ;;  %s4896_s14 = inlined_call_operand.hbm [shape: bf16[2,128,256], index: 14, kind: input, shape index: {}]   ;;  %s4897_s15 = inlined_call_operand.vmem [shape: f32[2,1,256], index: 15, kind: input, shape index: {}]   ;;  %s4898_s16 = inlined_call_operand.hbm [shape: bf16[2,256,128], index: 16, kind: input, shape index: {}]   ;;  %s4899_s17 = inlined_call_operand.hbm [shape: f32[2,1,128], index: 17, kind: input, shape index: {}]   ;;  %s4900_s18 = inlined_call_operand.hbm [shape: f32[2,1,128], index: 18, kind: input, shape index: {}]   ;;  %s4901_s19 = inlined_call_operand.hbm [shape: f32[2,1,128], index: 19, kind: input, shape index: {}]   ;;  %s4902_s20 = inlined_call_operand.vmem [shape: bf16[128,128], index: 20, kind: input, shape index: {}]   ;;  %s4903_s21 = inlined_call_operand.hbm [shape: f32[1,128], index: 21, kind: input, shape index: {}]   ;;  %s4904_s22 = inlined_call_operand.hbm [shape: f32[2,128], index: 22, kind: output, shape index: {}]  }
   0x1   :  { %4910 = sst [smem:[#allocation35_spill]] %s4882_s0 }
   0x2   :  { %4911 = sst [smem:[#allocation36_spill]] %s4883_s1 }
   0x3   :  { %4912 = sst [smem:[#allocation37_spill]] %s4884_s2 }
   0x4   :  { %4913 = sst [smem:[#allocation38_spill]] %s4885_s3 }
   0x5   :  { %4914 = sst [smem:[#allocation39_spill]] %s4886_s4 }
   0x6   :  { %4915 = sst [smem:[#allocation40_spill]] %s4887_s5 }
   0x7   :  { %4916 = sst [smem:[#allocation41_spill]] %s4888_s6 }
   0x8   :  { %27 = vsyncpa [#allocation3], 0 }
   0x9   :  { %28 = vsyncpa [#allocation6], 0 }
   0xa   :  { %29 = vsyncpa [#allocation9], 0 }
   0xb   :  { %30 = vsyncpa [#allocation12], 0 }
   0xc   :  { %31 = vsyncpa [#allocation15], 0 }
   0xd   :  { %32 = vsyncpa [#allocation18], 0 }
   0xe   :  { %33 = vsyncpa [#allocation21], 0 }
   0xf   :  { %34 = vsyncpa [#allocation24], 0 }
  0x10   :  { %35 = vsyncpa [#allocation4], 0  ;;  %s4115_s3 = smov [#allocation5]   ;;  %s4116_s29 = smov [#allocation8]  }
  0x11   :  { %s66_s28 = sshll.u32 %s4115_s3, 4  ;;  %s87_s30 = sshll.u32 %s4116_s29, 4  ;;  %s67_s28 = int_to_ptr.vmem [resolvable:$true] %s66_s28  ;;  %s4259_s30 = int_to_ptr.vmem [resolvable:$true] %s87_s30 }
  0x12   :  { %s3767_s23 = scalar_lea.hbm %s4889_s7, 16 }
  0x13   :  { %p3768_p0 = scmp.ne.s32.totalorder %s4889_s7, %s3767_s23  ;;  %p3771_p1 = scmp.lt.u32.totalorder %s3767_s23, %s4889_s7 }
  0x15   :  { %p3773_p2 = pnand %p3771_p1, %p3768_p0 }
  0x17   :  { %3776 = shalt.err (!%p3773_p2)
}
  0x18   :  { %s3777_s25 = scalar_lea.vmem %s67_s28, 16  ;;  %s3781_s26 = scalar_lea.vmem %s67_s28, 32 }
  0x19   :  { %p3778_p3 = scmp.ne.s32.totalorder %s67_s28, %s3777_s25  ;;  %p3782_p4 = scmp.lt.s32.totalorder %s67_s28, %s67_s28 }
  0x1a   :  { %p3783_p5 = scmp.lt.s32.totalorder %s3781_s26, %s3777_s25 }
  0x1c   :  { %p3784_p6 = por %p3783_p5, %p3782_p4 }
  0x1e   :  { %p3785_p7 = pnand %p3784_p6, %p3778_p3 }
  0x20   :  { %3788 = shalt.err (!%p3785_p7)
}
  0x21   :  { %69 = dma.hbm_to_vmem [thread:$0]  %s4889_s7, 16, %s67_s28, [#allocation6]  }
  0x22   :  { %s3789_s4 = scalar_lea.hbm %s4891_s9, 96 }
  0x23   :  { %p3790_p8 = scmp.ne.s32.totalorder %s4891_s9, %s3789_s4  ;;  %p3793_p9 = scmp.lt.u32.totalorder %s3789_s4, %s4891_s9 }
  0x25   :  { %p3795_p10 = pnand %p3793_p9, %p3790_p8 }
  0x27   :  { %3798 = shalt.err (!%p3795_p10)
}
  0x28   :  { %s3799_s24 = scalar_lea.vmem %s4259_s30, 96  ;;  %p3804_p12 = scmp.lt.s32.totalorder %s4259_s30, %s4259_s30 }
  0x29   :  { %p3800_p11 = scmp.ne.s32.totalorder %s4259_s30, %s3799_s24  ;;  %p3805_p13 = scmp.lt.s32.totalorder %s3799_s24, %s3799_s24 }
  0x2b   :  { %p3806_p0 = por %p3805_p13, %p3804_p12 }
  0x2d   :  { %p3807_p1 = pnand %p3806_p0, %p3800_p11 }
  0x2f   :  { %3810 = shalt.err (!%p3807_p1)
}
  0x30   :  { %s4117_s7 = smov 48   ;;  %s4118_s28 = smov 3  }
  0x31   :  { %93 = dma.hbm_to_vmem [thread:$0]  %s4891_s9, 96, %s4259_s30, [#allocation9], %s4117_s7, %s4117_s7, %s4118_s28  }
  0x32   :  { %s4119_s26 = smov [#allocation11]   ;;  %s3811_s29 = scalar_lea.hbm %s4893_s11, 32 }
  0x33   :  { %s111_s2 = sshll.u32 %s4119_s26, 4  ;;  %p3812_p2 = scmp.ne.s32.totalorder %s4893_s11, %s3811_s29  ;;  %s112_s2 = int_to_ptr.vmem [resolvable:$true] %s111_s2 }
  0x34   :  { %p3815_p3 = scmp.lt.u32.totalorder %s3811_s29, %s4893_s11 }
  0x36   :  { %p3817_p4 = pnand %p3815_p3, %p3812_p2 }
  0x38   :  { %3820 = shalt.err (!%p3817_p4)
}
  0x39   :  { %s3821_s5 = scalar_lea.vmem %s112_s2, 32  ;;  %p3826_p6 = scmp.lt.s32.totalorder %s112_s2, %s112_s2 }
  0x3a   :  { %p3822_p5 = scmp.ne.s32.totalorder %s112_s2, %s3821_s5  ;;  %p3827_p7 = scmp.lt.s32.totalorder %s3821_s5, %s3821_s5 }
  0x3c   :  { %p3828_p8 = por %p3827_p7, %p3826_p6 }
  0x3e   :  { %p3829_p9 = pnand %p3828_p8, %p3822_p5 }
  0x40   :  { %3832 = shalt.err (!%p3829_p9)
}
  0x41   :  { %s4120_s9 = smov 16   ;;  %s4121_s30 = smov 1  }
  0x42   :  { %117 = dma.hbm_to_vmem [thread:$0]  %s4893_s11, 32, %s112_s2, [#allocation12], %s4120_s9, %s4120_s9, %s4121_s30  }
  0x43   :  { %s4122_s28 = smov [#allocation14]   ;;  %s3833_s27 = scalar_lea.hbm %s4895_s13, 32 }
  0x44   :  { %s135_s6 = sshll.u32 %s4122_s28, 4  ;;  %p3834_p10 = scmp.ne.s32.totalorder %s4895_s13, %s3833_s27  ;;  %s136_s6 = int_to_ptr.vmem [resolvable:$true] %s135_s6 }
  0x45   :  { %p3837_p11 = scmp.lt.u32.totalorder %s3833_s27, %s4895_s13 }
  0x47   :  { %p3839_p12 = pnand %p3837_p11, %p3834_p10 }
  0x49   :  { %3842 = shalt.err (!%p3839_p12)
}
  0x4a   :  { %s3843_s23 = scalar_lea.vmem %s136_s6, 32  ;;  %p3848_p0 = scmp.lt.s32.totalorder %s136_s6, %s136_s6 }
  0x4b   :  { %p3844_p13 = scmp.ne.s32.totalorder %s136_s6, %s3843_s23  ;;  %p3849_p1 = scmp.lt.s32.totalorder %s3843_s23, %s3843_s23 }
  0x4d   :  { %p3850_p2 = por %p3849_p1, %p3848_p0 }
  0x4f   :  { %p3851_p3 = pnand %p3850_p2, %p3844_p13 }
  0x51   :  { %3854 = shalt.err (!%p3851_p3)
}
  0x52   :  { %141 = dma.hbm_to_vmem [thread:$0]  %s4895_s13, 32, %s136_s6, [#allocation15], %s4120_s9, %s4120_s9, %s4121_s30  }
  0x53   :  { %s4123_s1 = smov [#allocation17]   ;;  %s4124_s24 = smov [#allocation20]  }
  0x54   :  { %s161_s5 = sshll.u32 %s4123_s1, 4  ;;  %s185_s7 = sshll.u32 %s4124_s24, 4  ;;  %s162_s5 = int_to_ptr.vmem [resolvable:$true] %s161_s5  ;;  %s4320_s7 = int_to_ptr.vmem [resolvable:$true] %s185_s7 }
  0x55   :  { %s3855_s26 = scalar_lea.hbm %s4898_s16, 4096 }
  0x56   :  { %p3856_p4 = scmp.ne.s32.totalorder %s4898_s16, %s3855_s26  ;;  %p3859_p5 = scmp.lt.u32.totalorder %s3855_s26, %s4898_s16 }
  0x58   :  { %p3861_p6 = pnand %p3859_p5, %p3856_p4 }
  0x5a   :  { %3864 = shalt.err (!%p3861_p6)
}
  0x5b   :  { %s3865_s13 = scalar_lea.vmem %s162_s5, 4096  ;;  %p3870_p8 = scmp.lt.s32.totalorder %s162_s5, %s162_s5 }
  0x5c   :  { %p3866_p7 = scmp.ne.s32.totalorder %s162_s5, %s3865_s13  ;;  %p3871_p9 = scmp.lt.s32.totalorder %s3865_s13, %s3865_s13 }
  0x5e   :  { %p3872_p10 = por %p3871_p9, %p3870_p8 }
  0x60   :  { %p3873_p11 = pnand %p3872_p10, %p3866_p7 }
  0x62   :  { %3876 = shalt.err (!%p3873_p11)
}
  0x63   :  { %s4125_s6 = smov 64   ;;  %s4126_s0 = smov 4  }
  0x64   :  { %167 = dma.hbm_to_vmem [thread:$0]  %s4898_s16, 4096, %s162_s5, [#allocation18], %s4125_s6, %s4125_s6, %s4126_s0  }
  0x65   :  { %s3877_s24 = scalar_lea.hbm %s4900_s18, 32 }
  0x66   :  { %p3878_p12 = scmp.ne.s32.totalorder %s4900_s18, %s3877_s24  ;;  %p3881_p13 = scmp.lt.u32.totalorder %s3877_s24, %s4900_s18 }
  0x68   :  { %p3883_p0 = pnand %p3881_p13, %p3878_p12 }
  0x6a   :  { %3886 = shalt.err (!%p3883_p0)
}
  0x6b   :  { %s3887_s3 = scalar_lea.vmem %s4320_s7, 32  ;;  %p3892_p2 = scmp.lt.s32.totalorder %s4320_s7, %s4320_s7 }
  0x6c   :  { %p3888_p1 = scmp.ne.s32.totalorder %s4320_s7, %s3887_s3  ;;  %p3893_p3 = scmp.lt.s32.totalorder %s3887_s3, %s3887_s3 }
  0x6e   :  { %p3894_p4 = por %p3893_p3, %p3892_p2 }
  0x70   :  { %p3895_p5 = pnand %p3894_p4, %p3888_p1 }
  0x72   :  { %3898 = shalt.err (!%p3895_p5)
}
  0x73   :  { %191 = dma.hbm_to_vmem [thread:$0]  %s4900_s18, 32, %s4320_s7, [#allocation21], %s4120_s9, %s4120_s9, %s4121_s30  }
  0x74   :  { %s4127_s29 = smov [#allocation2]   ;;  %s4917_s11 = sld [smem:[#allocation38_spill]] }
  0x75   :  { %s47_s4 = sshll.u32 %s4127_s29, 4  ;;  %s48_s4 = int_to_ptr.vmem [resolvable:$true] %s47_s4 }
  0x7a   :  { %s3899_s2 = scalar_lea.hbm %s4917_s11, 2048 }
  0x7b   :  { %p3900_p6 = scmp.ne.s32.totalorder %s4917_s11, %s3899_s2  ;;  %p3903_p7 = scmp.lt.u32.totalorder %s3899_s2, %s4917_s11 }
  0x7d   :  { %p3905_p8 = pnand %p3903_p7, %p3900_p6 }
  0x7f   :  { %3908 = shalt.err (!%p3905_p8)
}
  0x80   :  { %s3909_s26 = scalar_lea.vmem %s48_s4, 2048  ;;  %p3914_p10 = scmp.lt.s32.totalorder %s48_s4, %s48_s4 }
  0x81   :  { %p3910_p9 = scmp.ne.s32.totalorder %s48_s4, %s3909_s26  ;;  %p3915_p11 = scmp.lt.s32.totalorder %s3909_s26, %s3909_s26 }
  0x83   :  { %p3916_p12 = por %p3915_p11, %p3914_p10 }
  0x85   :  { %p3917_p13 = pnand %p3916_p12, %p3910_p9 }
  0x87   :  { %3920 = shalt.err (!%p3917_p13)
}
  0x88   :  { %s4909_s18 = smov 128   ;;  %s4129_s7 = smov 8  }
  0x89   :  { %53 = dma.hbm_to_vmem [thread:$0]  %s4917_s11, 2048, %s48_s4, [#allocation3], %s4909_s18, %s4909_s18, %s4129_s7  }
  0x8a   :  { %s4130_s16 = smov [#allocation7]   ;;  %s3921_s23 = scalar_lea.hbm %s4890_s8, 6144 }
  0x8b   :  { %s75_s5 = sshll.u32 %s4130_s16, 4  ;;  %p3922_p0 = scmp.ne.s32.totalorder %s4890_s8, %s3921_s23  ;;  %s76_s5 = int_to_ptr.vmem [resolvable:$true] %s75_s5 }
  0x8c   :  { %p3925_p1 = scmp.lt.u32.totalorder %s3921_s23, %s4890_s8 }
  0x8e   :  { %p3927_p2 = pnand %p3925_p1, %p3922_p0 }
  0x90   :  { %3930 = shalt.err (!%p3927_p2)
}
  0x91   :  { %s3931_s25 = scalar_lea.vmem %s76_s5, 6144  ;;  %p3936_p4 = scmp.lt.s32.totalorder %s76_s5, %s76_s5 }
  0x92   :  { %p3932_p3 = scmp.ne.s32.totalorder %s76_s5, %s3931_s25  ;;  %p3937_p5 = scmp.lt.s32.totalorder %s3931_s25, %s3931_s25 }
  0x94   :  { %p3938_p6 = por %p3937_p5, %p3936_p4 }
  0x96   :  { %p3939_p7 = pnand %p3938_p6, %p3932_p3 }
  0x98   :  { %3942 = shalt.err (!%p3939_p7)
}
  0x99   :  { %s4131_s4 = smov 192   ;;  %s4132_s11 = smov 12  }
  0x9a   :  { %81 = dma.hbm_to_vmem [thread:$0]  %s4890_s8, 6144, %s76_s5, [#allocation6], %s4131_s4, %s4131_s4, %s4132_s11  }
  0x9b   :  { %s4133_s3 = smov [#allocation10]   ;;  %s4134_s29 = smov [#allocation13]  }
  0x9c   :  { %s99_s16 = sshll.u32 %s4133_s3, 4  ;;  %s123_s13 = sshll.u32 %s4134_s29, 4  ;;  %s100_s16 = int_to_ptr.vmem [resolvable:$true] %s99_s16  ;;  %s4384_s13 = int_to_ptr.vmem [resolvable:$true] %s123_s13 }
  0x9d   :  { %s3943_s1 = scalar_lea.hbm %s4892_s10, 2048 }
  0x9e   :  { %p3944_p8 = scmp.ne.s32.totalorder %s4892_s10, %s3943_s1  ;;  %p3947_p9 = scmp.lt.u32.totalorder %s3943_s1, %s4892_s10 }
  0xa0   :  { %p3949_p10 = pnand %p3947_p9, %p3944_p8 }
  0xa2   :  { %3952 = shalt.err (!%p3949_p10)
}
  0xa3   :  { %s3953_s8 = scalar_lea.vmem %s100_s16, 2048  ;;  %p3958_p12 = scmp.lt.s32.totalorder %s100_s16, %s100_s16 }
  0xa4   :  { %p3954_p11 = scmp.ne.s32.totalorder %s100_s16, %s3953_s8  ;;  %p3959_p13 = scmp.lt.s32.totalorder %s3953_s8, %s3953_s8 }
  0xa6   :  { %p3960_p0 = por %p3959_p13, %p3958_p12 }
  0xa8   :  { %p3961_p1 = pnand %p3960_p0, %p3954_p11 }
  0xaa   :  { %3964 = shalt.err (!%p3961_p1)
}
  0xab   :  { %105 = dma.hbm_to_vmem [thread:$0]  %s4892_s10, 2048, %s100_s16, [#allocation9], %s4125_s6, %s4125_s6, %s4126_s0  }
  0xac   :  { %s3965_s18 = scalar_lea.hbm %s4894_s12, 32 }
  0xad   :  { %p3966_p2 = scmp.ne.s32.totalorder %s4894_s12, %s3965_s18  ;;  %p3969_p3 = scmp.lt.u32.totalorder %s3965_s18, %s4894_s12 }
  0xaf   :  { %p3971_p4 = pnand %p3969_p3, %p3966_p2 }
  0xb1   :  { %3974 = shalt.err (!%p3971_p4)
}
  0xb2   :  { %s3975_s2 = scalar_lea.vmem %s4384_s13, 32  ;;  %p3980_p6 = scmp.lt.s32.totalorder %s4384_s13, %s4384_s13 }
  0xb3   :  { %p3976_p5 = scmp.ne.s32.totalorder %s4384_s13, %s3975_s2  ;;  %p3981_p7 = scmp.lt.s32.totalorder %s3975_s2, %s3975_s2 }
  0xb5   :  { %p3982_p8 = por %p3981_p7, %p3980_p6 }
  0xb7   :  { %p3983_p9 = pnand %p3982_p8, %p3976_p5 }
  0xb9   :  { %3986 = shalt.err (!%p3983_p9)
}
  0xba   :  { %129 = dma.hbm_to_vmem [thread:$0]  %s4894_s12, 32, %s4384_s13, [#allocation12], %s4120_s9, %s4120_s9, %s4121_s30  }
  0xbb   :  { %s4135_s16 = smov [#allocation16]   ;;  %s4136_s24 = smov [#allocation19]  }
  0xbc   :  { %s147_s1 = sshll.u32 %s4135_s16, 4  ;;  %s173_s28 = sshll.u32 %s4136_s24, 4  ;;  %s148_s1 = int_to_ptr.vmem [resolvable:$true] %s147_s1  ;;  %s4421_s28 = int_to_ptr.vmem [resolvable:$true] %s173_s28 }
  0xbd   :  { %s3987_s5 = scalar_lea.hbm %s4896_s14, 4096 }
  0xbe   :  { %p3988_p10 = scmp.ne.s32.totalorder %s4896_s14, %s3987_s5  ;;  %p3991_p11 = scmp.lt.u32.totalorder %s3987_s5, %s4896_s14 }
  0xc0   :  { %p3993_p12 = pnand %p3991_p11, %p3988_p10 }
  0xc2   :  { %3996 = shalt.err (!%p3993_p12)
}
  0xc3   :  { %s3997_s12 = scalar_lea.vmem %s148_s1, 4096  ;;  %p4002_p0 = scmp.lt.s32.totalorder %s148_s1, %s148_s1 }
  0xc4   :  { %p3998_p13 = scmp.ne.s32.totalorder %s148_s1, %s3997_s12  ;;  %p4003_p1 = scmp.lt.s32.totalorder %s3997_s12, %s3997_s12 }
  0xc6   :  { %p4004_p2 = por %p4003_p1, %p4002_p0 }
  0xc8   :  { %p4005_p3 = pnand %p4004_p2, %p3998_p13 }
  0xca   :  { %4008 = shalt.err (!%p4005_p3)
}
  0xcb   :  { %s4918_s13 = smov 128   ;;  %s4009_s2 = scalar_lea.hbm %s4899_s17, 32 }
  0xcc   :  { %153 = dma.hbm_to_vmem [thread:$0]  %s4896_s14, 4096, %s148_s1, [#allocation15], %s4918_s13, %s4918_s13, %s4129_s7  }
  0xcd   :  { %p4010_p4 = scmp.ne.s32.totalorder %s4899_s17, %s4009_s2  ;;  %p4013_p5 = scmp.lt.u32.totalorder %s4009_s2, %s4899_s17 }
  0xcf   :  { %p4015_p6 = pnand %p4013_p5, %p4010_p4 }
  0xd1   :  { %4018 = shalt.err (!%p4015_p6)
}
  0xd2   :  { %s4019_s25 = scalar_lea.vmem %s4421_s28, 32  ;;  %p4024_p8 = scmp.lt.s32.totalorder %s4421_s28, %s4421_s28 }
  0xd3   :  { %p4020_p7 = scmp.ne.s32.totalorder %s4421_s28, %s4019_s25  ;;  %p4025_p9 = scmp.lt.s32.totalorder %s4019_s25, %s4019_s25 }
  0xd5   :  { %p4026_p10 = por %p4025_p9, %p4024_p8 }
  0xd7   :  { %p4027_p11 = pnand %p4026_p10, %p4020_p7 }
  0xd9   :  { %4030 = shalt.err (!%p4027_p11)
}
  0xda   :  { %179 = dma.hbm_to_vmem [thread:$0]  %s4899_s17, 32, %s4421_s28, [#allocation18], %s4120_s9, %s4120_s9, %s4121_s30  }
  0xdb   :  { %s4137_s1 = smov [#allocation22]   ;;  %s4138_s5 = smov [#allocation23]  }
  0xdc   :  { %s197_s8 = sshll.u32 %s4137_s1, 4  ;;  %s212_s4 = sshll.u32 %s4138_s5, 4  ;;  %s198_s8 = int_to_ptr.vmem [resolvable:$true] %s197_s8  ;;  %s213_s4 = int_to_ptr.vmem [resolvable:$true] %s212_s4 }
  0xdd   :  { %s4031_s18 = scalar_lea.hbm %s4901_s19, 32 }
  0xde   :  { %p4032_p12 = scmp.ne.s32.totalorder %s4901_s19, %s4031_s18  ;;  %p4035_p13 = scmp.lt.u32.totalorder %s4031_s18, %s4901_s19 }
  0xe0   :  { %p4037_p0 = pnand %p4035_p13, %p4032_p12 }
  0xe2   :  { %4040 = shalt.err (!%p4037_p0)
}
  0xe3   :  { %s4041_s17 = scalar_lea.vmem %s198_s8, 32  ;;  %p4046_p2 = scmp.lt.s32.totalorder %s198_s8, %s198_s8 }
  0xe4   :  { %p4042_p1 = scmp.ne.s32.totalorder %s198_s8, %s4041_s17  ;;  %p4047_p3 = scmp.lt.s32.totalorder %s4041_s17, %s4041_s17 }
  0xe6   :  { %p4048_p4 = por %p4047_p3, %p4046_p2 }
  0xe8   :  { %p4049_p5 = pnand %p4048_p4, %p4042_p1 }
  0xea   :  { %4052 = shalt.err (!%p4049_p5)
}
  0xeb   :  { %203 = dma.hbm_to_vmem [thread:$0]  %s4901_s19, 32, %s198_s8, [#allocation21], %s4120_s9, %s4120_s9, %s4121_s30  }
  0xec   :  { %s4053_s10 = scalar_lea.hbm %s4903_s21, 16 }
  0xed   :  { %p4054_p6 = scmp.ne.s32.totalorder %s4903_s21, %s4053_s10  ;;  %p4057_p7 = scmp.lt.u32.totalorder %s4053_s10, %s4903_s21 }
  0xef   :  { %p4059_p8 = pnand %p4057_p7, %p4054_p6 }
  0xf1   :  { %4062 = shalt.err (!%p4059_p8)
}
  0xf2   :  { %s4063_s14 = scalar_lea.vmem %s213_s4, 16  ;;  %s4067_s7 = scalar_lea.vmem %s213_s4, 32 }
  0xf3   :  { %p4064_p9 = scmp.ne.s32.totalorder %s213_s4, %s4063_s14  ;;  %p4068_p10 = scmp.lt.s32.totalorder %s213_s4, %s213_s4 }
  0xf4   :  { %p4069_p11 = scmp.lt.s32.totalorder %s4067_s7, %s4063_s14 }
  0xf6   :  { %p4070_p12 = por %p4069_p11, %p4068_p10 }
  0xf8   :  { %p4071_p13 = pnand %p4070_p12, %p4064_p9 }
  0xfa   :  { %4074 = shalt.err (!%p4071_p13)
}
  0xfb   :  { %215 = dma.hbm_to_vmem [thread:$0]  %s4903_s21, 16, %s213_s4, [#allocation24]  }
  0xfc   :  { %4097 = dma.done.wait [#allocation3], 2048  }
  0xfd   :  { %4098 = vsyncadd [#allocation3], 4294965248 }
  0xfe   :  { %4099 = dma.done.wait [#allocation6], 6160  }
  0xff   :  { %4100 = vsyncadd [#allocation6], 4294961136 }
 0x100   :  { %4101 = dma.done.wait [#allocation9], 2144  }
 0x101   :  { %4102 = vsyncadd [#allocation9], 4294965152 }
 0x102   :  { %4103 = dma.done.wait [#allocation12], 64  }
 0x103   :  { %4104 = vsyncadd [#allocation12], 4294967232 }
 0x104   :  { %4105 = dma.done.wait [#allocation15], 4128  }
 0x105   :  { %4106 = vsyncadd [#allocation15], 4294963168 }
 0x106   :  { %4107 = dma.done.wait [#allocation18], 4128  }
 0x107   :  { %4108 = vsyncadd [#allocation18], 4294963168 }
 0x108   :  { %4109 = dma.done.wait [#allocation21], 64  }
 0x109   :  { %4110 = vsyncadd [#allocation21], 4294967232 }
 0x10a   :  { %4111 = dma.done.wait [#allocation24], 16  }
 0x10b   :  { %4112 = vsyncadd [#allocation24], 4294967280  ;;  %v4139_v0 = vmov 0   ;;  %s4919_s1 = sld [smem:[#allocation35_spill]]  ;;  %v275_v2 = vld [vmem:[#allocation2] sm:$0xff]  ;;  %v276_v3 = vld [vmem:[#allocation2 + $0x8] sm:$0xff]  ;;  %v259_v33 = vlaneseq }
 0x10c   :  { %3501 = vset.pattern.permute.xlu0 %v4139_v0  ;;  %3502 = vset.pattern.permute.xlu1 %v4139_v0  ;;  %v277_v4 = vld [vmem:[#allocation2 + $0x10] sm:$0xff]  ;;  %s4920_s26 = sld [smem:[#allocation36_spill]]  ;;  %v3440_v7 = vpack.c.bf16 %v276_v3, %v275_v2  ;;  %v278_v8 = vld [vmem:[#allocation2 + $0x18] sm:$0xff]  ;;  %v279_v10 = vld [vmem:[#allocation2 + $0x20] sm:$0xff]  ;;  %v4140_v36 = vmov 1.0   ;;  %s4921_s3 = sld [smem:[#allocation40_spill]] }
 0x10d   :  { %687 = vmatprep.mubr.bf16.mxu1 %v4139_v0  ;;  %v3444_v9 = vpack.c.bf16 %v278_v8, %v277_v4  ;;  %v280_v11 = vld [vmem:[#allocation2 + $0x28] sm:$0xff]  ;;  %v281_v14 = vld [vmem:[#allocation2 + $0x30] sm:$0xff]  ;;  %v282_v15 = vld [vmem:[#allocation2 + $0x38] sm:$0xff]  ;;  %v4501_v34 = vand.u32 127, %v259_v33  ;;  %s4922_s29 = sld [smem:[#allocation39_spill]]  ;;  %v4141_v62 = vmov 0.0  }
 0x10e   :  { %3441 = vmatprep.subr.bf16.mxu0 %v3440_v7  ;;  %v3448_v13 = vpack.c.bf16 %v280_v11, %v279_v10  ;;  %v283_v16 = vld [vmem:[#allocation2 + $0x40] sm:$0xff]  ;;  %v284_v17 = vld [vmem:[#allocation2 + $0x48] sm:$0xff]  ;;  %v3452_v20 = vpack.c.bf16 %v282_v15, %v281_v14  ;;  %v285_v23 = vld [vmem:[#allocation2 + $0x50] sm:$0xff]  ;;  %vm4142_vm2 = vmmov 0   ;;  %s4923_s16 = sld [smem:[#allocation41_spill]]  ;;  %vm742_vm3 = vcmask 523264  }
 0x10f   :  { %3443 = vmatpush3.bf16.msra.mxu0 %v3440_v7  ;;  %v286_v24 = vld [vmem:[#allocation2 + $0x58] sm:$0xff]  ;;  %v3456_v25 = vpack.c.bf16 %v284_v17, %v283_v16  ;;  %v287_v26 = vld [vmem:[#allocation2 + $0x60] sm:$0xff]  ;;  %v288_v27 = vld [vmem:[#allocation2 + $0x68] sm:$0xff]  ;;  %s4924_s14 = sld [smem:[#allocation37_spill]]  ;;  %vm469_vm4 = vcmp.ge.s32.totalorder %v4501_v34, 8  ;;  %vm470_vm5 = vcmp.lt.s32.totalorder %v4501_v34, 16 }
 0x110   :  { %3445 = vmatprep.subr.bf16.mxu0 %v3444_v9  ;;  %v3460_v28 = vpack.c.bf16 %v286_v24, %v285_v23  ;;  %v289_v29 = vld [vmem:[#allocation2 + $0x70] sm:$0xff]  ;;  %v290_v30 = vld [vmem:[#allocation2 + $0x78] sm:$0xff]  ;;  %v3464_v31 = vpack.c.bf16 %v288_v27, %v287_v26  ;;  %vm462_vm6 = vcmp.lt.s32.totalorder %v4501_v34, 8  ;;  %vm471_vm7 = vmand %vm469_vm4, %vm470_vm5  ;;  %vm794_vm8 = vcmask 130048  }
 0x111   :  { %v261_v1 = vld [vmem:[%s4919_s1] sm:$0xff]  ;;  %v262_v5 = vld [vmem:[%s4919_s1 + $0x8] sm:$0xff]  ;;  %v3468_v32 = vpack.c.bf16 %v290_v30, %v289_v29 }
 0x112   :  { %264 = vperm.xlu0 %3501, %v261_v1   ;;  %v367_v6 = vld [vmem:[%s4920_s26] sm:$0xff]  ;;  %v368_v19 = vld [vmem:[%s4920_s26 + $0x8] sm:$0xff] }
 0x113   :  { %v369_v12 = vcvt.s32.f32 %v367_v6  ;;  %3447 = vmatpush3.bf16.msra.mxu0 %v3444_v9  ;;  %v370_v21 = vcvt.s32.f32 %v368_v19  ;;  %v2972_v40 = vld [vmem:[%s4921_s3] ss:$0 sm:$0xff]  ;;  %v2973_v44 = vld [vmem:[%s4921_s3 + $0x1] ss:$0 sm:$0xff]  ;;  %v3513_v59 = vld [vmem:[#allocation7 + $0x4] ss:$12 sps:$4 sm:$0xff]  }
 0x114   :  { %3449 = vmatprep.subr.bf16.mxu0 %v3448_v13  ;;  %v291_v41 = vld [vmem:[%s4922_s29] sm:$0xff]  ;;  %v3516_v61 = vld [vmem:[#allocation7 + $0x8] ss:$12 sps:$4 sm:$0xff]   ;;  %655 = vmatprep.subr.bf16.mxu1 %v3513_v59  ;;  %v3525_v6 = vld [vmem:[#allocation7 + $0x4c] ss:$12 sps:$4 sm:$0xff]  }
 0x115   :  { %v371_v18 = vsub.f32 1.0, %v369_v12  ;;  %v372_v22 = vsub.f32 1.0, %v370_v21  ;;  %v3515_v60 = vld [vmem:[#allocation7] ss:$12 sps:$4 sm:$0xff]   ;;  %v3517_v63 = vld [vmem:[#allocation7 + $0x1c] ss:$12 sps:$4 sm:$0xff]  }
 0x116   :  { %267 = vperm.xlu0 %3501, %v262_v5   ;;  %656 = vmatpush1.bf16.msra.mxu1 %v3515_v60  ;;  %v3519_v1 = vld [vmem:[#allocation7 + $0x18] ss:$12 sps:$4 sm:$0xff]   ;;  %v3520_v2 = vld [vmem:[#allocation7 + $0x20] ss:$12 sps:$4 sm:$0xff]   ;;  %v3523_v4 = vld [vmem:[#allocation7 + $0x30] ss:$12 sps:$4 sm:$0xff]  }
 0x117   :  { %376 = vperm.xlu1 %3502, %v371_v18   ;;  %3451 = vmatpush3.bf16.msra.mxu0 %v3448_v13  ;;  %v3521_v3 = vld [vmem:[#allocation7 + $0x34] ss:$12 sps:$4 sm:$0xff]   ;;  %v3524_v5 = vld [vmem:[#allocation7 + $0x38] ss:$12 sps:$4 sm:$0xff]   ;;  %v3528_v8 = vld [vmem:[#allocation7 + $0x50] ss:$12 sps:$4 sm:$0xff]  }
 0x118   :  { %3453 = vmatprep.subr.bf16.mxu0 %v3452_v20  ;;  %657 = vmatprep.subr.bf16.mxu1 %v3517_v63  ;;  %v3527_v7 = vld [vmem:[#allocation7 + $0x48] ss:$12 sps:$4 sm:$0xff]   ;;  %v3529_v9 = vld [vmem:[#allocation7 + $0x64] ss:$12 sps:$4 sm:$0xff]   ;;  %v3531_v10 = vld [vmem:[#allocation7 + $0x60] ss:$12 sps:$4 sm:$0xff]  }
 0x119   :  { %v3532_v11 = vld [vmem:[#allocation7 + $0x68] ss:$12 sps:$4 sm:$0xff]   ;;  %v3535_v13 = vld [vmem:[#allocation7 + $0x78] ss:$12 sps:$4 sm:$0xff]   ;;  %v3536_v14 = vld [vmem:[#allocation7 + $0x80] ss:$12 sps:$4 sm:$0xff]  }
 0x11a   :  { %395 = vperm.xlu0 %3501, %v369_v12   ;;  %658 = vmatpush1.bf16.msra.mxu1 %v3519_v1  ;;  %v3533_v12 = vld [vmem:[#allocation7 + $0x7c] ss:$12 sps:$4 sm:$0xff]   ;;  %v3537_v15 = vld [vmem:[#allocation7 + $0x94] ss:$12 sps:$4 sm:$0xff]   ;;  %v3540_v17 = vld [vmem:[#allocation7 + $0x98] ss:$12 sps:$4 sm:$0xff]  }
 0x11b   :  { %381 = vperm.xlu1 %3502, %v372_v22   ;;  %3455 = vmatpush3.bf16.msra.mxu0 %v3452_v20  ;;  %v3539_v16 = vld [vmem:[#allocation7 + $0x90] ss:$12 sps:$4 sm:$0xff]   ;;  %v3541_v18 = vld [vmem:[#allocation7 + $0xac] ss:$12 sps:$4 sm:$0xff]   ;;  %v3543_v19 = vld [vmem:[#allocation7 + $0xa8] ss:$12 sps:$4 sm:$0xff]  }
 0x11c   :  { %3457 = vmatprep.subr.bf16.mxu0 %v3456_v25  ;;  %659 = vmatprep.subr.bf16.mxu1 %v3521_v3  ;;  %v3544_v20 = vld [vmem:[#allocation7 + $0xb0] ss:$12 sps:$4 sm:$0xff]  }
 0x11e   :  { %660 = vmatpush1.bf16.msra.mxu1 %v3523_v4 }
 0x11f   :  { %400 = vperm.xlu1 %3502, %v370_v21   ;;  %3459 = vmatpush3.bf16.msra.mxu0 %v3456_v25 }
 0x120   :  { %3461 = vmatprep.subr.bf16.mxu0 %v3460_v28  ;;  %661 = vmatprep.subr.bf16.mxu1 %v3525_v6 }
 0x122   :  { %662 = vmatpush1.bf16.msra.mxu1 %v3527_v7 }
 0x123   :  { %3463 = vmatpush3.bf16.msra.mxu0 %v3460_v28  ;;  %663 = vmatprep.subr.bf16.mxu1 %v3529_v9 }
 0x124   :  { %3465 = vmatprep.subr.bf16.mxu0 %v3464_v31 }
 0x126   :  { %664 = vmatpush1.bf16.msra.mxu1 %v3531_v10 }
 0x127   :  { %3467 = vmatpush3.bf16.msra.mxu0 %v3464_v31  ;;  %665 = vmatprep.subr.bf16.mxu1 %v3533_v12 }
 0x128   :  { %3469 = vmatprep.subr.bf16.mxu0 %v3468_v32 }
 0x12a   :  { %666 = vmatpush1.bf16.msra.mxu1 %v3535_v13 }
 0x12b   :  { %3471 = vmatpush3.bf16.msra.mxu0 %v3468_v32  ;;  %667 = vmatprep.subr.bf16.mxu1 %v3537_v15  ;;  %v458_v15 = vld [vmem:[%s4924_s14] sm:$0x1] }
 0x12c   :  { %3292 = vmatprep.subr.bf16.mxu0 %v4141_v62 }
 0x12e   :  { %668 = vmatpush1.bf16.msra.mxu1 %v3539_v16  ;;  %v459_v16 = vsub.f32 1.0, %v458_v15 }
 0x12f   :  { %669 = vmatprep.subr.bf16.mxu1 %v3541_v18 }
 0x132   :  { %670 = vmatpush1.bf16.msra.mxu1 %v3543_v19 }
 0x133   :  { %3312 = vmatprep.subr.bf16.mxu1 %v4141_v62 }
 0x191   :  { %v265_v35 = vpop.permute.xlu0 %264 }
 0x192   :  { %vm269_vm0 = vcmp.eq.s32.totalorder %v4501_v34, %v265_v35 }
 0x193   :  { %3289 = vmatprep.mubr.msk.f32.mxu0 %vm269_vm0, %v4140_v36 }
 0x195   :  { %v268_v37 = vpop.permute.xlu0 %267 }
 0x196   :  { %vm270_vm1 = vcmp.eq.s32.totalorder %v4501_v34, %v268_v37  ;;  %v377_v38 = vpop.permute.xlu1 %376  ;;  %v2974_v37 = vld [vmem:[%s4923_s16] ss:$0 sm:$0xff] }
 0x197   :  { %3290 = vmatmul.mubr.msk.f32.vlgmr.msra.gmra.mrb[0].mxu0 %vm270_vm1, %v4140_v36  ;;  %v388_v45 = vmul.f32 %v2972_v40, %v377_v38  ;;  %vm2830_vm1 = vcmask 1040384  }
 0x198   :  { %3293 = vmatpush3.bf16.msra.mxu0 %v3516_v61  ;;  %3308 = vmatprep.mubr.msk.bf16.mxu0 %vm4142_vm2, %v4141_v62 }
 0x199   :  { %v396_v47 = vpop.permute.xlu0 %395  ;;  %3294 = vmatprep.subr.bf16.mxu0 %v4141_v62 }
 0x19a   :  { %v382_v39 = vpop.permute.xlu1 %381  ;;  %v407_v53 = vmul.f32 %v2973_v44, %v396_v47 }
 0x19b   :  { %v389_v43 = vmul.f32 %v2972_v40, %v382_v39 }
 0x19c   :  { %3295 = vmatpush3.bf16.msra.mxu0 %v3520_v2 }
 0x19d   :  { %3296 = vmatprep.subr.bf16.mxu0 %v4141_v62 }
 0x19e   :  { %v401_v42 = vpop.permute.xlu1 %400 }
 0x19f   :  { %v408_v49 = vmul.f32 %v2973_v44, %v401_v42  ;;  %v2975_v42 = vld [vmem:[#allocation5] ss:$0 sm:$0xff] }
 0x1a0   :  { %3297 = vmatpush3.bf16.msra.mxu0 %v3524_v5 }
 0x1a1   :  { %3298 = vmatprep.subr.bf16.mxu0 %v4141_v62 }
 0x1a4   :  { %3299 = vmatpush3.bf16.msra.mxu0 %v3528_v8 }
 0x1a5   :  { %3300 = vmatprep.subr.bf16.mxu0 %v4141_v62 }
 0x1a8   :  { %3301 = vmatpush3.bf16.msra.mxu0 %v3532_v11 }
 0x1a9   :  { %3302 = vmatprep.subr.bf16.mxu0 %v4141_v62 }
 0x1ac   :  { %3303 = vmatpush3.bf16.msra.mxu0 %v3536_v14 }
 0x1ad   :  { %3304 = vmatprep.subr.bf16.mxu0 %v4141_v62 }
 0x1b0   :  { %3305 = vmatpush3.bf16.msra.mxu0 %v3540_v17  ;;  %v460_v17 = vmul.f32 -1e+09, %v459_v16 }
 0x1b1   :  { %3306 = vmatprep.subr.bf16.mxu0 %v4141_v62 }
 0x1b2   :  { %v464_v18 = vsel %vm462_vm6, %v460_v17, -1e+09  ;;  %v472_v19 = vsel %vm471_vm7, %v460_v17, -1e+09 }
 0x1b4   :  { %3307 = vmatpush3.bf16.msra.mxu0 %v3544_v20 }
 0x1b5   :  { %3336 = vmatprep.subr.bf16.mxu0 %v4141_v62 }
 0x26a   :  { %v3291_v46 = vpop.f32.mrb[0].mxu0 }
 0x26b   :  { %v364_v48 = vadd.f32 %v3291_v46, %v291_v41  ;;  %v358_v50 = vpop.f32.mrb[1].mxu0 }
 0x26c   :  { %v359_v51 = vadd.f32 %v358_v50, %v291_v41 }
 0x26d   :  { %v391_v52 = vadd.f32 %v389_v43, %v364_v48 }
 0x26e   :  { %v390_v54 = vadd.f32 %v388_v45, %v359_v51 }
 0x26f   :  { %v4514_v55 = vadd.f32 %v408_v49, %v391_v52  ;;  %v4552_v52 = vshrl.u32 %v259_v33, 7 }
 0x270   :  { %v4516_v56 = vadd.f32 %v407_v53, %v390_v54 }
 0x271   :  { %415 = vadd.xlane.f32.xlu1 %v4514_v55  ;;  %v421_v58 = vmul.f32 %v4514_v55, %v4514_v55  ;;  %v4555_v53 = vsub.s32 0, %v4552_v52  ;;  %v522_v54 = vsub.s32 2, %v4552_v52 }
 0x272   :  { %413 = vadd.xlane.f32.xlu0 %v4516_v56  ;;  %v420_v57 = vmul.f32 %v4516_v56, %v4516_v56 }
 0x273   :  { %v4581_v20 = vrot.slane %v464_v18, %v4555_v53 }
 0x276   :  { %422 = vadd.xlane.f32.xlu0 %v420_v57 }
 0x27a   :  { %424 = vadd.xlane.f32.xlu0 %v421_v58 }
 0x2fe   :  { %v416_v23 = vpop.xlane.xlu1 %415 }
 0x2ff   :  { %v414_v21 = vpop.xlane.xlu0 %413  ;;  %v419_v25 = vmul.f32 0.0078125, %v416_v23 }
 0x300   :  { %v418_v22 = vmul.f32 0.0078125, %v414_v21 }
 0x301   :  { %v429_v30 = vmul.f32 %v419_v25, %v419_v25 }
 0x302   :  { %v428_v26 = vmul.f32 %v418_v22, %v418_v22 }
 0x303   :  { %v423_v24 = vpop.xlane.xlu0 %422 }
 0x304   :  { %v426_v27 = vmul.f32 0.0078125, %v423_v24  ;;  %v4584_v24 = vrot.slane %v472_v19, %v4555_v53 }
 0x306   :  { %v430_v28 = vsub.f32 %v426_v27, %v428_v26 }
 0x307   :  { %v425_v29 = vpop.xlane.xlu0 %424 }
 0x308   :  { %v432_v31 = vadd.f32 1e-12, %v430_v28  ;;  %v427_v32 = vmul.f32 0.0078125, %v425_v29 }
 0x30a   :  { %3681 = vrsqrt.f32 %v432_v31  ;;  %v431_v35 = vsub.f32 %v427_v32, %v429_v30 }
 0x30c   :  { %v433_v36 = vadd.f32 1e-12, %v431_v35 }
 0x30e   :  { %3683 = vrsqrt.f32 %v433_v36 }
 0x314   :  { %v3682_v38 = vpop.eup %3681 }
 0x315   :  { %v442_v39 = vmul.f32 %v3682_v38, %v2974_v37 }
 0x317   :  { %v446_v40 = vmul.f32 %v442_v39, %v418_v22  ;;  %v444_v46 = vmul.f32 %v442_v39, %v4516_v56  ;;  %v4559_v56 = vsub.s32 1, %v4552_v52 }
 0x318   :  { %v3684_v41 = vpop.eup %3683 }
 0x319   :  { %v443_v43 = vmul.f32 %v3684_v41, %v2974_v37  ;;  %v454_v45 = vsub.f32 %v2975_v42, %v446_v40 }
 0x31b   :  { %v447_v44 = vmul.f32 %v443_v43, %v419_v25  ;;  %v445_v47 = vmul.f32 %v443_v43, %v4514_v55  ;;  %v4541_v49 = vadd.f32 %v454_v45, %v444_v46  ;;  %v509_v55 = vld [vmem:[#allocation8] sm:$0x7] }
 0x31c   :  { %v515_v57 = vrot.slane %v509_v55, %v4555_v53  ;;  %v523_v58 = vrot.slane %v509_v55, %v522_v54  ;;  %v519_v61 = vrot.slane %v509_v55, %v4559_v56 }
 0x31d   :  { %v455_v48 = vsub.f32 %v2975_v42, %v447_v44 }
 0x31f   :  { %v4543_v50 = vadd.f32 %v455_v48, %v445_v47 }
 0x321   :  { %v510_v51 = vpack.c.bf16 %v4543_v50, %v4541_v49 }
 0x323   :  { %688 = vmatmul.mubr.bf16.vlgmr.msra.gmra.mrb[0].mxu1 %v510_v51  ;;  %3309 = vmatmul.mubr.bf16.vlgmr.msra.gmra.mrb[4].mxu0 %v510_v51 }
 0x324   :  { %3314 = vmatprep.mubr.msk.bf16.mxu1 %vm4142_vm2, %v4141_v62  ;;  %3352 = vmatprep.mubr.msk.bf16.mxu0 %vm4142_vm2, %v4141_v62 }
 0x3f6   :  { %v689_v59 = vpop.f32.mrb[0].mxu1  ;;  %v732_v60 = vpop.f32.mrb[4].mxu0 }
 0x3f7   :  { %v691_v33 = vpop.f32.mrb[1].mxu1  ;;  %v3310_v63 = vpop.f32.mrb[5].mxu0  ;;  %v690_v3 = vadd.f32 %v689_v59, %v515_v57  ;;  %v733_v4 = vadd.f32 %v732_v60, %v523_v58 }
 0x3f8   :  { %v693_v1 = vpop.f32.mrb[2].mxu1  ;;  %v735_v2 = vpop.f32.mrb[6].mxu0  ;;  %v692_v9 = vadd.f32 %v691_v33, %v519_v61 }
 0x3f9   :  { %v694_v5 = vadd.f32 %v693_v1, %v515_v57  ;;  %v736_v6 = vadd.f32 %v735_v2, %v523_v58  ;;  %v695_v7 = vpop.f32.mrb[3].mxu1  ;;  %v3311_v8 = vpop.f32.mrb[7].mxu0 }
 0x3fa   :  { %v696_v10 = vadd.f32 %v695_v7, %v519_v61 }
 0x3fb   :  { %v739_v11 = vpack.c.bf16 %v694_v5, %v690_v3  ;;  %v4565_v12 = vpack.c.bf16 %v736_v6, %v733_v4 }
 0x3fc   :  { %v740_v13 = vpack.c.bf16 %v696_v10, %v692_v9 }
 0x3fe   :  { %v747_v14 = vsel %vm742_vm3, %v740_v13, 0 }
 0x3ff   :  { %3313 = vmatpush3.bf16.xpose.msra.mxu1 %v747_v14 }
 0x400   :  { %3318 = vmatprep.subr.bf16.mxu1 %v4141_v62 }
 0x406   :  { %3315 = vmatmul.mubr.msk.bf16.vlgmr.msra.gmra.mrb[4].mxu1 %vm742_vm3, %v739_v11 }
 0x407   :  { %3319 = vmatpush3.bf16.msra.mxu1 %v4565_v12  ;;  %3320 = vmatprep.mubr.msk.bf16.mxu1 %vm4142_vm2, %v4141_v62 }
 0x408   :  { %3324 = vmatprep.subr.bf16.mxu1 %v4141_v62 }
 0x4d9   :  { %v783_v21 = vpop.f32.mrb[4].mxu1 }
 0x4da   :  { %v790_v22 = vmul.f32 0.125, %v783_v21  ;;  %v3316_v23 = vpop.f32.mrb[5].mxu1 }
 0x4db   :  { %v786_v25 = vpop.f32.mrb[6].mxu1 }
 0x4dc   :  { %v791_v26 = vmul.f32 0.125, %v786_v25  ;;  %v3317_v27 = vpop.f32.mrb[7].mxu1  ;;  %v792_v28 = vadd.f32 %v790_v22, %v4581_v20 }
 0x4de   :  { %v795_v34 = vsel %vm794_vm8, %v792_v28, -inf  ;;  %v793_v29 = vadd.f32 %v791_v26, %v4584_v24 }
 0x4df   :  { %796 = vmax.xlane.f32.xlu1 %v795_v34 }
 0x4e0   :  { %v798_v30 = vsel %vm794_vm8, %v793_v29, -inf }
 0x4e1   :  { %799 = vmax.xlane.f32.xlu0 %v798_v30  ;;  %v3545_v30 = vld [vmem:[#allocation10] sm:$0xff]  }
 0x4e2   :  { %3337 = vmatpush3.bf16.msra.mxu0 %v3545_v30 }
 0x4e3   :  { %3338 = vmatprep.subr.bf16.mxu0 %v4141_v62 }
 0x56c   :  { %v797_v31 = vpop.xlane.xlu1 %796 }
 0x56d   :  { %v801_v32 = vsub.f32 %v792_v28, %v797_v31  ;;  %v3546_v31 = vld [vmem:[#allocation10 + $0x8] sm:$0xff]  }
 0x56e   :  { %v800_v35 = vpop.xlane.xlu0 %799  ;;  %3339 = vmatpush3.bf16.msra.mxu0 %v3546_v31 }
 0x56f   :  { %v803_v36 = vmul.f32 1.442695, %v801_v32  ;;  %v802_v37 = vsub.f32 %v793_v29, %v800_v35  ;;  %3340 = vmatprep.subr.bf16.mxu0 %v4141_v62  ;;  %v3548_v32 = vld [vmem:[#allocation10 + $0x18] sm:$0xff]   ;;  %v3549_v35 = vld [vmem:[#allocation10 + $0x20] sm:$0xff]  }
 0x571   :  { %3685 = vpow2.f32 %v803_v36  ;;  %v805_v38 = vmul.f32 1.442695, %v802_v37  ;;  %v3550_v36 = vld [vmem:[#allocation10 + $0x28] sm:$0xff]   ;;  %v3551_v37 = vld [vmem:[#allocation10 + $0x30] sm:$0xff]  }
 0x573   :  { %3687 = vpow2.f32 %v805_v38  ;;  %v3552_v38 = vld [vmem:[#allocation10 + $0x38] sm:$0xff]  }
 0x57b   :  { %v3686_v39 = vpop.eup %3685 }
 0x57c   :  { %v807_v40 = vsel %vm794_vm8, %v3686_v39, 0.0 }
 0x57d   :  { %v3688_v41 = vpop.eup %3687  ;;  %808 = vadd.xlane.f32.xlu1 %v807_v40 }
 0x57e   :  { %v810_v42 = vsel %vm794_vm8, %v3688_v41, 0.0 }
 0x57f   :  { %811 = vadd.xlane.f32.xlu0 %v810_v42 }
 0x58e   :  { %866 = vrot.lane.b32.xlu1 %v740_v13, %s4125_s6 }
 0x595   :  { %863 = vrot.lane.b32.xlu0 %v739_v11, %s4125_s6 }
 0x60a   :  { %v809_v43 = vpop.xlane.xlu1 %808 }
 0x60b   :  { %3689 = vrcp.f32 %v809_v43 }
 0x60c   :  { %v812_v44 = vpop.xlane.xlu0 %811 }
 0x60d   :  { %3691 = vrcp.f32 %v812_v44 }
 0x60e   :  { %v867_v51 = vpop.permute.xlu1 %866 }
 0x60f   :  { %v872_v57 = vsel %vm742_vm3, %v867_v51, 0 }
 0x610   :  { %v864_v58 = vpop.permute.xlu0 %863 }
 0x615   :  { %v3690_v45 = vpop.eup %3689 }
 0x616   :  { %v815_v47 = vmul.f32 %v3690_v45, %v3686_v39 }
 0x617   :  { %v3692_v46 = vpop.eup %3691 }
 0x618   :  { %v816_v48 = vmul.f32 %v3692_v46, %v3688_v41 }
 0x61a   :  { %v817_v55 = vpack.c.bf16 %v816_v48, %v815_v47 }
 0x61c   :  { %3321 = vmatmul.mubr.msk.bf16.vlgmr.msra.gmra.mrb[8].mxu1 %vm794_vm8, %v817_v55  ;;  %v3004_v55 = vld [vmem:[#allocation11] ss:$0 sm:$0xff] }
 0x61d   :  { %3325 = vmatpush3.bf16.xpose.msra.mxu1 %v872_v57  ;;  %3326 = vmatprep.mubr.msk.bf16.mxu1 %vm4142_vm2, %v4141_v62 }
 0x61e   :  { %3330 = vmatprep.subr.bf16.mxu1 %v4141_v62 }
 0x624   :  { %3327 = vmatmul.mubr.msk.bf16.vlgmr.msra.gmra.mrb[12].mxu1 %vm742_vm3, %v864_v58 }
 0x625   :  { %3332 = vmatprep.mubr.msk.bf16.mxu1 %vm4142_vm2, %v4141_v62 }
 0x6ef   :  { %v4602_v59 = vpop.f32.mrb[8].mxu1 }
 0x6f0   :  { %v3322_v60 = vpop.f32.mrb[9].mxu1 }
 0x6f1   :  { %v4604_v61 = vpop.f32.mrb[10].mxu1 }
 0x6f2   :  { %v3323_v33 = vpop.f32.mrb[11].mxu1 }
 0x6f7   :  { %v908_v63 = vpop.f32.mrb[12].mxu1 }
 0x6f8   :  { %v915_v1 = vmul.f32 0.125, %v908_v63  ;;  %v3328_v2 = vpop.f32.mrb[13].mxu1 }
 0x6f9   :  { %v911_v3 = vpop.f32.mrb[14].mxu1 }
 0x6fa   :  { %v916_v4 = vmul.f32 0.125, %v911_v3  ;;  %v3329_v5 = vpop.f32.mrb[15].mxu1  ;;  %v917_v6 = vadd.f32 %v915_v1, %v4581_v20 }
 0x6fb   :  { %v3558_v5 = vld [vmem:[#allocation16 + $0x14] ss:$8 sps:$4 sm:$0xff]  }
 0x6fc   :  { %v919_v7 = vsel %vm794_vm8, %v917_v6, -inf  ;;  %v918_v8 = vadd.f32 %v916_v4, %v4584_v24  ;;  %v3555_v4 = vld [vmem:[#allocation16 + $0x4] ss:$8 sps:$4 sm:$0xff]  }
 0x6fd   :  { %920 = vmax.xlane.f32.xlu1 %v919_v7  ;;  %v3559_v7 = vld [vmem:[#allocation16 + $0x20] ss:$8 sps:$4 sm:$0xff]  }
 0x6fe   :  { %v922_v9 = vsel %vm794_vm8, %v918_v8, -inf }
 0x6ff   :  { %923 = vmax.xlane.f32.xlu0 %v922_v9  ;;  %v3564_v9 = vld [vmem:[#allocation16 + $0x34] ss:$8 sps:$4 sm:$0xff]  }
 0x78a   :  { %v921_v10 = vpop.xlane.xlu1 %920 }
 0x78b   :  { %v925_v11 = vsub.f32 %v917_v6, %v921_v10  ;;  %v3556_v6 = vld [vmem:[#allocation16 + $0x10] ss:$8 sps:$4 sm:$0xff]   ;;  %v3567_v10 = vld [vmem:[#allocation16 + $0x44] ss:$8 sps:$4 sm:$0xff]  }
 0x78c   :  { %v924_v13 = vpop.xlane.xlu0 %923 }
 0x78d   :  { %v927_v14 = vmul.f32 1.442695, %v925_v11  ;;  %v926_v15 = vsub.f32 %v918_v8, %v924_v13  ;;  %v3562_v8 = vld [vmem:[#allocation16 + $0x30] ss:$8 sps:$4 sm:$0xff]   ;;  %v3565_v11 = vld [vmem:[#allocation16 + $0x40] ss:$8 sps:$4 sm:$0xff]  }
 0x78e   :  { %v3570_v13 = vld [vmem:[#allocation16 + $0x54] ss:$8 sps:$4 sm:$0xff]  }
 0x78f   :  { %3693 = vpow2.f32 %v927_v14  ;;  %v929_v16 = vmul.f32 1.442695, %v926_v15  ;;  %v3568_v14 = vld [vmem:[#allocation16 + $0x50] ss:$8 sps:$4 sm:$0xff]   ;;  %v3573_v15 = vld [vmem:[#allocation16 + $0x64] ss:$8 sps:$4 sm:$0xff]  }
 0x791   :  { %3695 = vpow2.f32 %v929_v16  ;;  %v3571_v16 = vld [vmem:[#allocation16 + $0x60] ss:$8 sps:$4 sm:$0xff]  }
 0x799   :  { %v3694_v17 = vpop.eup %3693 }
 0x79a   :  { %v931_v18 = vsel %vm794_vm8, %v3694_v17, 0.0 }
 0x79b   :  { %v3696_v19 = vpop.eup %3695  ;;  %932 = vadd.xlane.f32.xlu1 %v931_v18  ;;  %v3574_v18 = vld [vmem:[#allocation16 + $0x70] ss:$8 sps:$4 sm:$0xff]  }
 0x79c   :  { %v934_v21 = vsel %vm794_vm8, %v3696_v19, 0.0 }
 0x79d   :  { %935 = vadd.xlane.f32.xlu0 %v934_v21 }
 0x7ac   :  { %943 = vrot.lane.b32.xlu1 %v4565_v12, %s4125_s6  ;;  %v3547_v12 = vld [vmem:[#allocation10 + $0x10] sm:$0xff]  }
 0x7ad   :  { %3341 = vmatpush3.bf16.msra.mxu0 %v3547_v12 }
 0x7ae   :  { %3342 = vmatprep.subr.bf16.mxu0 %v4141_v62 }
 0x7b1   :  { %3343 = vmatpush3.bf16.msra.mxu0 %v3548_v32 }
 0x7b2   :  { %3344 = vmatprep.subr.bf16.mxu0 %v4141_v62 }
 0x7b5   :  { %3345 = vmatpush3.bf16.msra.mxu0 %v3549_v35  ;;  %v3013_v35 = vld [vmem:[#allocation13] ss:$0 sm:$0xff] }
 0x7b6   :  { %3346 = vmatprep.subr.bf16.mxu0 %v4141_v62 }
 0x7b9   :  { %3347 = vmatpush3.bf16.msra.mxu0 %v3550_v36 }
 0x7ba   :  { %3348 = vmatprep.subr.bf16.mxu0 %v4141_v62 }
 0x7bd   :  { %3349 = vmatpush3.bf16.msra.mxu0 %v3551_v37 }
 0x7be   :  { %3350 = vmatprep.subr.bf16.mxu0 %v4141_v62 }
 0x7c1   :  { %3351 = vmatpush3.bf16.msra.mxu0 %v3552_v38 }
 0x828   :  { %v933_v22 = vpop.xlane.xlu1 %932 }
 0x829   :  { %3697 = vrcp.f32 %v933_v22 }
 0x82a   :  { %v936_v23 = vpop.xlane.xlu0 %935 }
 0x82b   :  { %3699 = vrcp.f32 %v936_v23 }
 0x82c   :  { %v944_v25 = vpop.permute.xlu1 %943 }
 0x82d   :  { %3331 = vmatpush3.bf16.msra.mxu1 %v944_v25 }
 0x82e   :  { %1270 = vmatprep.subr.bf16.mxu1 %v3555_v4  ;;  %v3588_v4 = vld [vmem:[#allocation17 + $0x28] sm:$0xff]  }
 0x833   :  { %v3698_v26 = vpop.eup %3697 }
 0x834   :  { %v939_v28 = vmul.f32 %v3698_v26, %v3694_v17  ;;  %v3576_v17 = vld [vmem:[#allocation16 + $0x74] ss:$8 sps:$4 sm:$0xff]  }
 0x835   :  { %v3700_v27 = vpop.eup %3699 }
 0x836   :  { %v940_v34 = vmul.f32 %v3700_v27, %v3696_v19 }
 0x838   :  { %v941_v29 = vpack.c.bf16 %v940_v34, %v939_v28 }
 0x83a   :  { %3333 = vmatmul.mubr.msk.bf16.vlgmr.msra.gmra.mrb[16].mxu1 %vm794_vm8, %v941_v29 }
 0x83b   :  { %1302 = vmatprep.mubr.bf16.mxu1 %v4139_v0 }
 0x90d   :  { %v983_v39 = vpop.f32.mrb[16].mxu1 }
 0x90e   :  { %v3334_v40 = vpop.f32.mrb[17].mxu1 }
 0x90f   :  { %v986_v41 = vpop.f32.mrb[18].mxu1 }
 0x910   :  { %v3503_v42 = vpack.i.bf16 %v986_v41, %v983_v39  ;;  %v3335_v43 = vpop.f32.mrb[19].mxu1  ;;  %v3014_v39 = vld [vmem:[#allocation14] ss:$0 sm:$0xff] }
 0x912   :  { %3504 = vrot.lane.b32.xlu0 %v3503_v42, %s4125_s6 }
 0x984   :  { %v3505_v44 = vpop.permute.xlu0 %3504 }
 0x985   :  { %v3507_v45 = vunpack.i.h.bf16 %v3505_v44  ;;  %v3506_v46 = vunpack.i.l.bf16 %v3505_v44 }
 0x987   :  { %v999_v47 = vsel %vm742_vm3, %v4604_v61, %v3507_v45  ;;  %v998_v48 = vsel %vm742_vm3, %v4602_v59, %v3506_v46 }
 0x988   :  { %v1017_v51 = vpack.c.bf16 %v999_v47, %v998_v48 }
 0x98a   :  { %3353 = vmatmul.mubr.bf16.vlgmr.msra.gmra.mrb[8].mxu0 %v1017_v51 }
 0xa5d   :  { %v1106_v57 = vpop.f32.mrb[8].mxu0 }
 0xa5e   :  { %v1107_v58 = vadd.f32 %v3004_v55, %v1106_v57  ;;  %v3354_v60 = vpop.f32.mrb[9].mxu0  ;;  %v3578_v57 = vld [vmem:[#allocation17] sm:$0xff]  }
 0xa5f   :  { %v1109_v33 = vpop.f32.mrb[10].mxu0  ;;  %v3580_v60 = vld [vmem:[#allocation17 + $0x8] sm:$0xff]  }
 0xa60   :  { %v4629_v63 = vadd.f32 %v1107_v58, %v4541_v49  ;;  %v1110_v1 = vadd.f32 %v3004_v55, %v1109_v33  ;;  %v3355_v2 = vpop.f32.mrb[11].mxu0  ;;  %v3553_v49 = vld [vmem:[#allocation16] ss:$8 sps:$4 sm:$0xff]   ;;  %v3581_v33 = vld [vmem:[#allocation17 + $0x50] sm:$0xff]  }
 0xa61   :  { %1271 = vmatpush1.bf16.msra.mxu1 %v3553_v49  ;;  %v3577_v55 = vld [vmem:[#allocation17 + $0x40] sm:$0xff]   ;;  %v3579_v58 = vld [vmem:[#allocation17 + $0x48] sm:$0xff]   ;;  %v3584_v2 = vld [vmem:[#allocation17 + $0x18] sm:$0xff]  }
 0xa62   :  { %v4632_v3 = vadd.f32 %v1110_v1, %v4543_v50  ;;  %1117 = vadd.xlane.f32.xlu1 %v4629_v63  ;;  %v1123_v59 = vmul.f32 %v4629_v63, %v4629_v63  ;;  %1272 = vmatprep.subr.bf16.mxu1 %v3558_v5  ;;  %v3561_v50 = vld [vmem:[#allocation16 + $0x24] ss:$8 sps:$4 sm:$0xff]   ;;  %v3583_v1 = vld [vmem:[#allocation17 + $0x58] sm:$0xff]   ;;  %v3589_v49 = vld [vmem:[#allocation17 + $0x70] sm:$0xff]  }
 0xa63   :  { %3178 = vmatprep.subr.bf16.mxu0 %v3577_v55  ;;  %v3590_v5 = vld [vmem:[#allocation17 + $0x30] sm:$0xff]  }
 0xa64   :  { %1119 = vadd.xlane.f32.xlu0 %v4632_v3  ;;  %v1124_v61 = vmul.f32 %v4632_v3, %v4632_v3  ;;  %3179 = vmatpush3.bf16.msra.mxu0 %v3578_v57 }
 0xa65   :  { %1273 = vmatpush1.bf16.msra.mxu1 %v3556_v6  ;;  %3180 = vmatprep.subr.bf16.mxu0 %v3579_v58  ;;  %v3591_v6 = vld [vmem:[#allocation17 + $0x78] sm:$0xff]  }
 0xa66   :  { %1125 = vadd.xlane.f32.xlu1 %v1123_v59  ;;  %1274 = vmatprep.subr.bf16.mxu1 %v3561_v50  ;;  %v3586_v59 = vld [vmem:[#allocation17 + $0x20] sm:$0xff]   ;;  %v3592_v50 = vld [vmem:[#allocation17 + $0x38] sm:$0xff]  }
 0xa68   :  { %1127 = vadd.xlane.f32.xlu0 %v1124_v61  ;;  %3181 = vmatpush3.bf16.msra.mxu0 %v3580_v60  ;;  %v3587_v61 = vld [vmem:[#allocation17 + $0x68] sm:$0xff]  }
 0xa69   :  { %1275 = vmatpush1.bf16.msra.mxu1 %v3559_v7  ;;  %3182 = vmatprep.subr.bf16.mxu0 %v3581_v33  ;;  %v1177_v7 = vld [vmem:[%s4897_s15] sm:$0x3] }
 0xa6a   :  { %1276 = vmatprep.subr.bf16.mxu1 %v3564_v9  ;;  %v1187_v9 = vrot.slane %v1177_v7, %v4559_v56 }
 0xa6d   :  { %1277 = vmatpush1.bf16.msra.mxu1 %v3562_v8  ;;  %v1183_v8 = vrot.slane %v1177_v7, %v4555_v53 }
 0xa6e   :  { %1278 = vmatprep.subr.bf16.mxu1 %v3567_v10 }
 0xa71   :  { %1279 = vmatpush1.bf16.msra.mxu1 %v3565_v11 }
 0xa72   :  { %1280 = vmatprep.subr.bf16.mxu1 %v3570_v13 }
 0xa75   :  { %1281 = vmatpush1.bf16.msra.mxu1 %v3568_v14 }
 0xa76   :  { %1282 = vmatprep.subr.bf16.mxu1 %v3573_v15 }
 0xa79   :  { %1283 = vmatpush1.bf16.msra.mxu1 %v3571_v16 }
 0xa7a   :  { %1284 = vmatprep.subr.bf16.mxu1 %v3576_v17 }
 0xa7d   :  { %1285 = vmatpush1.bf16.msra.mxu1 %v3574_v18 }
 0xaef   :  { %v1118_v19 = vpop.xlane.xlu1 %1117 }
 0xaf0   :  { %v1121_v21 = vmul.f32 0.0078125, %v1118_v19 }
 0xaf1   :  { %v1120_v22 = vpop.xlane.xlu0 %1119 }
 0xaf2   :  { %v1122_v23 = vmul.f32 0.0078125, %v1120_v22  ;;  %v1131_v26 = vmul.f32 %v1121_v21, %v1121_v21 }
 0xaf3   :  { %v1126_v25 = vpop.xlane.xlu1 %1125 }
 0xaf4   :  { %v1129_v27 = vmul.f32 0.0078125, %v1126_v25  ;;  %v1132_v34 = vmul.f32 %v1122_v23, %v1122_v23 }
 0xaf5   :  { %v1128_v28 = vpop.xlane.xlu0 %1127 }
 0xaf6   :  { %v1133_v29 = vsub.f32 %v1129_v27, %v1131_v26  ;;  %v1130_v30 = vmul.f32 0.0078125, %v1128_v28 }
 0xaf8   :  { %v1135_v31 = vadd.f32 1e-12, %v1133_v29  ;;  %v1134_v12 = vsub.f32 %v1130_v30, %v1132_v34 }
 0xafa   :  { %3701 = vrsqrt.f32 %v1135_v31  ;;  %v1136_v32 = vadd.f32 1e-12, %v1134_v12 }
 0xafc   :  { %3703 = vrsqrt.f32 %v1136_v32 }
 0xb04   :  { %v3702_v36 = vpop.eup %3701 }
 0xb05   :  { %v1145_v37 = vmul.f32 %v3702_v36, %v3013_v35 }
 0xb06   :  { %v3704_v38 = vpop.eup %3703 }
 0xb07   :  { %v1146_v40 = vmul.f32 %v3704_v38, %v3013_v35  ;;  %v1149_v41 = vmul.f32 %v1145_v37, %v1121_v21  ;;  %v1147_v44 = vmul.f32 %v1145_v37, %v4629_v63  ;;  %v3582_v63 = vld [vmem:[#allocation17 + $0x10] sm:$0xff]  }
 0xb08   :  { %3183 = vmatpush3.bf16.msra.mxu0 %v3582_v63 }
 0xb09   :  { %v1150_v42 = vmul.f32 %v1146_v40, %v1122_v23  ;;  %v1157_v43 = vsub.f32 %v3014_v39, %v1149_v41  ;;  %v1148_v45 = vmul.f32 %v1146_v40, %v4632_v3  ;;  %3184 = vmatprep.subr.bf16.mxu0 %v3583_v1  ;;  %v3585_v3 = vld [vmem:[#allocation17 + $0x60] sm:$0xff]  }
 0xb0b   :  { %v1158_v46 = vsub.f32 %v3014_v39, %v1150_v42  ;;  %v4642_v47 = vadd.f32 %v1157_v43, %v1147_v44 }
 0xb0c   :  { %3185 = vmatpush3.bf16.msra.mxu0 %v3584_v2 }
 0xb0d   :  { %v4644_v48 = vadd.f32 %v1158_v46, %v1148_v45  ;;  %3186 = vmatprep.subr.bf16.mxu0 %v3585_v3 }
 0xb0f   :  { %v1178_v51 = vpack.c.bf16 %v4644_v48, %v4642_v47 }
 0xb10   :  { %3187 = vmatpush3.bf16.msra.mxu0 %v3586_v59 }
 0xb11   :  { %1303 = vmatmul.mubr.bf16.vlgmr.msra.gmra.mrb[20].mxu1 %v1178_v51  ;;  %3188 = vmatprep.subr.bf16.mxu0 %v3587_v61 }
 0xb12   :  { %1859 = vmatprep.mubr.bf16.mxu1 %v4139_v0 }
 0xb14   :  { %3189 = vmatpush3.bf16.msra.mxu0 %v3588_v4 }
 0xb15   :  { %3190 = vmatprep.subr.bf16.mxu0 %v3589_v49 }
 0xb18   :  { %3191 = vmatpush3.bf16.msra.mxu0 %v3590_v5 }
 0xb19   :  { %3192 = vmatprep.subr.bf16.mxu0 %v3591_v6 }
 0xb1c   :  { %3193 = vmatpush3.bf16.msra.mxu0 %v3592_v50 }
 0xb1d   :  { %3356 = vmatprep.subr.bf16.mxu0 %v4141_v62 }
 0xbe4   :  { %v1304_v10 = vpop.f32.mrb[20].mxu1 }
 0xbe5   :  { %v4655_v11 = vadd.f32 %v1304_v10, %v1183_v8  ;;  %v1306_v13 = vpop.f32.mrb[21].mxu1 }
 0xbe6   :  { %v4657_v14 = vadd.f32 %v1306_v13, %v1187_v9  ;;  %v1308_v15 = vpop.f32.mrb[22].mxu1 }
 0xbe7   :  { %v4660_v16 = vmul.f32 0.70710677, %v4655_v11  ;;  %v4662_v17 = vadd.f32 %v1308_v15, %v1183_v8  ;;  %v1310_v18 = vpop.f32.mrb[23].mxu1 }
 0xbe8   :  { %v4665_v19 = vmul.f32 0.70710677, %v4657_v14  ;;  %v4667_v21 = vadd.f32 %v1310_v18, %v1187_v9 }
 0xbe9   :  { %v1321_v22 = vand.u32 2147483647, %v4660_v16  ;;  %v4671_v23 = vmul.f32 0.70710677, %v4662_v17  ;;  %vm1401_vm9 = vcmp.ge.f32.partialorder %v4660_v16, 0.0 }
 0xbea   :  { %v1322_v25 = vand.u32 2147483647, %v4665_v19  ;;  %v4675_v26 = vmul.f32 0.70710677, %v4667_v21  ;;  %vm1402_vm10 = vcmp.ge.f32.partialorder %v4665_v19, 0.0 }
 0xbeb   :  { %v1325_v27 = vmul.f32 0.3275911, %v1321_v22  ;;  %v1323_v28 = vand.u32 2147483647, %v4671_v23  ;;  %v1377_v37 = vsub.f32 0.0, %v1321_v22  ;;  %vm1403_vm11 = vcmp.ge.f32.partialorder %v4671_v23, 0.0 }
 0xbec   :  { %v1326_v34 = vmul.f32 0.3275911, %v1322_v25  ;;  %v1324_v29 = vand.u32 2147483647, %v4675_v26  ;;  %v1378_v38 = vsub.f32 0.0, %v1322_v25  ;;  %vm1404_vm12 = vcmp.ge.f32.partialorder %v4675_v26, 0.0 }
 0xbed   :  { %v1329_v30 = vadd.f32 1.0, %v1325_v27  ;;  %v1327_v31 = vmul.f32 0.3275911, %v1323_v28  ;;  %v1381_v40 = vmul.f32 %v1377_v37, %v1321_v22  ;;  %v1379_v41 = vsub.f32 0.0, %v1323_v28 }
 0xbee   :  { %v1330_v12 = vadd.f32 1.0, %v1326_v34  ;;  %v1328_v32 = vmul.f32 0.3275911, %v1324_v29  ;;  %v1382_v44 = vmul.f32 %v1378_v38, %v1322_v25  ;;  %v1380_v46 = vsub.f32 0.0, %v1324_v29 }
 0xbef   :  { %3705 = vrcp.f32 %v1329_v30  ;;  %v1331_v35 = vadd.f32 1.0, %v1327_v31  ;;  %v1385_v57 = vmul.f32 1.442695, %v1381_v40  ;;  %v1383_v60 = vmul.f32 %v1379_v41, %v1323_v28 }
 0xbf0   :  { %3707 = vrcp.f32 %v1330_v12  ;;  %v1332_v36 = vadd.f32 1.0, %v1328_v32  ;;  %v1387_v63 = vmul.f32 1.442695, %v1382_v44  ;;  %v1384_v59 = vmul.f32 %v1380_v46, %v1324_v29 }
 0xbf1   :  { %3709 = vrcp.f32 %v1331_v35  ;;  %v1389_v6 = vmul.f32 1.442695, %v1383_v60 }
 0xbf2   :  { %3711 = vrcp.f32 %v1332_v36  ;;  %v1391_v10 = vmul.f32 1.442695, %v1384_v59 }
 0xbf3   :  { %3713 = vpow2.f32 %v1385_v57 }
 0xbf4   :  { %3715 = vpow2.f32 %v1387_v63 }
 0xbf5   :  { %3717 = vpow2.f32 %v1389_v6 }
 0xbf6   :  { %3719 = vpow2.f32 %v1391_v10 }
 0xbf9   :  { %v3706_v39 = vpop.eup %3705 }
 0xbfa   :  { %v3708_v42 = vpop.eup %3707  ;;  %v1341_v43 = vmul.f32 1.0614054, %v3706_v39 }
 0xbfb   :  { %v1342_v45 = vmul.f32 1.0614054, %v3708_v42  ;;  %v3710_v55 = vpop.eup %3709 }
 0xbfc   :  { %v1345_v51 = vadd.f32 -1.4531521, %v1341_v43  ;;  %v1343_v1 = vmul.f32 1.0614054, %v3710_v55  ;;  %v3712_v2 = vpop.eup %3711 }
 0xbfd   :  { %v1346_v58 = vadd.f32 -1.4531521, %v1342_v45  ;;  %v1344_v49 = vmul.f32 1.0614054, %v3712_v2  ;;  %v3714_v37 = vpop.eup %3713 }
 0xbfe   :  { %v1349_v33 = vmul.f32 %v3706_v39, %v1345_v51  ;;  %v1347_v4 = vadd.f32 -1.4531521, %v1343_v1  ;;  %v3716_v40 = vpop.eup %3715 }
 0xbff   :  { %v1350_v3 = vmul.f32 %v3708_v42, %v1346_v58  ;;  %v1348_v8 = vadd.f32 -1.4531521, %v1344_v49  ;;  %v3718_v58 = vpop.eup %3717 }
 0xc00   :  { %v1353_v61 = vadd.f32 1.4214138, %v1349_v33  ;;  %v1351_v7 = vmul.f32 %v3710_v55, %v1347_v4 }
 0xc01   :  { %v1354_v5 = vadd.f32 1.4214138, %v1350_v3  ;;  %v1352_v18 = vmul.f32 %v3712_v2, %v1348_v8  ;;  %v3720_v3 = vpop.eup %3719  ;;  %v1315_v8 = vmul.f32 0.5, %v4662_v17 }
 0xc02   :  { %v1357_v50 = vmul.f32 %v3706_v39, %v1353_v61  ;;  %v1355_v15 = vadd.f32 1.4214138, %v1351_v7 }
 0xc03   :  { %v1358_v9 = vmul.f32 %v3708_v42, %v1354_v5  ;;  %v1356_v28 = vadd.f32 1.4214138, %v1352_v18 }
 0xc04   :  { %v1361_v13 = vadd.f32 -0.28449672, %v1357_v50  ;;  %v1359_v27 = vmul.f32 %v3710_v55, %v1355_v15  ;;  %v1316_v15 = vmul.f32 0.5, %v4667_v21 }
 0xc05   :  { %v1362_v22 = vadd.f32 -0.28449672, %v1358_v9  ;;  %v1360_v31 = vmul.f32 %v3712_v2, %v1356_v28  ;;  %v1314_v9 = vmul.f32 0.5, %v4657_v14 }
 0xc06   :  { %v1365_v25 = vmul.f32 %v3706_v39, %v1361_v13  ;;  %v1363_v30 = vadd.f32 -0.28449672, %v1359_v27  ;;  %v3031_v27 = vld [vmem:[#allocation19] ss:$0 sm:$0xff] }
 0xc07   :  { %v1366_v34 = vmul.f32 %v3708_v42, %v1362_v22  ;;  %v1364_v36 = vadd.f32 -0.28449672, %v1360_v31 }
 0xc08   :  { %v1369_v29 = vadd.f32 0.2548296, %v1365_v25  ;;  %v1367_v35 = vmul.f32 %v3710_v55, %v1363_v30 }
 0xc09   :  { %v1370_v12 = vadd.f32 0.2548296, %v1366_v34  ;;  %v1368_v44 = vmul.f32 %v3712_v2, %v1364_v36  ;;  %v3595_v36 = vld [vmem:[#allocation7 + $0xc4] ss:$12 sps:$4 sm:$0xff]  }
 0xc0a   :  { %v1373_v32 = vmul.f32 %v3706_v39, %v1369_v29  ;;  %v1371_v43 = vadd.f32 0.2548296, %v1367_v35  ;;  %1827 = vmatprep.subr.bf16.mxu1 %v3595_v36 }
 0xc0b   :  { %v1374_v38 = vmul.f32 %v3708_v42, %v1370_v12  ;;  %v1372_v57 = vadd.f32 0.2548296, %v1368_v44  ;;  %v3604_v44 = vld [vmem:[#allocation7 + $0xf8] ss:$12 sps:$4 sm:$0xff]  }
 0xc0c   :  { %v1393_v41 = vmul.f32 %v3714_v37, %v1373_v32  ;;  %v1375_v51 = vmul.f32 %v3710_v55, %v1371_v43  ;;  %v1313_v55 = vmul.f32 0.5, %v4655_v11  ;;  %v3593_v37 = vld [vmem:[#allocation7 + $0xc0] ss:$12 sps:$4 sm:$0xff]   ;;  %v3601_v43 = vld [vmem:[#allocation7 + $0xf0] ss:$12 sps:$4 sm:$0xff]  }
 0xc0d   :  { %v1394_v45 = vmul.f32 %v3716_v40, %v1374_v38  ;;  %v1376_v1 = vmul.f32 %v3712_v2, %v1372_v57  ;;  %v3596_v38 = vld [vmem:[#allocation7 + $0xc8] ss:$12 sps:$4 sm:$0xff]   ;;  %1828 = vmatpush1.bf16.msra.mxu1 %v3593_v37  ;;  %v3600_v40 = vld [vmem:[#allocation7 + $0xe0] ss:$12 sps:$4 sm:$0xff]   ;;  %v3611_v57 = vld [vmem:[#allocation7 + $0x124] ss:$12 sps:$4 sm:$0xff]  }
 0xc0e   :  { %v1397_v46 = vsub.f32 1.0, %v1393_v41  ;;  %v1395_v63 = vmul.f32 %v3718_v58, %v1375_v51  ;;  %v3603_v41 = vld [vmem:[#allocation7 + $0xf4] ss:$12 sps:$4 sm:$0xff]   ;;  %v3608_v51 = vld [vmem:[#allocation7 + $0x110] ss:$12 sps:$4 sm:$0xff]  }
 0xc0f   :  { %v1398_v60 = vsub.f32 1.0, %v1394_v45  ;;  %v1396_v42 = vmul.f32 %v3720_v3, %v1376_v1  ;;  %v3607_v45 = vld [vmem:[#allocation7 + $0x10c] ss:$12 sps:$4 sm:$0xff]   ;;  %v3619_v3 = vld [vmem:[#allocation7 + $0x154] ss:$12 sps:$4 sm:$0xff]  }
 0xc10   :  { %v1405_v33 = vsub.f32 0.0, %v1397_v46  ;;  %v1399_v61 = vsub.f32 1.0, %v1395_v63  ;;  %v3609_v58 = vld [vmem:[#allocation7 + $0x120] ss:$12 sps:$4 sm:$0xff]   ;;  %v3613_v63 = vld [vmem:[#allocation7 + $0x138] ss:$12 sps:$4 sm:$0xff]  }
 0xc11   :  { %v1406_v39 = vsub.f32 0.0, %v1398_v60  ;;  %v1400_v5 = vsub.f32 1.0, %v1396_v42  ;;  %v3616_v1 = vld [vmem:[#allocation7 + $0x140] ss:$12 sps:$4 sm:$0xff]   ;;  %v3621_v42 = vld [vmem:[#allocation7 + $0x168] ss:$12 sps:$4 sm:$0xff]  }
 0xc12   :  { %v1409_v59 = vsel %vm1401_vm9, %v1397_v46, %v1405_v33  ;;  %v1407_v49 = vsub.f32 0.0, %v1399_v61  ;;  %v3605_v46 = vld [vmem:[#allocation7 + $0x108] ss:$12 sps:$4 sm:$0xff]  }
 0xc13   :  { %v1410_v4 = vsel %vm1402_vm10, %v1398_v60, %v1406_v39  ;;  %v1413_v6 = vadd.f32 1.0, %v1409_v59  ;;  %v1408_v7 = vsub.f32 0.0, %v1400_v5  ;;  %v3612_v60 = vld [vmem:[#allocation7 + $0x128] ss:$12 sps:$4 sm:$0xff]   ;;  %v3617_v39 = vld [vmem:[#allocation7 + $0x150] ss:$12 sps:$4 sm:$0xff]  }
 0xc14   :  { %v1411_v50 = vsel %vm1403_vm11, %v1399_v61, %v1407_v49  ;;  %v1414_v2 = vadd.f32 1.0, %v1410_v4  ;;  %v3615_v33 = vld [vmem:[#allocation7 + $0x13c] ss:$12 sps:$4 sm:$0xff]   ;;  %v3620_v59 = vld [vmem:[#allocation7 + $0x158] ss:$12 sps:$4 sm:$0xff]  }
 0xc15   :  { %v1415_v16 = vadd.f32 1.0, %v1411_v50  ;;  %v1412_v10 = vsel %vm1404_vm12, %v1400_v5, %v1408_v7  ;;  %v1417_v19 = vmul.f32 %v1413_v6, %v1313_v55  ;;  %v3623_v61 = vld [vmem:[#allocation7 + $0x16c] ss:$12 sps:$4 sm:$0xff]   ;;  %v3624_v4 = vld [vmem:[#allocation7 + $0x170] ss:$12 sps:$4 sm:$0xff]  }
 0xc16   :  { %v1416_v18 = vadd.f32 1.0, %v1412_v10  ;;  %v1418_v22 = vmul.f32 %v1414_v2, %v1314_v9 }
 0xc17   :  { %v1419_v13 = vmul.f32 %v1415_v16, %v1315_v8 }
 0xc18   :  { %v1420_v25 = vmul.f32 %v1416_v18, %v1316_v15  ;;  %v3048_v18 = vld [vmem:[#allocation20] ss:$0 sm:$0xff] }
 0xc19   :  { %v1454_v23 = vpack.c.bf16 %v1419_v13, %v1417_v19 }
 0xc1a   :  { %v1455_v11 = vpack.c.bf16 %v1420_v25, %v1418_v22 }
 0xc1c   :  { %1590 = vmatprep.mubr.bf16.mxu0 %v1455_v11  ;;  %v3049_v11 = vld [vmem:[#allocation22] ss:$0 sm:$0xff] }
 0xc1d   :  { %1591 = vmatmul.mubr.bf16.vlgmr.msra.gmra.mrb[12].mxu0 %v1454_v23 }
 0xc1e   :  { %3372 = vmatprep.mubr.msk.bf16.mxu0 %vm4142_vm2, %v4141_v62  ;;  %3357 = vmatpush3.bf16.msra.mxu0 %v3596_v38 }
 0xc1f   :  { %3358 = vmatprep.subr.bf16.mxu0 %v4141_v62 }
 0xc22   :  { %3359 = vmatpush3.bf16.msra.mxu0 %v3600_v40 }
 0xc23   :  { %3360 = vmatprep.subr.bf16.mxu0 %v4141_v62 }
 0xc26   :  { %3361 = vmatpush3.bf16.msra.mxu0 %v3604_v44 }
 0xc27   :  { %3362 = vmatprep.subr.bf16.mxu0 %v4141_v62 }
 0xc2a   :  { %3363 = vmatpush3.bf16.msra.mxu0 %v3608_v51 }
 0xc2b   :  { %3364 = vmatprep.subr.bf16.mxu0 %v4141_v62 }
 0xc2e   :  { %3365 = vmatpush3.bf16.msra.mxu0 %v3612_v60 }
 0xc2f   :  { %3366 = vmatprep.subr.bf16.mxu0 %v4141_v62 }
 0xc32   :  { %3367 = vmatpush3.bf16.msra.mxu0 %v3616_v1 }
 0xc33   :  { %3368 = vmatprep.subr.bf16.mxu0 %v4141_v62 }
 0xc36   :  { %3369 = vmatpush3.bf16.msra.mxu0 %v3620_v59 }
 0xc37   :  { %3370 = vmatprep.subr.bf16.mxu0 %v4141_v62 }
 0xc3a   :  { %3371 = vmatpush3.bf16.msra.mxu0 %v3624_v4 }
 0xc3b   :  { %3400 = vmatprep.subr.bf16.mxu0 %v4141_v62 }
 0xcf0   :  { %v3194_v17 = vpop.f32.mrb[12].mxu0 }
 0xcf1   :  { %v3195_v26 = vpop.f32.mrb[13].mxu0 }
 0xcf2   :  { %v3196_v28 = vadd.f32 %v3195_v26, %v3194_v17  ;;  %v3197_v14 = vpop.f32.mrb[14].mxu0 }
 0xcf3   :  { %v3198_v34 = vpop.f32.mrb[15].mxu0 }
 0xcf4   :  { %v1593_v29 = vadd.f32 %v3196_v28, %v3031_v27  ;;  %v3199_v30 = vadd.f32 %v3198_v34, %v3197_v14 }
 0xcf6   :  { %v1596_v31 = vadd.f32 %v3199_v30, %v3031_v27  ;;  %v4690_v21 = vadd.f32 %v1593_v29, %v4642_v47  ;;  %v3599_v47 = vld [vmem:[#allocation7 + $0xdc] ss:$12 sps:$4 sm:$0xff]  }
 0xcf7   :  { %1829 = vmatprep.subr.bf16.mxu1 %v3599_v47 }
 0xcf8   :  { %1603 = vadd.xlane.f32.xlu1 %v4690_v21  ;;  %v4694_v12 = vadd.f32 %v1596_v31, %v4644_v48  ;;  %v1609_v32 = vmul.f32 %v4690_v21, %v4690_v21  ;;  %v3597_v48 = vld [vmem:[#allocation7 + $0xd8] ss:$12 sps:$4 sm:$0xff]  }
 0xcf9   :  { %1830 = vmatpush1.bf16.msra.mxu1 %v3597_v48 }
 0xcfa   :  { %1605 = vadd.xlane.f32.xlu0 %v4694_v12  ;;  %v1610_v35 = vmul.f32 %v4694_v12, %v4694_v12  ;;  %1831 = vmatprep.subr.bf16.mxu1 %v3603_v41 }
 0xcfc   :  { %1611 = vadd.xlane.f32.xlu1 %v1609_v32 }
 0xcfd   :  { %1832 = vmatpush1.bf16.msra.mxu1 %v3601_v43 }
 0xcfe   :  { %1613 = vadd.xlane.f32.xlu0 %v1610_v35  ;;  %1833 = vmatprep.subr.bf16.mxu1 %v3607_v45  ;;  %v1681_v35 = vld [vmem:[#allocation8 + $0x3] sm:$0x7] }
 0xcff   :  { %v1691_v38 = vrot.slane %v1681_v35, %v4559_v56 }
 0xd01   :  { %1834 = vmatpush1.bf16.msra.mxu1 %v3605_v46 }
 0xd02   :  { %1835 = vmatprep.subr.bf16.mxu1 %v3611_v57 }
 0xd05   :  { %1836 = vmatpush1.bf16.msra.mxu1 %v3609_v58 }
 0xd06   :  { %1837 = vmatprep.subr.bf16.mxu1 %v3615_v33 }
 0xd09   :  { %1838 = vmatpush1.bf16.msra.mxu1 %v3613_v63 }
 0xd0a   :  { %1839 = vmatprep.subr.bf16.mxu1 %v3619_v3 }
 0xd0d   :  { %1840 = vmatpush1.bf16.msra.mxu1 %v3617_v39 }
 0xd0e   :  { %1841 = vmatprep.subr.bf16.mxu1 %v3623_v61 }
 0xd11   :  { %1842 = vmatpush1.bf16.msra.mxu1 %v3621_v42 }
 0xd12   :  { %3376 = vmatprep.subr.bf16.mxu1 %v4141_v62 }
 0xd85   :  { %v1604_v49 = vpop.xlane.xlu1 %1603 }
 0xd86   :  { %v1607_v5 = vmul.f32 0.0078125, %v1604_v49 }
 0xd87   :  { %v1606_v6 = vpop.xlane.xlu0 %1605 }
 0xd88   :  { %v1608_v55 = vmul.f32 0.0078125, %v1606_v6  ;;  %v1617_v7 = vmul.f32 %v1607_v5, %v1607_v5 }
 0xd89   :  { %v1612_v50 = vpop.xlane.xlu1 %1611 }
 0xd8a   :  { %v1615_v2 = vmul.f32 0.0078125, %v1612_v50  ;;  %v1618_v16 = vmul.f32 %v1608_v55, %v1608_v55 }
 0xd8b   :  { %v1614_v8 = vpop.xlane.xlu0 %1613 }
 0xd8c   :  { %v1619_v9 = vsub.f32 %v1615_v2, %v1617_v7  ;;  %v1616_v10 = vmul.f32 0.0078125, %v1614_v8 }
 0xd8e   :  { %v1621_v19 = vadd.f32 1e-12, %v1619_v9  ;;  %v1620_v13 = vsub.f32 %v1616_v10, %v1618_v16 }
 0xd90   :  { %3721 = vrsqrt.f32 %v1621_v19  ;;  %v1622_v15 = vadd.f32 1e-12, %v1620_v13 }
 0xd92   :  { %3723 = vrsqrt.f32 %v1622_v15 }
 0xd9a   :  { %v3722_v22 = vpop.eup %3721 }
 0xd9b   :  { %v1631_v23 = vmul.f32 %v3722_v22, %v3048_v18 }
 0xd9c   :  { %v3724_v25 = vpop.eup %3723 }
 0xd9d   :  { %v1632_v17 = vmul.f32 %v3724_v25, %v3048_v18  ;;  %v1635_v27 = vmul.f32 %v1631_v23, %v1607_v5  ;;  %v1633_v14 = vmul.f32 %v1631_v23, %v4690_v21  ;;  %v1687_v21 = vrot.slane %v1681_v35, %v4555_v53 }
 0xd9f   :  { %v1636_v26 = vmul.f32 %v1632_v17, %v1608_v55  ;;  %v1643_v28 = vsub.f32 %v3049_v11, %v1635_v27  ;;  %v1634_v34 = vmul.f32 %v1632_v17, %v4694_v12  ;;  %v1695_v12 = vrot.slane %v1681_v35, %v522_v54 }
 0xda1   :  { %v1644_v29 = vsub.f32 %v3049_v11, %v1636_v26  ;;  %v4712_v30 = vadd.f32 %v1643_v28, %v1633_v14 }
 0xda3   :  { %v4714_v31 = vadd.f32 %v1644_v29, %v1634_v34 }
 0xda5   :  { %v1682_v32 = vpack.c.bf16 %v4714_v31, %v4712_v30 }
 0xda7   :  { %1860 = vmatmul.mubr.bf16.vlgmr.msra.gmra.mrb[24].mxu1 %v1682_v32  ;;  %3373 = vmatmul.mubr.bf16.vlgmr.msra.gmra.mrb[16].mxu0 %v1682_v32 }
 0xda8   :  { %3378 = vmatprep.mubr.msk.bf16.mxu1 %vm4142_vm2, %v4141_v62  ;;  %3416 = vmatprep.mubr.msk.bf16.mxu0 %vm4142_vm2, %v4141_v62 }
 0xe7a   :  { %v1861_v36 = vpop.f32.mrb[24].mxu1  ;;  %v1904_v37 = vpop.f32.mrb[16].mxu0 }
 0xe7b   :  { %v1863_v47 = vpop.f32.mrb[25].mxu1  ;;  %v3374_v48 = vpop.f32.mrb[17].mxu0  ;;  %v1862_v43 = vadd.f32 %v1861_v36, %v1687_v21  ;;  %v1905_v44 = vadd.f32 %v1904_v37, %v1695_v12 }
 0xe7c   :  { %v1865_v40 = vpop.f32.mrb[26].mxu1  ;;  %v1907_v41 = vpop.f32.mrb[18].mxu0  ;;  %v1864_v58 = vadd.f32 %v1863_v47, %v1691_v38 }
 0xe7d   :  { %v1866_v45 = vadd.f32 %v1865_v40, %v1687_v21  ;;  %v1908_v46 = vadd.f32 %v1907_v41, %v1695_v12  ;;  %v1867_v51 = vpop.f32.mrb[27].mxu1  ;;  %v3375_v57 = vpop.f32.mrb[19].mxu0 }
 0xe7e   :  { %v1868_v60 = vadd.f32 %v1867_v51, %v1691_v38 }
 0xe7f   :  { %v1911_v33 = vpack.c.bf16 %v1866_v45, %v1862_v43  ;;  %v4726_v63 = vpack.c.bf16 %v1908_v46, %v1905_v44 }
 0xe80   :  { %v1912_v52 = vpack.c.bf16 %v1868_v60, %v1864_v58 }
 0xe82   :  { %v1918_v54 = vsel %vm742_vm3, %v1912_v52, 0 }
 0xe83   :  { %3377 = vmatpush3.bf16.xpose.msra.mxu1 %v1918_v54 }
 0xe84   :  { %3382 = vmatprep.subr.bf16.mxu1 %v4141_v62 }
 0xe8a   :  { %3379 = vmatmul.mubr.msk.bf16.vlgmr.msra.gmra.mrb[28].mxu1 %vm742_vm3, %v1911_v33 }
 0xe8b   :  { %3383 = vmatpush3.bf16.msra.mxu1 %v4726_v63  ;;  %3384 = vmatprep.mubr.msk.bf16.mxu1 %vm4142_vm2, %v4141_v62 }
 0xe8c   :  { %3388 = vmatprep.subr.bf16.mxu1 %v4141_v62 }
 0xf5d   :  { %v1954_v1 = vpop.f32.mrb[28].mxu1 }
 0xf5e   :  { %v1961_v3 = vmul.f32 0.125, %v1954_v1  ;;  %v3380_v39 = vpop.f32.mrb[29].mxu1 }
 0xf5f   :  { %v1957_v59 = vpop.f32.mrb[30].mxu1 }
 0xf60   :  { %v1962_v61 = vmul.f32 0.125, %v1957_v59  ;;  %v3381_v42 = vpop.f32.mrb[31].mxu1  ;;  %v1963_v4 = vadd.f32 %v1961_v3, %v4581_v20 }
 0xf61   :  { %v3625_v42 = vld [vmem:[#allocation10 + $0x40] sm:$0xff]  }
 0xf62   :  { %v1965_v49 = vsel %vm794_vm8, %v1963_v4, -inf  ;;  %v1964_v5 = vadd.f32 %v1962_v61, %v4584_v24  ;;  %3401 = vmatpush3.bf16.msra.mxu0 %v3625_v42 }
 0xf63   :  { %1966 = vmax.xlane.f32.xlu1 %v1965_v49  ;;  %3402 = vmatprep.subr.bf16.mxu0 %v4141_v62  ;;  %v3628_v49 = vld [vmem:[#allocation10 + $0x58] sm:$0xff]  }
 0xf64   :  { %v1968_v6 = vsel %vm794_vm8, %v1964_v5, -inf }
 0xf65   :  { %1969 = vmax.xlane.f32.xlu0 %v1968_v6  ;;  %v3630_v6 = vld [vmem:[#allocation10 + $0x68] sm:$0xff]  }
 0xff0   :  { %v1967_v55 = vpop.xlane.xlu1 %1966 }
 0xff1   :  { %v1971_v50 = vsub.f32 %v1963_v4, %v1967_v55  ;;  %v3626_v4 = vld [vmem:[#allocation10 + $0x48] sm:$0xff]   ;;  %v3632_v55 = vld [vmem:[#allocation10 + $0x78] sm:$0xff]  }
 0xff2   :  { %v1970_v7 = vpop.xlane.xlu0 %1969  ;;  %3403 = vmatpush3.bf16.msra.mxu0 %v3626_v4 }
 0xff3   :  { %v1973_v2 = vmul.f32 1.442695, %v1971_v50  ;;  %v1972_v8 = vsub.f32 %v1964_v5, %v1970_v7  ;;  %3404 = vmatprep.subr.bf16.mxu0 %v4141_v62  ;;  %v3629_v5 = vld [vmem:[#allocation10 + $0x60] sm:$0xff]  }
 0xff5   :  { %3725 = vpow2.f32 %v1973_v2  ;;  %v1975_v16 = vmul.f32 1.442695, %v1972_v8 }
 0xff7   :  { %3727 = vpow2.f32 %v1975_v16 }
 0xfff   :  { %v3726_v9 = vpop.eup %3725 }
0x1000   :  { %v1977_v10 = vsel %vm794_vm8, %v3726_v9, 0.0 }
0x1001   :  { %v3728_v19 = vpop.eup %3727  ;;  %1978 = vadd.xlane.f32.xlu1 %v1977_v10 }
0x1002   :  { %v1980_v13 = vsel %vm794_vm8, %v3728_v19, 0.0 }
0x1003   :  { %1981 = vadd.xlane.f32.xlu0 %v1980_v13 }
0x1012   :  { %2036 = vrot.lane.b32.xlu1 %v1912_v52, %s4125_s6 }
0x1019   :  { %2033 = vrot.lane.b32.xlu0 %v1911_v33, %s4125_s6 }
0x108e   :  { %v1979_v15 = vpop.xlane.xlu1 %1978 }
0x108f   :  { %3729 = vrcp.f32 %v1979_v15 }
0x1090   :  { %v1982_v18 = vpop.xlane.xlu0 %1981 }
0x1091   :  { %3731 = vrcp.f32 %v1982_v18 }
0x1092   :  { %v2037_v17 = vpop.permute.xlu1 %2036 }
0x1093   :  { %v2042_v26 = vsel %vm742_vm3, %v2037_v17, 0 }
0x1094   :  { %v2034_v28 = vpop.permute.xlu0 %2033 }
0x1099   :  { %v3730_v22 = vpop.eup %3729 }
0x109a   :  { %v1985_v25 = vmul.f32 %v3730_v22, %v3726_v9  ;;  %v3078_v22 = vld [vmem:[#allocation11 + $0x1] ss:$0 sm:$0xff] }
0x109b   :  { %v3732_v23 = vpop.eup %3731 }
0x109c   :  { %v1986_v11 = vmul.f32 %v3732_v23, %v3728_v19 }
0x109e   :  { %v1987_v27 = vpack.c.bf16 %v1986_v11, %v1985_v25 }
0x10a0   :  { %3385 = vmatmul.mubr.msk.bf16.vlgmr.msra.gmra.mrb[32].mxu1 %vm794_vm8, %v1987_v27 }
0x10a1   :  { %3389 = vmatpush3.bf16.xpose.msra.mxu1 %v2042_v26  ;;  %3390 = vmatprep.mubr.msk.bf16.mxu1 %vm4142_vm2, %v4141_v62 }
0x10a2   :  { %3394 = vmatprep.subr.bf16.mxu1 %v4141_v62 }
0x10a8   :  { %3391 = vmatmul.mubr.msk.bf16.vlgmr.msra.gmra.mrb[36].mxu1 %vm742_vm3, %v2034_v28 }
0x10a9   :  { %3396 = vmatprep.mubr.msk.bf16.mxu1 %vm4142_vm2, %v4141_v62 }
0x1173   :  { %v4751_v14 = vpop.f32.mrb[32].mxu1 }
0x1174   :  { %v3386_v34 = vpop.f32.mrb[33].mxu1 }
0x1175   :  { %v4753_v29 = vpop.f32.mrb[34].mxu1 }
0x1176   :  { %v3387_v32 = vpop.f32.mrb[35].mxu1 }
0x1177   :  { %v3635_v32 = vld [vmem:[#allocation16 + $0x84] ss:$8 sps:$4 sm:$0xff]  }
0x117b   :  { %v2078_v35 = vpop.f32.mrb[36].mxu1 }
0x117c   :  { %v2085_v21 = vmul.f32 0.125, %v2078_v35  ;;  %v3392_v12 = vpop.f32.mrb[37].mxu1  ;;  %v3638_v35 = vld [vmem:[#allocation16 + $0x94] ss:$8 sps:$4 sm:$0xff]  }
0x117d   :  { %v2081_v36 = vpop.f32.mrb[38].mxu1  ;;  %v3639_v12 = vld [vmem:[#allocation16 + $0xa0] ss:$8 sps:$4 sm:$0xff]  }
0x117e   :  { %v2086_v37 = vmul.f32 0.125, %v2081_v36  ;;  %v3393_v38 = vpop.f32.mrb[39].mxu1  ;;  %v2087_v47 = vadd.f32 %v2085_v21, %v4581_v20  ;;  %v3636_v21 = vld [vmem:[#allocation16 + $0x90] ss:$8 sps:$4 sm:$0xff]  }
0x117f   :  { %v3642_v36 = vld [vmem:[#allocation16 + $0xb0] ss:$8 sps:$4 sm:$0xff]   ;;  %v3647_v38 = vld [vmem:[#allocation16 + $0xc4] ss:$8 sps:$4 sm:$0xff]  }
0x1180   :  { %v2089_v48 = vsel %vm794_vm8, %v2087_v47, -inf  ;;  %v2088_v40 = vadd.f32 %v2086_v37, %v4584_v24  ;;  %v3644_v37 = vld [vmem:[#allocation16 + $0xb4] ss:$8 sps:$4 sm:$0xff]  }
0x1181   :  { %2090 = vmax.xlane.f32.xlu1 %v2089_v48  ;;  %v3650_v48 = vld [vmem:[#allocation16 + $0xd4] ss:$8 sps:$4 sm:$0xff]  }
0x1182   :  { %v2092_v41 = vsel %vm794_vm8, %v2088_v40, -inf }
0x1183   :  { %2093 = vmax.xlane.f32.xlu0 %v2092_v41  ;;  %v3653_v41 = vld [vmem:[#allocation16 + $0xe4] ss:$8 sps:$4 sm:$0xff]  }
0x120e   :  { %v2091_v43 = vpop.xlane.xlu1 %2090 }
0x120f   :  { %v2095_v44 = vsub.f32 %v2087_v47, %v2091_v43  ;;  %v3645_v47 = vld [vmem:[#allocation16 + $0xc0] ss:$8 sps:$4 sm:$0xff]  }
0x1210   :  { %v2094_v45 = vpop.xlane.xlu0 %2093  ;;  %v3651_v43 = vld [vmem:[#allocation16 + $0xe0] ss:$8 sps:$4 sm:$0xff]  }
0x1211   :  { %v2097_v46 = vmul.f32 1.442695, %v2095_v44  ;;  %v2096_v51 = vsub.f32 %v2088_v40, %v2094_v45  ;;  %v3648_v40 = vld [vmem:[#allocation16 + $0xd0] ss:$8 sps:$4 sm:$0xff]   ;;  %v3656_v44 = vld [vmem:[#allocation16 + $0xf4] ss:$8 sps:$4 sm:$0xff]  }
0x1212   :  { %v3654_v45 = vld [vmem:[#allocation16 + $0xf0] ss:$8 sps:$4 sm:$0xff]  }
0x1213   :  { %3733 = vpow2.f32 %v2097_v46  ;;  %v2099_v57 = vmul.f32 1.442695, %v2096_v51 }
0x1215   :  { %3735 = vpow2.f32 %v2099_v57 }
0x121d   :  { %v3734_v58 = vpop.eup %3733 }
0x121e   :  { %v2101_v60 = vsel %vm794_vm8, %v3734_v58, 0.0 }
0x121f   :  { %v3736_v20 = vpop.eup %3735  ;;  %2102 = vadd.xlane.f32.xlu1 %v2101_v60 }
0x1220   :  { %v2104_v33 = vsel %vm794_vm8, %v3736_v20, 0.0 }
0x1221   :  { %2105 = vadd.xlane.f32.xlu0 %v2104_v33 }
0x1230   :  { %2113 = vrot.lane.b32.xlu1 %v4726_v63, %s4125_s6  ;;  %v3627_v63 = vld [vmem:[#allocation10 + $0x50] sm:$0xff]  }
0x1231   :  { %3405 = vmatpush3.bf16.msra.mxu0 %v3627_v63 }
0x1232   :  { %3406 = vmatprep.subr.bf16.mxu0 %v4141_v62 }
0x1235   :  { %3407 = vmatpush3.bf16.msra.mxu0 %v3628_v49  ;;  %v3088_v49 = vld [vmem:[#allocation14 + $0x1] ss:$0 sm:$0xff] }
0x1236   :  { %3408 = vmatprep.subr.bf16.mxu0 %v4141_v62 }
0x1239   :  { %3409 = vmatpush3.bf16.msra.mxu0 %v3629_v5 }
0x123a   :  { %3410 = vmatprep.subr.bf16.mxu0 %v4141_v62 }
0x123d   :  { %3411 = vmatpush3.bf16.msra.mxu0 %v3630_v6 }
0x123e   :  { %3412 = vmatprep.subr.bf16.mxu0 %v4141_v62 }
0x12ac   :  { %v2103_v24 = vpop.xlane.xlu1 %2102 }
0x12ad   :  { %3737 = vrcp.f32 %v2103_v24 }
0x12ae   :  { %v2106_v52 = vpop.xlane.xlu0 %2105 }
0x12af   :  { %3739 = vrcp.f32 %v2106_v52 }
0x12b0   :  { %v2114_v54 = vpop.permute.xlu1 %2113 }
0x12b1   :  { %3395 = vmatpush3.bf16.msra.mxu1 %v2114_v54 }
0x12b2   :  { %2446 = vmatprep.subr.bf16.mxu1 %v3635_v32  ;;  %v3089_v32 = vld [vmem:[%s4897_s15 + $0x2] sm:$0x3] }
0x12b7   :  { %v3738_v1 = vpop.eup %3737 }
0x12b8   :  { %v2109_v39 = vmul.f32 %v3738_v1, %v3734_v58 }
0x12b9   :  { %v3740_v3 = vpop.eup %3739 }
0x12ba   :  { %v2110_v59 = vmul.f32 %v3740_v3, %v3736_v20 }
0x12bc   :  { %v2111_v61 = vpack.c.bf16 %v2110_v59, %v2109_v39 }
0x12be   :  { %3397 = vmatmul.mubr.msk.bf16.vlgmr.msra.gmra.mrb[40].mxu1 %vm794_vm8, %v2111_v61  ;;  %v3087_v61 = vld [vmem:[#allocation13 + $0x1] ss:$0 sm:$0xff] }
0x12bf   :  { %2478 = vmatprep.mubr.bf16.mxu1 %v4139_v0  ;;  %v3631_v0 = vld [vmem:[#allocation10 + $0x70] sm:$0xff]  }
0x12c0   :  { %3413 = vmatpush3.bf16.msra.mxu0 %v3631_v0 }
0x12c1   :  { %3414 = vmatprep.subr.bf16.mxu0 %v4141_v62 }
0x12c4   :  { %3415 = vmatpush3.bf16.msra.mxu0 %v3632_v55 }
0x1391   :  { %v2153_v50 = vpop.f32.mrb[40].mxu1 }
0x1392   :  { %v3398_v7 = vpop.f32.mrb[41].mxu1 }
0x1393   :  { %v2156_v2 = vpop.f32.mrb[42].mxu1 }
0x1394   :  { %v3508_v8 = vpack.i.bf16 %v2156_v2, %v2153_v50  ;;  %v3399_v16 = vpop.f32.mrb[43].mxu1 }
0x1396   :  { %3509 = vrot.lane.b32.xlu0 %v3508_v8, %s4125_s6 }
0x1408   :  { %v3510_v9 = vpop.permute.xlu0 %3509 }
0x1409   :  { %v3512_v10 = vunpack.i.h.bf16 %v3510_v9  ;;  %v3511_v19 = vunpack.i.l.bf16 %v3510_v9 }
0x140b   :  { %v2169_v13 = vsel %vm742_vm3, %v4753_v29, %v3512_v10  ;;  %v2168_v15 = vsel %vm742_vm3, %v4751_v14, %v3511_v19  ;;  %v3657_v10 = vld [vmem:[#allocation17 + $0xc0] sm:$0xff]  }
0x140c   :  { %v2189_v18 = vpack.c.bf16 %v2169_v13, %v2168_v15  ;;  %v3658_v19 = vld [vmem:[#allocation17 + $0x80] sm:$0xff]   ;;  %3226 = vmatprep.subr.bf16.mxu0 %v3657_v10  ;;  %v3659_v13 = vld [vmem:[#allocation17 + $0xc8] sm:$0xff]  }
0x140d   :  { %v3660_v15 = vld [vmem:[#allocation17 + $0x88] sm:$0xff]  }
0x140e   :  { %3417 = vmatmul.mubr.bf16.vlgmr.msra.gmra.mrb[20].mxu0 %v2189_v18  ;;  %v3661_v18 = vld [vmem:[#allocation17 + $0xd0] sm:$0xff]  }
0x140f   :  { %3227 = vmatpush3.bf16.msra.mxu0 %v3658_v19 }
0x1410   :  { %3228 = vmatprep.subr.bf16.mxu0 %v3659_v13 }
0x1413   :  { %3229 = vmatpush3.bf16.msra.mxu0 %v3660_v15 }
0x1414   :  { %3230 = vmatprep.subr.bf16.mxu0 %v3661_v18 }
0x14e1   :  { %v2278_v23 = vpop.f32.mrb[20].mxu0 }
0x14e2   :  { %v2279_v25 = vadd.f32 %v3078_v22, %v2278_v23  ;;  %v3418_v11 = vpop.f32.mrb[21].mxu0  ;;  %v3663_v23 = vld [vmem:[#allocation17 + $0xd8] sm:$0xff]  }
0x14e3   :  { %v2281_v17 = vpop.f32.mrb[22].mxu0  ;;  %v3665_v11 = vld [vmem:[#allocation17 + $0xe0] sm:$0xff]  }
0x14e4   :  { %v4778_v27 = vadd.f32 %v2279_v25, %v4712_v30  ;;  %v2282_v26 = vadd.f32 %v3078_v22, %v2281_v17  ;;  %v3419_v28 = vpop.f32.mrb[23].mxu0  ;;  %v3633_v30 = vld [vmem:[#allocation16 + $0x80] ss:$8 sps:$4 sm:$0xff]   ;;  %v3662_v22 = vld [vmem:[#allocation17 + $0x90] sm:$0xff]   ;;  %v3664_v25 = vld [vmem:[#allocation17 + $0x98] sm:$0xff]  }
0x14e5   :  { %2447 = vmatpush1.bf16.msra.mxu1 %v3633_v30  ;;  %3231 = vmatpush3.bf16.msra.mxu0 %v3662_v22  ;;  %v3666_v17 = vld [vmem:[#allocation17 + $0xa0] sm:$0xff]   ;;  %v3669_v28 = vld [vmem:[#allocation17 + $0xf0] sm:$0xff]   ;;  %v2359_v30 = vrot.slane %v3089_v32, %v4555_v53 }
0x14e6   :  { %v4781_v34 = vadd.f32 %v2282_v26, %v4714_v31  ;;  %2291 = vadd.xlane.f32.xlu1 %v4778_v27  ;;  %v2297_v14 = vmul.f32 %v4778_v27, %v4778_v27  ;;  %2448 = vmatprep.subr.bf16.mxu1 %v3638_v35  ;;  %v3641_v31 = vld [vmem:[#allocation16 + $0xa4] ss:$8 sps:$4 sm:$0xff]   ;;  %v2363_v35 = vrot.slane %v3089_v32, %v4559_v56 }
0x14e7   :  { %3232 = vmatprep.subr.bf16.mxu0 %v3663_v23  ;;  %v3668_v26 = vld [vmem:[#allocation17 + $0xa8] sm:$0xff]  }
0x14e8   :  { %2293 = vadd.xlane.f32.xlu0 %v4781_v34  ;;  %v2298_v29 = vmul.f32 %v4781_v34, %v4781_v34 }
0x14e9   :  { %2449 = vmatpush1.bf16.msra.mxu1 %v3636_v21  ;;  %3233 = vmatpush3.bf16.msra.mxu0 %v3664_v25 }
0x14ea   :  { %2299 = vadd.xlane.f32.xlu1 %v2297_v14  ;;  %2450 = vmatprep.subr.bf16.mxu1 %v3641_v31  ;;  %v3671_v14 = vld [vmem:[#allocation17 + $0xf8] sm:$0xff]  }
0x14eb   :  { %3234 = vmatprep.subr.bf16.mxu0 %v3665_v11 }
0x14ec   :  { %2301 = vadd.xlane.f32.xlu0 %v2298_v29  ;;  %v3672_v29 = vld [vmem:[#allocation17 + $0xb8] sm:$0xff]  }
0x14ed   :  { %2451 = vmatpush1.bf16.msra.mxu1 %v3639_v12  ;;  %3235 = vmatpush3.bf16.msra.mxu0 %v3666_v17 }
0x14ee   :  { %2452 = vmatprep.subr.bf16.mxu1 %v3644_v37 }
0x14f1   :  { %2453 = vmatpush1.bf16.msra.mxu1 %v3642_v36 }
0x14f2   :  { %2454 = vmatprep.subr.bf16.mxu1 %v3647_v38 }
0x14f5   :  { %2455 = vmatpush1.bf16.msra.mxu1 %v3645_v47 }
0x14f6   :  { %2456 = vmatprep.subr.bf16.mxu1 %v3650_v48 }
0x14f9   :  { %2457 = vmatpush1.bf16.msra.mxu1 %v3648_v40 }
0x14fa   :  { %2458 = vmatprep.subr.bf16.mxu1 %v3653_v41 }
0x14fd   :  { %2459 = vmatpush1.bf16.msra.mxu1 %v3651_v43 }
0x14fe   :  { %2460 = vmatprep.subr.bf16.mxu1 %v3656_v44 }
0x1501   :  { %2461 = vmatpush1.bf16.msra.mxu1 %v3654_v45 }
0x1502   :  { %3420 = vmatprep.subr.bf16.mxu1 %v4141_v62 }
0x1573   :  { %v2292_v46 = vpop.xlane.xlu1 %2291 }
0x1574   :  { %v2295_v51 = vmul.f32 0.0078125, %v2292_v46 }
0x1575   :  { %v2294_v57 = vpop.xlane.xlu0 %2293 }
0x1576   :  { %v2296_v58 = vmul.f32 0.0078125, %v2294_v57  ;;  %v2305_v20 = vmul.f32 %v2295_v51, %v2295_v51 }
0x1577   :  { %v2300_v60 = vpop.xlane.xlu1 %2299 }
0x1578   :  { %v2303_v33 = vmul.f32 0.0078125, %v2300_v60  ;;  %v2306_v52 = vmul.f32 %v2296_v58, %v2296_v58 }
0x1579   :  { %v2302_v24 = vpop.xlane.xlu0 %2301 }
0x157a   :  { %v2307_v54 = vsub.f32 %v2303_v33, %v2305_v20  ;;  %v2304_v1 = vmul.f32 0.0078125, %v2302_v24 }
0x157c   :  { %v2309_v3 = vadd.f32 1e-12, %v2307_v54  ;;  %v2308_v39 = vsub.f32 %v2304_v1, %v2306_v52 }
0x157e   :  { %3741 = vrsqrt.f32 %v2309_v3  ;;  %v2310_v59 = vadd.f32 1e-12, %v2308_v39 }
0x1580   :  { %3743 = vrsqrt.f32 %v2310_v59 }
0x1588   :  { %v3742_v42 = vpop.eup %3741 }
0x1589   :  { %v2319_v4 = vmul.f32 %v3742_v42, %v3087_v61 }
0x158a   :  { %v3744_v63 = vpop.eup %3743 }
0x158b   :  { %v2320_v5 = vmul.f32 %v3744_v63, %v3087_v61  ;;  %v2323_v6 = vmul.f32 %v2319_v4, %v2295_v51  ;;  %v2321_v50 = vmul.f32 %v2319_v4, %v4778_v27  ;;  %v3667_v27 = vld [vmem:[#allocation17 + $0xe8] sm:$0xff]  }
0x158c   :  { %3236 = vmatprep.subr.bf16.mxu0 %v3667_v27 }
0x158d   :  { %v2324_v0 = vmul.f32 %v2320_v5, %v2296_v58  ;;  %v2331_v55 = vsub.f32 %v3088_v49, %v2323_v6  ;;  %v2322_v7 = vmul.f32 %v2320_v5, %v4781_v34  ;;  %3237 = vmatpush3.bf16.msra.mxu0 %v3668_v26  ;;  %v3670_v34 = vld [vmem:[#allocation17 + $0xb0] sm:$0xff]  }
0x158e   :  { %3238 = vmatprep.subr.bf16.mxu0 %v3669_v28 }
0x158f   :  { %v2332_v2 = vsub.f32 %v3088_v49, %v2324_v0  ;;  %v4792_v8 = vadd.f32 %v2331_v55, %v2321_v50 }
0x1591   :  { %v4794_v16 = vadd.f32 %v2332_v2, %v2322_v7  ;;  %3239 = vmatpush3.bf16.msra.mxu0 %v3670_v34 }
0x1592   :  { %3240 = vmatprep.subr.bf16.mxu0 %v3671_v14 }
0x1593   :  { %v2354_v9 = vpack.c.bf16 %v4794_v16, %v4792_v8 }
0x1595   :  { %2479 = vmatmul.mubr.bf16.vlgmr.msra.gmra.mrb[44].mxu1 %v2354_v9  ;;  %3241 = vmatpush3.bf16.msra.mxu0 %v3672_v29 }
0x1596   :  { %3436 = vmatprep.mubr.msk.bf16.mxu1 %vm4142_vm2, %v4141_v62 }
0x1668   :  { %v2480_v21 = vpop.f32.mrb[44].mxu1 }
0x1669   :  { %v4805_v31 = vadd.f32 %v2480_v21, %v2359_v30  ;;  %v2482_v12 = vpop.f32.mrb[45].mxu1 }
0x166a   :  { %v4807_v36 = vadd.f32 %v2482_v12, %v2363_v35  ;;  %v2484_v37 = vpop.f32.mrb[46].mxu1 }
0x166b   :  { %v4810_v38 = vmul.f32 0.70710677, %v4805_v31  ;;  %v4812_v47 = vadd.f32 %v2484_v37, %v2359_v30  ;;  %v2486_v48 = vpop.f32.mrb[47].mxu1 }
0x166c   :  { %v4815_v40 = vmul.f32 0.70710677, %v4807_v36  ;;  %v4817_v41 = vadd.f32 %v2486_v48, %v2363_v35 }
0x166d   :  { %v2497_v53 = vand.u32 2147483647, %v4810_v38  ;;  %v4821_v56 = vmul.f32 0.70710677, %v4812_v47  ;;  %vm2577_vm13 = vcmp.ge.f32.partialorder %v4810_v38, 0.0 }
0x166e   :  { %v2498_v43 = vand.u32 2147483647, %v4815_v40  ;;  %v4825_v44 = vmul.f32 0.70710677, %v4817_v41  ;;  %vm2578_vm14 = vcmp.ge.f32.partialorder %v4815_v40, 0.0 }
0x166f   :  { %v2501_v45 = vmul.f32 0.3275911, %v2497_v53  ;;  %v2499_v46 = vand.u32 2147483647, %v4821_v56  ;;  %v2553_v54 = vsub.f32 0.0, %v2497_v53  ;;  %vm2579_vm15 = vcmp.ge.f32.partialorder %v4821_v56, 0.0 }
0x1670   :  { %v2502_v51 = vmul.f32 0.3275911, %v2498_v43  ;;  %v2500_v57 = vand.u32 2147483647, %v4825_v44  ;;  %v2554_v1 = vsub.f32 0.0, %v2498_v43  ;;  %vm2580_vm0 = vcmp.ge.f32.partialorder %v4825_v44, 0.0 }
0x1671   :  { %v2505_v58 = vadd.f32 1.0, %v2501_v45  ;;  %v2503_v60 = vmul.f32 0.3275911, %v2499_v46  ;;  %v2557_v39 = vmul.f32 %v2553_v54, %v2497_v53  ;;  %v2555_v59 = vsub.f32 0.0, %v2499_v46 }
0x1672   :  { %v2506_v20 = vadd.f32 1.0, %v2502_v51  ;;  %v2504_v33 = vmul.f32 0.3275911, %v2500_v57  ;;  %v2558_v4 = vmul.f32 %v2554_v1, %v2498_v43  ;;  %v2556_v49 = vsub.f32 0.0, %v2500_v57 }
0x1673   :  { %3745 = vrcp.f32 %v2505_v58  ;;  %v2507_v24 = vadd.f32 1.0, %v2503_v60  ;;  %v2561_v0 = vmul.f32 1.442695, %v2557_v39  ;;  %v2559_v50 = vmul.f32 %v2555_v59, %v2499_v46 }
0x1674   :  { %3747 = vrcp.f32 %v2506_v20  ;;  %v2508_v52 = vadd.f32 1.0, %v2504_v33  ;;  %v2563_v2 = vmul.f32 1.442695, %v2558_v4  ;;  %v2560_v13 = vmul.f32 %v2556_v49, %v2500_v57 }
0x1675   :  { %3749 = vrcp.f32 %v2507_v24  ;;  %v2565_v25 = vmul.f32 1.442695, %v2559_v50 }
0x1676   :  { %3751 = vrcp.f32 %v2508_v52  ;;  %v2567_v28 = vmul.f32 1.442695, %v2560_v13 }
0x1677   :  { %3753 = vpow2.f32 %v2561_v0 }
0x1678   :  { %3755 = vpow2.f32 %v2563_v2 }
0x1679   :  { %3757 = vpow2.f32 %v2565_v25  ;;  %v2492_v25 = vmul.f32 0.5, %v4817_v41 }
0x167a   :  { %3759 = vpow2.f32 %v2567_v28  ;;  %v3106_v28 = vld [vmem:[#allocation19 + $0x1] ss:$0 sm:$0xff] }
0x167d   :  { %v3746_v3 = vpop.eup %3745 }
0x167e   :  { %v3748_v61 = vpop.eup %3747  ;;  %v2517_v42 = vmul.f32 1.0614054, %v3746_v3 }
0x167f   :  { %v2518_v63 = vmul.f32 1.0614054, %v3748_v61  ;;  %v3750_v6 = vpop.eup %3749 }
0x1680   :  { %v2521_v5 = vadd.f32 -1.4531521, %v2517_v42  ;;  %v2519_v9 = vmul.f32 1.0614054, %v3750_v6  ;;  %v3752_v10 = vpop.eup %3751 }
0x1681   :  { %v2522_v55 = vadd.f32 -1.4531521, %v2518_v63  ;;  %v2520_v22 = vmul.f32 1.0614054, %v3752_v10  ;;  %v3754_v57 = vpop.eup %3753 }
0x1682   :  { %v2525_v7 = vmul.f32 %v3746_v3, %v2521_v5  ;;  %v2523_v18 = vadd.f32 -1.4531521, %v2519_v9  ;;  %v3756_v60 = vpop.eup %3755 }
0x1683   :  { %v2526_v19 = vmul.f32 %v3748_v61, %v2522_v55  ;;  %v2524_v27 = vadd.f32 -1.4531521, %v2520_v22  ;;  %v3758_v59 = vpop.eup %3757 }
0x1684   :  { %v2529_v15 = vadd.f32 1.4214138, %v2525_v7  ;;  %v2527_v17 = vmul.f32 %v3750_v6, %v2523_v18  ;;  %v3760_v5 = vpop.eup %3759  ;;  %v2490_v18 = vmul.f32 0.5, %v4807_v36 }
0x1685   :  { %v2530_v23 = vadd.f32 1.4214138, %v2526_v19  ;;  %v2528_v29 = vmul.f32 %v3752_v10, %v2524_v27 }
0x1686   :  { %v2533_v11 = vmul.f32 %v3746_v3, %v2529_v15  ;;  %v2531_v14 = vadd.f32 1.4214138, %v2527_v17  ;;  %v2491_v15 = vmul.f32 0.5, %v4812_v47 }
0x1687   :  { %v2534_v26 = vmul.f32 %v3748_v61, %v2530_v23  ;;  %v2532_v21 = vadd.f32 1.4214138, %v2528_v29 }
0x1688   :  { %v2537_v34 = vadd.f32 -0.28449672, %v2533_v11  ;;  %v2535_v35 = vmul.f32 %v3750_v6, %v2531_v14 }
0x1689   :  { %v2538_v32 = vadd.f32 -0.28449672, %v2534_v26  ;;  %v2536_v53 = vmul.f32 %v3752_v10, %v2532_v21 }
0x168a   :  { %v2541_v30 = vmul.f32 %v3746_v3, %v2537_v34  ;;  %v2539_v48 = vadd.f32 -0.28449672, %v2535_v35 }
0x168b   :  { %v2542_v12 = vmul.f32 %v3748_v61, %v2538_v32  ;;  %v2540_v51 = vadd.f32 -0.28449672, %v2536_v53  ;;  %v3678_v53 = vld [vmem:[%s4902_s20 + $0x28] sm:$0xff]  }
0x168c   :  { %v2545_v37 = vadd.f32 0.2548296, %v2541_v30  ;;  %v2543_v46 = vmul.f32 %v3750_v6, %v2539_v48  ;;  %v3677_v48 = vld [vmem:[%s4902_s20 + $0x20] sm:$0xff]  }
0x168d   :  { %v2546_v43 = vadd.f32 0.2548296, %v2542_v12  ;;  %v2544_v24 = vmul.f32 %v3752_v10, %v2540_v51  ;;  %v3673_v12 = vld [vmem:[%s4902_s20] sm:$0xff]  }
0x168e   :  { %v2549_v45 = vmul.f32 %v3746_v3, %v2545_v37  ;;  %v2547_v33 = vadd.f32 0.2548296, %v2543_v46  ;;  %3421 = vmatpush3.bf16.msra.mxu1 %v3673_v12  ;;  %v3674_v37 = vld [vmem:[%s4902_s20 + $0x8] sm:$0xff]  }
0x168f   :  { %v2550_v58 = vmul.f32 %v3748_v61, %v2546_v43  ;;  %v2548_v39 = vadd.f32 0.2548296, %v2544_v24  ;;  %3422 = vmatprep.subr.bf16.mxu1 %v4141_v62  ;;  %v3679_v43 = vld [vmem:[%s4902_s20 + $0x30] sm:$0xff]  }
0x1690   :  { %v2569_v20 = vmul.f32 %v3754_v57, %v2549_v45  ;;  %v2551_v1 = vmul.f32 %v3750_v6, %v2547_v33  ;;  %v2489_v6 = vmul.f32 0.5, %v4805_v31  ;;  %v3680_v45 = vld [vmem:[%s4902_s20 + $0x38] sm:$0xff]  }
0x1691   :  { %v2570_v52 = vmul.f32 %v3756_v60, %v2550_v58  ;;  %v2552_v49 = vmul.f32 %v3752_v10, %v2548_v39 }
0x1692   :  { %v2573_v54 = vsub.f32 1.0, %v2569_v20  ;;  %v2571_v63 = vmul.f32 %v3758_v59, %v2551_v1  ;;  %3423 = vmatpush3.bf16.msra.mxu1 %v3674_v37 }
0x1693   :  { %v2574_v42 = vsub.f32 1.0, %v2570_v52  ;;  %v2572_v61 = vmul.f32 %v3760_v5, %v2552_v49  ;;  %3424 = vmatprep.subr.bf16.mxu1 %v4141_v62 }
0x1694   :  { %v2581_v4 = vsub.f32 0.0, %v2573_v54  ;;  %v2575_v55 = vsub.f32 1.0, %v2571_v63 }
0x1695   :  { %v2582_v3 = vsub.f32 0.0, %v2574_v42  ;;  %v2576_v2 = vsub.f32 1.0, %v2572_v61 }
0x1696   :  { %v2585_v0 = vsel %vm2577_vm13, %v2573_v54, %v2581_v4  ;;  %v2583_v7 = vsub.f32 0.0, %v2575_v55  ;;  %v3123_v4 = vld [vmem:[#allocation20 + $0x1] ss:$0 sm:$0xff] }
0x1697   :  { %v2586_v50 = vsel %vm2578_vm14, %v2574_v42, %v2582_v3  ;;  %v2589_v9 = vadd.f32 1.0, %v2585_v0  ;;  %v2584_v13 = vsub.f32 0.0, %v2576_v2  ;;  %v3124_v0 = vld [vmem:[#allocation22 + $0x1] ss:$0 sm:$0xff] }
0x1698   :  { %v2587_v19 = vsel %vm2579_vm15, %v2575_v55, %v2583_v7  ;;  %v2590_v10 = vadd.f32 1.0, %v2586_v50 }
0x1699   :  { %v2591_v38 = vadd.f32 1.0, %v2587_v19  ;;  %v2588_v22 = vsel %vm2580_vm0, %v2576_v2, %v2584_v13  ;;  %v2593_v40 = vmul.f32 %v2589_v9, %v2489_v6 }
0x169a   :  { %v2592_v11 = vadd.f32 1.0, %v2588_v22  ;;  %v2594_v17 = vmul.f32 %v2590_v10, %v2490_v18 }
0x169b   :  { %v2595_v23 = vmul.f32 %v2591_v38, %v2491_v15  ;;  %v3125_v15 = vld [vmem:[#allocation23] ss:$0 sm:$0xff] }
0x169c   :  { %v2596_v27 = vmul.f32 %v2592_v11, %v2492_v25 }
0x169d   :  { %v2632_v56 = vpack.c.bf16 %v2595_v23, %v2593_v40 }
0x169e   :  { %v2633_v31 = vpack.c.bf16 %v2596_v27, %v2594_v17 }
0x16a0   :  { %2768 = vmatprep.mubr.bf16.mxu0 %v2633_v31 }
0x16a1   :  { %2769 = vmatmul.mubr.bf16.vlgmr.msra.gmra.mrb[24].mxu0 %v2632_v56 }
0x1774   :  { %v3242_v26 = vpop.f32.mrb[24].mxu0 }
0x1775   :  { %v3243_v47 = vpop.f32.mrb[25].mxu0 }
0x1776   :  { %v3244_v34 = vadd.f32 %v3243_v47, %v3242_v26  ;;  %v3245_v14 = vpop.f32.mrb[26].mxu0 }
0x1777   :  { %v3246_v44 = vpop.f32.mrb[27].mxu0 }
0x1778   :  { %v2771_v29 = vadd.f32 %v3244_v34, %v3106_v28  ;;  %v3247_v36 = vadd.f32 %v3246_v44, %v3245_v14 }
0x177a   :  { %v2774_v32 = vadd.f32 %v3247_v36, %v3106_v28  ;;  %v2777_v30 = vadd.f32 %v2771_v29, %v4792_v8  ;;  %v3675_v8 = vld [vmem:[%s4902_s20 + $0x10] sm:$0xff]  }
0x177b   :  { %3425 = vmatpush3.bf16.msra.mxu1 %v3675_v8 }
0x177c   :  { %2783 = vadd.xlane.f32.xlu0 %v2777_v30  ;;  %v2778_v41 = vadd.f32 %v2774_v32, %v4794_v16  ;;  %v2789_v35 = vmul.f32 %v2777_v30, %v2777_v30  ;;  %3426 = vmatprep.subr.bf16.mxu1 %v4141_v62  ;;  %v3676_v16 = vld [vmem:[%s4902_s20 + $0x18] sm:$0xff]   ;;  %s4143_s20 = smov [#allocation25]  }
0x177d   :  { %s2952_s29 = sshll.u32 %s4143_s20, 4  ;;  %s2953_s29 = int_to_ptr.vmem [resolvable:$true] %s2952_s29 }
0x177e   :  { %2785 = vadd.xlane.f32.xlu1 %v2778_v41  ;;  %v2790_v21 = vmul.f32 %v2778_v41, %v2778_v41  ;;  %s4075_s23 = scalar_lea.vmem %s2953_s29, 32  ;;  %p4080_p1 = scmp.lt.s32.totalorder %s2953_s29, %s2953_s29 }
0x177f   :  { %3427 = vmatpush3.bf16.msra.mxu1 %v3676_v16  ;;  %p4076_p0 = scmp.ne.s32.totalorder %s2953_s29, %s4075_s23  ;;  %p4081_p2 = scmp.lt.s32.totalorder %s4075_s23, %s4075_s23 }
0x1780   :  { %2791 = vadd.xlane.f32.xlu0 %v2789_v35  ;;  %3428 = vmatprep.subr.bf16.mxu1 %v4141_v62 }
0x1781   :  { %p4082_p3 = por %p4081_p2, %p4080_p1 }
0x1782   :  { %2793 = vadd.xlane.f32.xlu1 %v2790_v21 }
0x1783   :  { %3429 = vmatpush3.bf16.msra.mxu1 %v3677_v48  ;;  %p4083_p4 = pnand %p4082_p3, %p4076_p0 }
0x1784   :  { %3430 = vmatprep.subr.bf16.mxu1 %v4141_v62 }
0x1787   :  { %3431 = vmatpush3.bf16.msra.mxu1 %v3678_v53 }
0x1788   :  { %3432 = vmatprep.subr.bf16.mxu1 %v4141_v62 }
0x178b   :  { %3433 = vmatpush3.bf16.msra.mxu1 %v3679_v43 }
0x178c   :  { %3434 = vmatprep.subr.bf16.mxu1 %v4141_v62 }
0x178f   :  { %3435 = vmatpush3.bf16.msra.mxu1 %v3680_v45 }
0x1809   :  { %v2784_v46 = vpop.xlane.xlu0 %2783 }
0x180a   :  { %v2787_v51 = vmul.f32 0.0078125, %v2784_v46 }
0x180b   :  { %v2786_v57 = vpop.xlane.xlu1 %2785 }
0x180c   :  { %v2788_v58 = vmul.f32 0.0078125, %v2786_v57  ;;  %v2797_v20 = vmul.f32 %v2787_v51, %v2787_v51 }
0x180d   :  { %v2792_v60 = vpop.xlane.xlu0 %2791 }
0x180e   :  { %v2795_v33 = vmul.f32 0.0078125, %v2792_v60  ;;  %v2798_v52 = vmul.f32 %v2788_v58, %v2788_v58 }
0x180f   :  { %v2794_v24 = vpop.xlane.xlu1 %2793 }
0x1810   :  { %v2799_v54 = vsub.f32 %v2795_v33, %v2797_v20  ;;  %v2796_v1 = vmul.f32 0.0078125, %v2794_v24 }
0x1812   :  { %v2801_v39 = vadd.f32 1e-12, %v2799_v54  ;;  %v2800_v59 = vsub.f32 %v2796_v1, %v2798_v52 }
0x1814   :  { %3761 = vrsqrt.f32 %v2801_v39  ;;  %v2802_v42 = vadd.f32 1e-12, %v2800_v59 }
0x1816   :  { %3763 = vrsqrt.f32 %v2802_v42 }
0x181e   :  { %v3762_v63 = vpop.eup %3761 }
0x181f   :  { %v2811_v62 = vmul.f32 %v3762_v63, %v3123_v4 }
0x1820   :  { %v3764_v49 = vpop.eup %3763 }
0x1821   :  { %v2815_v5 = vmul.f32 %v2811_v62, %v2787_v51  ;;  %v2812_v3 = vmul.f32 %v3764_v49, %v3123_v4  ;;  %v2813_v2 = vmul.f32 %v2811_v62, %v2777_v30 }
0x1823   :  { %v2816_v55 = vmul.f32 %v2812_v3, %v2788_v58  ;;  %v2814_v61 = vmul.f32 %v2812_v3, %v2778_v41  ;;  %v2823_v50 = vsub.f32 %v3124_v0, %v2815_v5 }
0x1825   :  { %v2824_v7 = vsub.f32 %v3124_v0, %v2816_v55  ;;  %v2825_v6 = vadd.f32 %v2823_v50, %v2813_v2 }
0x1827   :  { %v2826_v9 = vadd.f32 %v2824_v7, %v2814_v61 }
0x1829   :  { %v2828_v19 = vrot.slane %v2826_v9, 7 }
0x182b   :  { %v2831_v13 = vsel %vm2830_vm1, %v2825_v6, %v2828_v19 }
0x182c   :  { %v2849_v10 = vpack.c.bf16 %v2831_v13, %v2831_v13 }
0x182e   :  { %3437 = vmatmul.mubr.bf16.vlgmr.msra.gmra.mrb[48].mxu1 %v2849_v10 }
0x1901   :  { %v2938_v38 = vpop.f32.mrb[48].mxu1 }
0x1902   :  { %v2939_v18 = vadd.f32 %v3125_v15, %v2938_v38  ;;  %v3438_v22 = vpop.f32.mrb[49].mxu1 }
0x1903   :  { %v2941_v40 = vpop.f32.mrb[50].mxu1 }
0x1904   :  { %3765 = vtanh.f32 %v2939_v18  ;;  %v3439_v23 = vpop.f32.mrb[51].mxu1 }
0x190e   :  { %v3766_v25 = vpop.eup %3765 }
0x190f   :  { %2945 = vst [vmem:[#allocation25] sm:$0x3] %v3766_v25 }
0x1910   :  { %4086 = shalt.err (!%p4083_p4)
}
0x1911   :  { %s4087_s0 = scalar_lea.hbm %s4904_s22, 32 }
0x1912   :  { %p4088_p5 = scmp.ne.s32.totalorder %s4904_s22, %s4087_s0  ;;  %p4091_p6 = scmp.lt.u32.totalorder %s4087_s0, %s4904_s22 }
0x1914   :  { %p4093_p7 = pnand %p4091_p6, %p4088_p5 }
0x1916   :  { %4096 = shalt.err (!%p4093_p7)
}
0x1917   :  { %2955 = dma.vmem_to_hbm [thread:$0]  %s2953_s29, 32, %s4904_s22, [#allocation4]  }
0x1918   :  { %4113 = dma.done.wait [#allocation4], 32  }
0x1919   :  { %4114 = vsyncadd [#allocation4], 4294967264 }
0x191a   :  { %2959 = vsyncpa [#allocation3], 1 }
0x191b   :  { %2960 = vsyncpa [#allocation6], 1 }
0x191c   :  { %2961 = vsyncpa [#allocation9], 1 }
0x191d   :  { %2962 = vsyncpa [#allocation12], 1 }
0x191e   :  { %2963 = vsyncpa [#allocation15], 1 }
0x191f   :  { %2964 = vsyncpa [#allocation18], 1 }
0x1920   :  { %2965 = vsyncpa [#allocation21], 1 }
0x1921   :  { %2966 = vsyncpa [#allocation24], 1 }
0x1922   :  { %2967 = vsyncpa [#allocation4], 1 }

</bundles_post_ra>
